<compile_context>
chip_gen: v6e
topology: v6e:2x2x1
jax: 0.10.0
libtpu: 0.0.40
codegen_flags: <defaults>
</compile_context>

<pallas_src>
import jax
import jax.numpy as jnp
import numpy as np
from jax.experimental import pallas as pl
from jax.experimental.pallas import tpu as pltpu


# ----------------------------------------------------------------------------
# Activation (used inside the kernel, the XLA-side Cond_Net and the reference)
# ----------------------------------------------------------------------------

def _activation(x, act):
    if act == "gelu":
        # TODO(synk): tanh-approx GELU (PyTorch nn.GELU default is exact erf).
        return jax.nn.gelu(x, approximate=True)
    if act == "relu":
        return jnp.maximum(x, 0.0)
    return x


# ----------------------------------------------------------------------------
# Fully fused Mixer_Core kernel (all Mixer3D stages in one pallas_call)
# ----------------------------------------------------------------------------

def _make_core_kernel(plan, act):
    """plan: tuple of (n_r, n_a, n_v, has_shift, res_conn) per Mixer3D stage.

    Ref layout (inputs then output):
        z_ref                              : (1, R*A, V)  state block (one batch elem)
        per stage:
          [pos_ra, pos_v, sc_ra, sc_v]     : (1, RA, 1) / (1, 1, V)   (if has_shift)
          r-mix weights                    : n_r * (W_kron bf16, b_col f32)
          a-mix weights                    : n_a * (W_kron bf16, b_col f32)
          v-mix weights                    : n_v * (W bf16, b_row f32)
        out_ref                            : (1, R'*A', V')
    """

    def kernel(*refs):
        idx = 0
        z_ref = refs[idx]; idx += 1
        out_ref = refs[-1]

        z = z_ref[0].astype(jnp.float32)                       # (R*A, V)

        def run_mlp(h, wb_refs, left):
            n_layers = len(wb_refs) // 2
            for li in range(n_layers):
                w = wb_refs[2 * li][...]                        # bf16 (MXU input)
                b = wb_refs[2 * li + 1][...]                    # f32 epilogue
                hc = h.astype(w.dtype)
                if left:   # token mix: block-diag weight on the left, V stays in lanes
                    h = jnp.dot(w, hc, preferred_element_type=jnp.float32) + b
                else:      # channel (v) mix
                    h = jnp.dot(hc, w, preferred_element_type=jnp.float32) + b
                if li < n_layers - 1:
                    h = _activation(h, act)
            return h

        for (n_r, n_a, n_v, has_shift, res_conn) in plan:
            if has_shift:
                pra = refs[idx][0]; pv = refs[idx + 1][0]
                sra = refs[idx + 2][0]; sv = refs[idx + 3][0]
                idx += 4
                # shift = pos_emb + z * scale_emb, broadcast from small per-axis
                # vectors entirely in VMEM (never materialized full-size in HBM).
                pos = pra + pv                                   # (RA,1)+(1,V) -> (RA,V)
                scl = sra + sv
                z = z + pos + z * scl

            r_refs = refs[idx: idx + 2 * n_r]; idx += 2 * n_r
            a_refs = refs[idx: idx + 2 * n_a]; idx += 2 * n_a
            v_refs = refs[idx: idx + 2 * n_v]; idx += 2 * n_v

            h = run_mlp(z, r_refs, left=True)
            if res_conn and h.shape == z.shape:
                h = h + z
            z = h

            h = run_mlp(z, a_refs, left=True)
            if res_conn and h.shape == z.shape:
                h = h + z
            z = h

            h = run_mlp(z, v_refs, left=False)
            if res_conn and h.shape == z.shape:
                h = h + z
            z = h

        out_ref[0] = z.astype(out_ref.dtype)

    return kernel


def _prep_stage_weights(mlp_r, mlp_a, mlp_v, a_in, mxu_dtype):
    """Expand the tiny token-mixing weights into block-diagonal (Kronecker) form
    so each mix is a single lane-dense 2-D matmul on the (R*A, V) slab.
    TODO(synk): kron expansion grows as A*|W_r| / R*|W_a|; token dims here are
      small so this stays a few KiB of resident VMEM.
    Returns (weight_list, R_out, A_out, V_out)."""
    r_out = mlp_r[-1][0].shape[1]
    a_out = mlp_a[-1][0].shape[1]
    v_out = mlp_v[-1][0].shape[1]

    ws = []
    eye_a = jnp.eye(a_in, dtype=jnp.float32)
    for (w, b) in mlp_r:
        ws.append(jnp.kron(w.T.astype(jnp.float32), eye_a).astype(mxu_dtype))
        ws.append(jnp.repeat(b.reshape(-1), a_in)[:, None].astype(jnp.float32))
    eye_r = jnp.eye(r_out, dtype=jnp.float32)
    for (w, b) in mlp_a:
        ws.append(jnp.kron(eye_r, w.T.astype(jnp.float32)).astype(mxu_dtype))
        ws.append(jnp.tile(b.reshape(-1), r_out)[:, None].astype(jnp.float32))
    for (w, b) in mlp_v:
        ws.append(w.astype(mxu_dtype))
        ws.append(b.reshape(1, -1).astype(jnp.float32))
    return ws, r_out, a_out, v_out


# ----------------------------------------------------------------------------
# Cond_Net (tiny -> plain XLA, no Pallas launches)
# ----------------------------------------------------------------------------

def cond_net_forward(p, c, act="gelu"):
    def mlp(h, layers):
        for i, (w, b) in enumerate(layers):
            h = h @ w + b
            if i < len(layers) - 1:
                h = _activation(h, act)
        return h

    outs = []
    for axis in ("r", "a", "v"):
        o = mlp(c, p[axis])
        d = o.shape[-1] // 2
        outs.append((o[:, :d], o[:, d:]))
    return outs  # [(pos_r, sc_r), (pos_a, sc_a), (pos_v, sc_v)]


# ----------------------------------------------------------------------------
# Mixer_Core forward: one fused Pallas kernel for the whole stack
# ----------------------------------------------------------------------------

def mixer_core_forward(params, x_in, c_in=None, act="gelu", mxu_dtype=jnp.bfloat16):
    B, R, A, V = x_in.shape
    z2 = x_in.reshape(B, R * A, V)          # free row-major reshape (channels-last)

    plan = []
    args = [z2]
    in_specs = [pl.BlockSpec((1, R * A, V), lambda b: (b, 0, 0))]

    def add_weights(ws):
        for w in ws:
            args.append(w)
            in_specs.append(pl.BlockSpec(w.shape, lambda b: (0, 0)))

    r_c, a_c, v_c = R, A, V
    for layer in params["layers"]:
        has_shift = c_in is not None
        if has_shift:
            (pr, sr), (pa, sa), (pv, sv) = cond_net_forward(layer["cond"], c_in, act)
            # Fold r/a conditioning into small (B, R*A, 1) columns; keep v
            # conditioning as (B, 1, V) rows; the kernel broadcasts in VMEM.
            ra = r_c * a_c
            pos_ra = (pr[:, :, None] + pa[:, None, :]).reshape(B, ra, 1)
            sc_ra = (sr[:, :, None] + sa[:, None, :]).reshape(B, ra, 1)
            args += [pos_ra, pv[:, None, :], sc_ra, sv[:, None, :]]
            in_specs += [
                pl.BlockSpec((1, ra, 1), lambda b: (b, 0, 0)),
                pl.BlockSpec((1, 1, v_c), lambda b: (b, 0, 0)),
                pl.BlockSpec((1, ra, 1), lambda b: (b, 0, 0)),
                pl.BlockSpec((1, 1, v_c), lambda b: (b, 0, 0)),
            ]
        m = layer["mixer"]
        ws, r_c, a_c, v_c = _prep_stage_weights(m["mlp_r"], m["mlp_a"], m["mlp_v"],
                                                a_c, mxu_dtype)
        add_weights(ws)
        plan.append((len(m["mlp_r"]), len(m["mlp_a"]), len(m["mlp_v"]),
                     has_shift, params["res_conn"]))

    if params["decoder"] is not None:
        m = params["decoder"]
        ws, r_c, a_c, v_c = _prep_stage_weights(m["mlp_r"], m["mlp_a"], m["mlp_v"],
                                                a_c, mxu_dtype)
        add_weights(ws)
        plan.append((len(m["mlp_r"]), len(m["mlp_a"]), len(m["mlp_v"]), False, False))

    out_specs = pl.BlockSpec((1, r_c * a_c, v_c), lambda b: (b, 0, 0))
    out_shape = jax.ShapeDtypeStruct((B, r_c * a_c, v_c), x_in.dtype)

    # Explicit VMEM budget: double-buffered state blocks + resident weights,
    # clamped well under the smallest physical VMEM (64 MiB on v7x).
    blk_bytes = (R * A * V + r_c * a_c * v_c) * 4
    w_bytes = sum(int(a.size) * a.dtype.itemsize for a in args[1:])
    vmem_limit = int(min(48 * 1024 * 1024,
                         max(16 * 1024 * 1024,
                             4 * blk_bytes + 2 * w_bytes + (4 << 20))))

    kernel = _make_core_kernel(tuple(plan), act)
    out = pl.pallas_call(
        kernel,
        grid=(B,),
        in_specs=in_specs,
        out_specs=out_specs,
        out_shape=out_shape,
        compiler_params=pltpu.CompilerParams(
            dimension_semantics=("parallel",),
            vmem_limit_bytes=vmem_limit),
    )(*args)
    return out.reshape(B, r_c, a_c, v_c)


# ----------------------------------------------------------------------------
# Pure-JAX reference (mirrors the kernel's bf16 matmul operand rounding)
# ----------------------------------------------------------------------------

def mixer_core_reference(params, x_in, c_in=None, act="gelu", mxu_dtype=jnp.bfloat16):
    z = x_in.astype(jnp.float32)                                 # (B, R, A, V)

    def mix(h, layers, axis):
        n = len(layers)
        for i, (w, b) in enumerate(layers):
            wq = w.astype(mxu_dtype)
            hq = h.astype(mxu_dtype)
            if axis == "r":
                h = jnp.einsum("brav,rs->bsav", hq, wq,
                               preferred_element_type=jnp.float32)
                h = h + b.reshape(1, -1, 1, 1)
            elif axis == "a":
                h = jnp.einsum("brav,as->brsv", hq, wq,
                               preferred_element_type=jnp.float32)
                h = h + b.reshape(1, 1, -1, 1)
            else:
                h = jnp.einsum("brav,vs->bras", hq, wq,
                               preferred_element_type=jnp.float32)
                h = h + b.reshape(1, 1, 1, -1)
            if i < n - 1:
                h = _activation(h, act)
        return h

    def stage(z, m, shift, res_conn):
        if shift is not None:
            z = z + shift
        for axis, key in (("r", "mlp_r"), ("a", "mlp_a"), ("v", "mlp_v")):
            h = mix(z, m[key], axis)
            if res_conn and h.shape == z.shape:
                h = h + z
            z = h
        return z

    for layer in params["layers"]:
        shift = None
        if c_in is not None:
            (pr, sr), (pa, sa), (pv, sv) = cond_net_forward(layer["cond"], c_in, act)
            pos = pr[:, :, None, None] + pa[:, None, :, None] + pv[:, None, None, :]
            scl = sr[:, :, None, None] + sa[:, None, :, None] + sv[:, None, None, :]
            shift = pos + z * scl
        z = stage(z, layer["mixer"], shift, params["res_conn"])
    if params["decoder"] is not None:
        z = stage(z, params["decoder"], None, False)
    return z


# ----------------------------------------------------------------------------
# Parameter initialization (deterministic, xavier-normal with gain)
# ----------------------------------------------------------------------------

def _xavier_normal(key, fan_in, fan_out, gain):
    std = gain * jnp.sqrt(2.0 / (fan_in + fan_out))
    return (std * jax.random.normal(key, (fan_in, fan_out))).astype(jnp.float32)


def init_mlp(key, dims, gain):
    layers = []
    for i in range(len(dims) - 1):
        key, k = jax.random.split(key)
        w = _xavier_normal(k, dims[i], dims[i + 1], gain)
        b = jnp.zeros((1, dims[i + 1]), jnp.float32)
        layers.append((w, b))
    return layers


def init_mixer3d(key, dim_x0, dim_x1, dim_x2, mlp_ratio, mlp_layers, gain):
    kr, ka, kv = jax.random.split(key, 3)

    def dims(d_in, d_out):
        return [d_in] + [mlp_ratio * d_in] * mlp_layers + [d_out]

    return {"mlp_r": init_mlp(kr, dims(dim_x0[0], dim_x0[1]), gain),
            "mlp_a": init_mlp(ka, dims(dim_x1[0], dim_x1[1]), gain),
            "mlp_v": init_mlp(kv, dims(dim_x2[0], dim_x2[1]), gain)}


def init_cond_net(key, dim_r_i, dim_a_i, dim_v_i, dim_c, gain=1.4):
    kr, ka, kv = jax.random.split(key, 3)
    return {"r": init_mlp(kr, [dim_c, 8, 16, 2 * dim_r_i], gain),
            "a": init_mlp(ka, [dim_c, 8, 16, 2 * dim_a_i], gain),
            "v": init_mlp(kv, [dim_c, 8, 16, 2 * dim_v_i], gain)}


def init_mixer_core(key, dim_v, dim_r, dim_a, dim_c, mlp_ratio, mlp_layers,
                    res_conn=True, decoder=False):
    layers = []
    for i in range(len(dim_r) - 1):
        key, km, kc = jax.random.split(key, 3)
        layers.append({
            "mixer": init_mixer3d(km, dim_r[i:i + 2], dim_a[i:i + 2],
                                  dim_v[i:i + 2], mlp_ratio, mlp_layers, gain=1.0),
            "cond": init_cond_net(kc, dim_r[i], dim_a[i], dim_v[i], dim_c, gain=1.4),
        })
    params = {"layers": layers, "res_conn": res_conn, "decoder": None}
    if decoder:
        key, kd = jax.random.split(key)
        params["decoder"] = init_mixer3d(kd, [dim_r[-1]] * 2, [dim_a[-1]] * 2,
                                         [dim_v[-1]] * 2, mlp_ratio, mlp_layers,
                                         gain=1.0)
    return params


# ----------------------------------------------------------------------------
# Example
# ----------------------------------------------------------------------------

if __name__ == "__main__":
    key = jax.random.PRNGKey(0)
    kp, kx, kc = jax.random.split(key, 3)

    # Two Mixer3D layers + decoder => three fused stages in ONE pallas_call.
    dim_r = [8, 8, 8]
    dim_a = [8, 8, 8]
    dim_v = [16, 16, 16]
    dim_c = 4
    mlp_ratio = 2
    mlp_layers = 1

    params = init_mixer_core(kp, dim_v, dim_r, dim_a, dim_c,
                             mlp_ratio=mlp_ratio, mlp_layers=mlp_layers,
                             res_conn=True, decoder=True)

    B = 2
    x = jax.random.normal(kx, (B, dim_r[0], dim_a[0], dim_v[0]), jnp.float32)
    c = jax.random.normal(kc, (B, dim_c), jnp.float32)

    fwd = jax.jit(lambda x_in, c_in: mixer_core_forward(params, x_in, c_in))
    out = fwd(x, c)
    jax.block_until_ready(out)
    assert out.shape == (B, dim_r[-1], dim_a[-1], dim_v[-1])

    ref = jax.jit(lambda x_in, c_in: mixer_core_reference(params, x_in, c_in))(x, c)
    jax.block_until_ready(ref)
    np.testing.assert_allclose(np.asarray(out), np.asarray(ref),
                               rtol=2e-2, atol=2e-2)
    print("KERNEL_OK")
</pallas_src>

<mosaic_0001>
module attributes {stable_mosaic.version = 11 : i64} {
  func.func @kernel(%arg0: i32, %arg1: memref<1x64x16xf32, #tpu.memory_space<vmem>>, %arg2: memref<1x64x1xf32, #tpu.memory_space<vmem>>, %arg3: memref<1x1x16xf32, #tpu.memory_space<vmem>>, %arg4: memref<1x64x1xf32, #tpu.memory_space<vmem>>, %arg5: memref<1x1x16xf32, #tpu.memory_space<vmem>>, %arg6: memref<128x64xbf16, #tpu.memory_space<vmem>>, %arg7: memref<128x1xf32, #tpu.memory_space<vmem>>, %arg8: memref<64x128xbf16, #tpu.memory_space<vmem>>, %arg9: memref<64x1xf32, #tpu.memory_space<vmem>>, %arg10: memref<128x64xbf16, #tpu.memory_space<vmem>>, %arg11: memref<128x1xf32, #tpu.memory_space<vmem>>, %arg12: memref<64x128xbf16, #tpu.memory_space<vmem>>, %arg13: memref<64x1xf32, #tpu.memory_space<vmem>>, %arg14: memref<16x32xbf16, #tpu.memory_space<vmem>>, %arg15: memref<1x32xf32, #tpu.memory_space<vmem>>, %arg16: memref<32x16xbf16, #tpu.memory_space<vmem>>, %arg17: memref<1x16xf32, #tpu.memory_space<vmem>>, %arg18: memref<1x64x1xf32, #tpu.memory_space<vmem>>, %arg19: memref<1x1x16xf32, #tpu.memory_space<vmem>>, %arg20: memref<1x64x1xf32, #tpu.memory_space<vmem>>, %arg21: memref<1x1x16xf32, #tpu.memory_space<vmem>>, %arg22: memref<128x64xbf16, #tpu.memory_space<vmem>>, %arg23: memref<128x1xf32, #tpu.memory_space<vmem>>, %arg24: memref<64x128xbf16, #tpu.memory_space<vmem>>, %arg25: memref<64x1xf32, #tpu.memory_space<vmem>>, %arg26: memref<128x64xbf16, #tpu.memory_space<vmem>>, %arg27: memref<128x1xf32, #tpu.memory_space<vmem>>, %arg28: memref<64x128xbf16, #tpu.memory_space<vmem>>, %arg29: memref<64x1xf32, #tpu.memory_space<vmem>>, %arg30: memref<16x32xbf16, #tpu.memory_space<vmem>>, %arg31: memref<1x32xf32, #tpu.memory_space<vmem>>, %arg32: memref<32x16xbf16, #tpu.memory_space<vmem>>, %arg33: memref<1x16xf32, #tpu.memory_space<vmem>>, %arg34: memref<128x64xbf16, #tpu.memory_space<vmem>>, %arg35: memref<128x1xf32, #tpu.memory_space<vmem>>, %arg36: memref<64x128xbf16, #tpu.memory_space<vmem>>, %arg37: memref<64x1xf32, #tpu.memory_space<vmem>>, %arg38: memref<128x64xbf16, #tpu.memory_space<vmem>>, %arg39: memref<128x1xf32, #tpu.memory_space<vmem>>, %arg40: memref<64x128xbf16, #tpu.memory_space<vmem>>, %arg41: memref<64x1xf32, #tpu.memory_space<vmem>>, %arg42: memref<16x32xbf16, #tpu.memory_space<vmem>>, %arg43: memref<1x32xf32, #tpu.memory_space<vmem>>, %arg44: memref<32x16xbf16, #tpu.memory_space<vmem>>, %arg45: memref<1x16xf32, #tpu.memory_space<vmem>>, %arg46: memref<1x64x16xf32, #tpu.memory_space<vmem>>) attributes {dimension_semantics = [#tpu.dimension_semantics<parallel>], iteration_bounds = array<i64: 2>, scalar_prefetch = 0 : i64, scratch_operands = 0 : i64, tpu.core_type = #tpu.core_type<tc>, window_params = [{transform_indices = @transform_0, window_bounds = array<i64: 1, 64, 16>}, {transform_indices = @transform_1, window_bounds = array<i64: 1, 64, 1>}, {transform_indices = @transform_2, window_bounds = array<i64: 1, 1, 16>}, {transform_indices = @transform_3, window_bounds = array<i64: 1, 64, 1>}, {transform_indices = @transform_4, window_bounds = array<i64: 1, 1, 16>}, {pipeline_mode = #tpu.pipeline_mode<synchronous>, transform_indices = @transform_5, window_bounds = array<i64: 128, 64>}, {pipeline_mode = #tpu.pipeline_mode<synchronous>, transform_indices = @transform_6, window_bounds = array<i64: 128, 1>}, {pipeline_mode = #tpu.pipeline_mode<synchronous>, transform_indices = @transform_7, window_bounds = array<i64: 64, 128>}, {pipeline_mode = #tpu.pipeline_mode<synchronous>, transform_indices = @transform_8, window_bounds = array<i64: 64, 1>}, {pipeline_mode = #tpu.pipeline_mode<synchronous>, transform_indices = @transform_9, window_bounds = array<i64: 128, 64>}, {pipeline_mode = #tpu.pipeline_mode<synchronous>, transform_indices = @transform_10, window_bounds = array<i64: 128, 1>}, {pipeline_mode = #tpu.pipeline_mode<synchronous>, transform_indices = @transform_11, window_bounds = array<i64: 64, 128>}, {pipeline_mode = #tpu.pipeline_mode<synchronous>, transform_indices = @transform_12, window_bounds = array<i64: 64, 1>}, {pipeline_mode = #tpu.pipeline_mode<synchronous>, transform_indices = @transform_13, window_bounds = array<i64: 16, 32>}, {pipeline_mode = #tpu.pipeline_mode<synchronous>, transform_indices = @transform_14, window_bounds = array<i64: 1, 32>}, {pipeline_mode = #tpu.pipeline_mode<synchronous>, transform_indices = @transform_15, window_bounds = array<i64: 32, 16>}, {pipeline_mode = #tpu.pipeline_mode<synchronous>, transform_indices = @transform_16, window_bounds = array<i64: 1, 16>}, {transform_indices = @transform_17, window_bounds = array<i64: 1, 64, 1>}, {transform_indices = @transform_18, window_bounds = array<i64: 1, 1, 16>}, {transform_indices = @transform_19, window_bounds = array<i64: 1, 64, 1>}, {transform_indices = @transform_20, window_bounds = array<i64: 1, 1, 16>}, {pipeline_mode = #tpu.pipeline_mode<synchronous>, transform_indices = @transform_21, window_bounds = array<i64: 128, 64>}, {pipeline_mode = #tpu.pipeline_mode<synchronous>, transform_indices = @transform_22, window_bounds = array<i64: 128, 1>}, {pipeline_mode = #tpu.pipeline_mode<synchronous>, transform_indices = @transform_23, window_bounds = array<i64: 64, 128>}, {pipeline_mode = #tpu.pipeline_mode<synchronous>, transform_indices = @transform_24, window_bounds = array<i64: 64, 1>}, {pipeline_mode = #tpu.pipeline_mode<synchronous>, transform_indices = @transform_25, window_bounds = array<i64: 128, 64>}, {pipeline_mode = #tpu.pipeline_mode<synchronous>, transform_indices = @transform_26, window_bounds = array<i64: 128, 1>}, {pipeline_mode = #tpu.pipeline_mode<synchronous>, transform_indices = @transform_27, window_bounds = array<i64: 64, 128>}, {pipeline_mode = #tpu.pipeline_mode<synchronous>, transform_indices = @transform_28, window_bounds = array<i64: 64, 1>}, {pipeline_mode = #tpu.pipeline_mode<synchronous>, transform_indices = @transform_29, window_bounds = array<i64: 16, 32>}, {pipeline_mode = #tpu.pipeline_mode<synchronous>, transform_indices = @transform_30, window_bounds = array<i64: 1, 32>}, {pipeline_mode = #tpu.pipeline_mode<synchronous>, transform_indices = @transform_31, window_bounds = array<i64: 32, 16>}, {pipeline_mode = #tpu.pipeline_mode<synchronous>, transform_indices = @transform_32, window_bounds = array<i64: 1, 16>}, {pipeline_mode = #tpu.pipeline_mode<synchronous>, transform_indices = @transform_33, window_bounds = array<i64: 128, 64>}, {pipeline_mode = #tpu.pipeline_mode<synchronous>, transform_indices = @transform_34, window_bounds = array<i64: 128, 1>}, {pipeline_mode = #tpu.pipeline_mode<synchronous>, transform_indices = @transform_35, window_bounds = array<i64: 64, 128>}, {pipeline_mode = #tpu.pipeline_mode<synchronous>, transform_indices = @transform_36, window_bounds = array<i64: 64, 1>}, {pipeline_mode = #tpu.pipeline_mode<synchronous>, transform_indices = @transform_37, window_bounds = array<i64: 128, 64>}, {pipeline_mode = #tpu.pipeline_mode<synchronous>, transform_indices = @transform_38, window_bounds = array<i64: 128, 1>}, {pipeline_mode = #tpu.pipeline_mode<synchronous>, transform_indices = @transform_39, window_bounds = array<i64: 64, 128>}, {pipeline_mode = #tpu.pipeline_mode<synchronous>, transform_indices = @transform_40, window_bounds = array<i64: 64, 1>}, {pipeline_mode = #tpu.pipeline_mode<synchronous>, transform_indices = @transform_41, window_bounds = array<i64: 16, 32>}, {pipeline_mode = #tpu.pipeline_mode<synchronous>, transform_indices = @transform_42, window_bounds = array<i64: 1, 32>}, {pipeline_mode = #tpu.pipeline_mode<synchronous>, transform_indices = @transform_43, window_bounds = array<i64: 32, 16>}, {pipeline_mode = #tpu.pipeline_mode<synchronous>, transform_indices = @transform_44, window_bounds = array<i64: 1, 16>}, {transform_indices = @transform_45, window_bounds = array<i64: 1, 64, 16>}]} {
    %c0 = arith.constant 0 : index
    %c0_0 = arith.constant 0 : index
    %c0_1 = arith.constant 0 : index
    %0 = vector.load %arg1[%c0, %c0_0, %c0_1] : memref<1x64x16xf32, #tpu.memory_space<vmem>>, vector<1x64x16xf32>
    %1 = vector.shape_cast %0 : vector<1x64x16xf32> to vector<64x16xf32>
    %c0_2 = arith.constant 0 : index
    %c0_3 = arith.constant 0 : index
    %c0_4 = arith.constant 0 : index
    %2 = vector.load %arg2[%c0_2, %c0_3, %c0_4] : memref<1x64x1xf32, #tpu.memory_space<vmem>>, vector<1x64x1xf32>
    %3 = vector.shape_cast %2 : vector<1x64x1xf32> to vector<64x1xf32>
    %c0_5 = arith.constant 0 : index
    %c0_6 = arith.constant 0 : index
    %c0_7 = arith.constant 0 : index
    %4 = vector.load %arg3[%c0_5, %c0_6, %c0_7] : memref<1x1x16xf32, #tpu.memory_space<vmem>>, vector<1x1x16xf32>
    %5 = vector.shape_cast %4 : vector<1x1x16xf32> to vector<1x16xf32>
    %c0_8 = arith.constant 0 : index
    %c0_9 = arith.constant 0 : index
    %c0_10 = arith.constant 0 : index
    %6 = vector.load %arg4[%c0_8, %c0_9, %c0_10] : memref<1x64x1xf32, #tpu.memory_space<vmem>>, vector<1x64x1xf32>
    %7 = vector.shape_cast %6 : vector<1x64x1xf32> to vector<64x1xf32>
    %c0_11 = arith.constant 0 : index
    %c0_12 = arith.constant 0 : index
    %c0_13 = arith.constant 0 : index
    %8 = vector.load %arg5[%c0_11, %c0_12, %c0_13] : memref<1x1x16xf32, #tpu.memory_space<vmem>>, vector<1x1x16xf32>
    %9 = vector.shape_cast %8 : vector<1x1x16xf32> to vector<1x16xf32>
    %10 = vector.broadcast %3 : vector<64x1xf32> to vector<64x16xf32>
    %11 = vector.broadcast %5 : vector<1x16xf32> to vector<64x16xf32>
    %12 = arith.addf %10, %11 : vector<64x16xf32>
    %13 = vector.broadcast %7 : vector<64x1xf32> to vector<64x16xf32>
    %14 = vector.broadcast %9 : vector<1x16xf32> to vector<64x16xf32>
    %15 = arith.addf %13, %14 : vector<64x16xf32>
    %16 = arith.addf %1, %12 : vector<64x16xf32>
    %17 = arith.mulf %1, %15 : vector<64x16xf32>
    %18 = arith.addf %16, %17 : vector<64x16xf32>
    %c0_14 = arith.constant 0 : index
    %c0_15 = arith.constant 0 : index
    %19 = vector.load %arg6[%c0_14, %c0_15] : memref<128x64xbf16, #tpu.memory_space<vmem>>, vector<128x64xbf16>
    %c0_16 = arith.constant 0 : index
    %c0_17 = arith.constant 0 : index
    %20 = vector.load %arg7[%c0_16, %c0_17] : memref<128x1xf32, #tpu.memory_space<vmem>>, vector<128x1xf32>
    %21 = arith.truncf %18 : vector<64x16xf32> to vector<64x16xbf16>
    %cst = arith.constant dense<0.000000e+00> : vector<128x16xf32>
    %22 = tpu.matmul %19, %21, %cst {dimension_numbers = #tpu.dot_dimension_numbers<[1], [0], [0], [1], [0, 0, 1, 1], [], []>} : vector<128x64xbf16>, vector<64x16xbf16>, vector<128x16xf32> -> vector<128x16xf32>
    %23 = vector.broadcast %20 : vector<128x1xf32> to vector<128x16xf32>
    %24 = arith.addf %22, %23 : vector<128x16xf32>
    %25 = arith.mulf %24, %24 : vector<128x16xf32>
    %26 = arith.mulf %24, %25 : vector<128x16xf32>
    %cst_18 = arith.constant 4.471500e-02 : f32
    %27 = vector.broadcast %cst_18 : f32 to vector<128x16xf32>
    %28 = arith.mulf %27, %26 : vector<128x16xf32>
    %29 = arith.addf %24, %28 : vector<128x16xf32>
    %cst_19 = arith.constant 0.797884583 : f32
    %30 = vector.broadcast %cst_19 : f32 to vector<128x16xf32>
    %31 = arith.mulf %30, %29 : vector<128x16xf32>
    %32 = math.tanh %31 : vector<128x16xf32>
    %cst_20 = arith.constant 1.000000e+00 : f32
    %33 = vector.broadcast %cst_20 : f32 to vector<128x16xf32>
    %34 = arith.addf %33, %32 : vector<128x16xf32>
    %cst_21 = arith.constant 5.000000e-01 : f32
    %35 = vector.broadcast %cst_21 : f32 to vector<128x16xf32>
    %36 = arith.mulf %35, %34 : vector<128x16xf32>
    %37 = arith.mulf %24, %36 : vector<128x16xf32>
    %c0_22 = arith.constant 0 : index
    %c0_23 = arith.constant 0 : index
    %38 = vector.load %arg8[%c0_22, %c0_23] : memref<64x128xbf16, #tpu.memory_space<vmem>>, vector<64x128xbf16>
    %c0_24 = arith.constant 0 : index
    %c0_25 = arith.constant 0 : index
    %39 = vector.load %arg9[%c0_24, %c0_25] : memref<64x1xf32, #tpu.memory_space<vmem>>, vector<64x1xf32>
    %40 = arith.truncf %37 : vector<128x16xf32> to vector<128x16xbf16>
    %cst_26 = arith.constant dense<0.000000e+00> : vector<64x16xf32>
    %41 = tpu.matmul %38, %40, %cst_26 {dimension_numbers = #tpu.dot_dimension_numbers<[1], [0], [0], [1], [0, 0, 1, 1], [], []>} : vector<64x128xbf16>, vector<128x16xbf16>, vector<64x16xf32> -> vector<64x16xf32>
    %42 = vector.broadcast %39 : vector<64x1xf32> to vector<64x16xf32>
    %43 = arith.addf %41, %42 : vector<64x16xf32>
    %44 = arith.addf %43, %18 : vector<64x16xf32>
    %c0_27 = arith.constant 0 : index
    %c0_28 = arith.constant 0 : index
    %45 = vector.load %arg10[%c0_27, %c0_28] : memref<128x64xbf16, #tpu.memory_space<vmem>>, vector<128x64xbf16>
    %c0_29 = arith.constant 0 : index
    %c0_30 = arith.constant 0 : index
    %46 = vector.load %arg11[%c0_29, %c0_30] : memref<128x1xf32, #tpu.memory_space<vmem>>, vector<128x1xf32>
    %47 = arith.truncf %44 : vector<64x16xf32> to vector<64x16xbf16>
    %cst_31 = arith.constant dense<0.000000e+00> : vector<128x16xf32>
    %48 = tpu.matmul %45, %47, %cst_31 {dimension_numbers = #tpu.dot_dimension_numbers<[1], [0], [0], [1], [0, 0, 1, 1], [], []>} : vector<128x64xbf16>, vector<64x16xbf16>, vector<128x16xf32> -> vector<128x16xf32>
    %49 = vector.broadcast %46 : vector<128x1xf32> to vector<128x16xf32>
    %50 = arith.addf %48, %49 : vector<128x16xf32>
    %51 = arith.mulf %50, %50 : vector<128x16xf32>
    %52 = arith.mulf %50, %51 : vector<128x16xf32>
    %cst_32 = arith.constant 4.471500e-02 : f32
    %53 = vector.broadcast %cst_32 : f32 to vector<128x16xf32>
    %54 = arith.mulf %53, %52 : vector<128x16xf32>
    %55 = arith.addf %50, %54 : vector<128x16xf32>
    %cst_33 = arith.constant 0.797884583 : f32
    %56 = vector.broadcast %cst_33 : f32 to vector<128x16xf32>
    %57 = arith.mulf %56, %55 : vector<128x16xf32>
    %58 = math.tanh %57 : vector<128x16xf32>
    %cst_34 = arith.constant 1.000000e+00 : f32
    %59 = vector.broadcast %cst_34 : f32 to vector<128x16xf32>
    %60 = arith.addf %59, %58 : vector<128x16xf32>
    %cst_35 = arith.constant 5.000000e-01 : f32
    %61 = vector.broadcast %cst_35 : f32 to vector<128x16xf32>
    %62 = arith.mulf %61, %60 : vector<128x16xf32>
    %63 = arith.mulf %50, %62 : vector<128x16xf32>
    %c0_36 = arith.constant 0 : index
    %c0_37 = arith.constant 0 : index
    %64 = vector.load %arg12[%c0_36, %c0_37] : memref<64x128xbf16, #tpu.memory_space<vmem>>, vector<64x128xbf16>
    %c0_38 = arith.constant 0 : index
    %c0_39 = arith.constant 0 : index
    %65 = vector.load %arg13[%c0_38, %c0_39] : memref<64x1xf32, #tpu.memory_space<vmem>>, vector<64x1xf32>
    %66 = arith.truncf %63 : vector<128x16xf32> to vector<128x16xbf16>
    %cst_40 = arith.constant dense<0.000000e+00> : vector<64x16xf32>
    %67 = tpu.matmul %64, %66, %cst_40 {dimension_numbers = #tpu.dot_dimension_numbers<[1], [0], [0], [1], [0, 0, 1, 1], [], []>} : vector<64x128xbf16>, vector<128x16xbf16>, vector<64x16xf32> -> vector<64x16xf32>
    %68 = vector.broadcast %65 : vector<64x1xf32> to vector<64x16xf32>
    %69 = arith.addf %67, %68 : vector<64x16xf32>
    %70 = arith.addf %69, %44 : vector<64x16xf32>
    %c0_41 = arith.constant 0 : index
    %c0_42 = arith.constant 0 : index
    %71 = vector.load %arg14[%c0_41, %c0_42] : memref<16x32xbf16, #tpu.memory_space<vmem>>, vector<16x32xbf16>
    %c0_43 = arith.constant 0 : index
    %c0_44 = arith.constant 0 : index
    %72 = vector.load %arg15[%c0_43, %c0_44] : memref<1x32xf32, #tpu.memory_space<vmem>>, vector<1x32xf32>
    %73 = arith.truncf %70 : vector<64x16xf32> to vector<64x16xbf16>
    %cst_45 = arith.constant dense<0.000000e+00> : vector<64x32xf32>
    %74 = tpu.matmul %73, %71, %cst_45 {dimension_numbers = #tpu.dot_dimension_numbers<[1], [0], [0], [1], [0, 0, 1, 1], [], []>} : vector<64x16xbf16>, vector<16x32xbf16>, vector<64x32xf32> -> vector<64x32xf32>
    %75 = vector.broadcast %72 : vector<1x32xf32> to vector<64x32xf32>
    %76 = arith.addf %74, %75 : vector<64x32xf32>
    %77 = arith.mulf %76, %76 : vector<64x32xf32>
    %78 = arith.mulf %76, %77 : vector<64x32xf32>
    %cst_46 = arith.constant 4.471500e-02 : f32
    %79 = vector.broadcast %cst_46 : f32 to vector<64x32xf32>
    %80 = arith.mulf %79, %78 : vector<64x32xf32>
    %81 = arith.addf %76, %80 : vector<64x32xf32>
    %cst_47 = arith.constant 0.797884583 : f32
    %82 = vector.broadcast %cst_47 : f32 to vector<64x32xf32>
    %83 = arith.mulf %82, %81 : vector<64x32xf32>
    %84 = math.tanh %83 : vector<64x32xf32>
    %cst_48 = arith.constant 1.000000e+00 : f32
    %85 = vector.broadcast %cst_48 : f32 to vector<64x32xf32>
    %86 = arith.addf %85, %84 : vector<64x32xf32>
    %cst_49 = arith.constant 5.000000e-01 : f32
    %87 = vector.broadcast %cst_49 : f32 to vector<64x32xf32>
    %88 = arith.mulf %87, %86 : vector<64x32xf32>
    %89 = arith.mulf %76, %88 : vector<64x32xf32>
    %c0_50 = arith.constant 0 : index
    %c0_51 = arith.constant 0 : index
    %90 = vector.load %arg16[%c0_50, %c0_51] : memref<32x16xbf16, #tpu.memory_space<vmem>>, vector<32x16xbf16>
    %c0_52 = arith.constant 0 : index
    %c0_53 = arith.constant 0 : index
    %91 = vector.load %arg17[%c0_52, %c0_53] : memref<1x16xf32, #tpu.memory_space<vmem>>, vector<1x16xf32>
    %92 = arith.truncf %89 : vector<64x32xf32> to vector<64x32xbf16>
    %cst_54 = arith.constant dense<0.000000e+00> : vector<64x16xf32>
    %93 = tpu.matmul %92, %90, %cst_54 {dimension_numbers = #tpu.dot_dimension_numbers<[1], [0], [0], [1], [0, 0, 1, 1], [], []>} : vector<64x32xbf16>, vector<32x16xbf16>, vector<64x16xf32> -> vector<64x16xf32>
    %94 = vector.broadcast %91 : vector<1x16xf32> to vector<64x16xf32>
    %95 = arith.addf %93, %94 : vector<64x16xf32>
    %96 = arith.addf %95, %70 : vector<64x16xf32>
    %c0_55 = arith.constant 0 : index
    %c0_56 = arith.constant 0 : index
    %c0_57 = arith.constant 0 : index
    %97 = vector.load %arg18[%c0_55, %c0_56, %c0_57] : memref<1x64x1xf32, #tpu.memory_space<vmem>>, vector<1x64x1xf32>
    %98 = vector.shape_cast %97 : vector<1x64x1xf32> to vector<64x1xf32>
    %c0_58 = arith.constant 0 : index
    %c0_59 = arith.constant 0 : index
    %c0_60 = arith.constant 0 : index
    %99 = vector.load %arg19[%c0_58, %c0_59, %c0_60] : memref<1x1x16xf32, #tpu.memory_space<vmem>>, vector<1x1x16xf32>
    %100 = vector.shape_cast %99 : vector<1x1x16xf32> to vector<1x16xf32>
    %c0_61 = arith.constant 0 : index
    %c0_62 = arith.constant 0 : index
    %c0_63 = arith.constant 0 : index
    %101 = vector.load %arg20[%c0_61, %c0_62, %c0_63] : memref<1x64x1xf32, #tpu.memory_space<vmem>>, vector<1x64x1xf32>
    %102 = vector.shape_cast %101 : vector<1x64x1xf32> to vector<64x1xf32>
    %c0_64 = arith.constant 0 : index
    %c0_65 = arith.constant 0 : index
    %c0_66 = arith.constant 0 : index
    %103 = vector.load %arg21[%c0_64, %c0_65, %c0_66] : memref<1x1x16xf32, #tpu.memory_space<vmem>>, vector<1x1x16xf32>
    %104 = vector.shape_cast %103 : vector<1x1x16xf32> to vector<1x16xf32>
    %105 = vector.broadcast %98 : vector<64x1xf32> to vector<64x16xf32>
    %106 = vector.broadcast %100 : vector<1x16xf32> to vector<64x16xf32>
    %107 = arith.addf %105, %106 : vector<64x16xf32>
    %108 = vector.broadcast %102 : vector<64x1xf32> to vector<64x16xf32>
    %109 = vector.broadcast %104 : vector<1x16xf32> to vector<64x16xf32>
    %110 = arith.addf %108, %109 : vector<64x16xf32>
    %111 = arith.addf %96, %107 : vector<64x16xf32>
    %112 = arith.mulf %96, %110 : vector<64x16xf32>
    %113 = arith.addf %111, %112 : vector<64x16xf32>
    %c0_67 = arith.constant 0 : index
    %c0_68 = arith.constant 0 : index
    %114 = vector.load %arg22[%c0_67, %c0_68] : memref<128x64xbf16, #tpu.memory_space<vmem>>, vector<128x64xbf16>
    %c0_69 = arith.constant 0 : index
    %c0_70 = arith.constant 0 : index
    %115 = vector.load %arg23[%c0_69, %c0_70] : memref<128x1xf32, #tpu.memory_space<vmem>>, vector<128x1xf32>
    %116 = arith.truncf %113 : vector<64x16xf32> to vector<64x16xbf16>
    %cst_71 = arith.constant dense<0.000000e+00> : vector<128x16xf32>
    %117 = tpu.matmul %114, %116, %cst_71 {dimension_numbers = #tpu.dot_dimension_numbers<[1], [0], [0], [1], [0, 0, 1, 1], [], []>} : vector<128x64xbf16>, vector<64x16xbf16>, vector<128x16xf32> -> vector<128x16xf32>
    %118 = vector.broadcast %115 : vector<128x1xf32> to vector<128x16xf32>
    %119 = arith.addf %117, %118 : vector<128x16xf32>
    %120 = arith.mulf %119, %119 : vector<128x16xf32>
    %121 = arith.mulf %119, %120 : vector<128x16xf32>
    %cst_72 = arith.constant 4.471500e-02 : f32
    %122 = vector.broadcast %cst_72 : f32 to vector<128x16xf32>
    %123 = arith.mulf %122, %121 : vector<128x16xf32>
    %124 = arith.addf %119, %123 : vector<128x16xf32>
    %cst_73 = arith.constant 0.797884583 : f32
    %125 = vector.broadcast %cst_73 : f32 to vector<128x16xf32>
    %126 = arith.mulf %125, %124 : vector<128x16xf32>
    %127 = math.tanh %126 : vector<128x16xf32>
    %cst_74 = arith.constant 1.000000e+00 : f32
    %128 = vector.broadcast %cst_74 : f32 to vector<128x16xf32>
    %129 = arith.addf %128, %127 : vector<128x16xf32>
    %cst_75 = arith.constant 5.000000e-01 : f32
    %130 = vector.broadcast %cst_75 : f32 to vector<128x16xf32>
    %131 = arith.mulf %130, %129 : vector<128x16xf32>
    %132 = arith.mulf %119, %131 : vector<128x16xf32>
    %c0_76 = arith.constant 0 : index
    %c0_77 = arith.constant 0 : index
    %133 = vector.load %arg24[%c0_76, %c0_77] : memref<64x128xbf16, #tpu.memory_space<vmem>>, vector<64x128xbf16>
    %c0_78 = arith.constant 0 : index
    %c0_79 = arith.constant 0 : index
    %134 = vector.load %arg25[%c0_78, %c0_79] : memref<64x1xf32, #tpu.memory_space<vmem>>, vector<64x1xf32>
    %135 = arith.truncf %132 : vector<128x16xf32> to vector<128x16xbf16>
    %cst_80 = arith.constant dense<0.000000e+00> : vector<64x16xf32>
    %136 = tpu.matmul %133, %135, %cst_80 {dimension_numbers = #tpu.dot_dimension_numbers<[1], [0], [0], [1], [0, 0, 1, 1], [], []>} : vector<64x128xbf16>, vector<128x16xbf16>, vector<64x16xf32> -> vector<64x16xf32>
    %137 = vector.broadcast %134 : vector<64x1xf32> to vector<64x16xf32>
    %138 = arith.addf %136, %137 : vector<64x16xf32>
    %139 = arith.addf %138, %113 : vector<64x16xf32>
    %c0_81 = arith.constant 0 : index
    %c0_82 = arith.constant 0 : index
    %140 = vector.load %arg26[%c0_81, %c0_82] : memref<128x64xbf16, #tpu.memory_space<vmem>>, vector<128x64xbf16>
    %c0_83 = arith.constant 0 : index
    %c0_84 = arith.constant 0 : index
    %141 = vector.load %arg27[%c0_83, %c0_84] : memref<128x1xf32, #tpu.memory_space<vmem>>, vector<128x1xf32>
    %142 = arith.truncf %139 : vector<64x16xf32> to vector<64x16xbf16>
    %cst_85 = arith.constant dense<0.000000e+00> : vector<128x16xf32>
    %143 = tpu.matmul %140, %142, %cst_85 {dimension_numbers = #tpu.dot_dimension_numbers<[1], [0], [0], [1], [0, 0, 1, 1], [], []>} : vector<128x64xbf16>, vector<64x16xbf16>, vector<128x16xf32> -> vector<128x16xf32>
    %144 = vector.broadcast %141 : vector<128x1xf32> to vector<128x16xf32>
    %145 = arith.addf %143, %144 : vector<128x16xf32>
    %146 = arith.mulf %145, %145 : vector<128x16xf32>
    %147 = arith.mulf %145, %146 : vector<128x16xf32>
    %cst_86 = arith.constant 4.471500e-02 : f32
    %148 = vector.broadcast %cst_86 : f32 to vector<128x16xf32>
    %149 = arith.mulf %148, %147 : vector<128x16xf32>
    %150 = arith.addf %145, %149 : vector<128x16xf32>
    %cst_87 = arith.constant 0.797884583 : f32
    %151 = vector.broadcast %cst_87 : f32 to vector<128x16xf32>
    %152 = arith.mulf %151, %150 : vector<128x16xf32>
    %153 = math.tanh %152 : vector<128x16xf32>
    %cst_88 = arith.constant 1.000000e+00 : f32
    %154 = vector.broadcast %cst_88 : f32 to vector<128x16xf32>
    %155 = arith.addf %154, %153 : vector<128x16xf32>
    %cst_89 = arith.constant 5.000000e-01 : f32
    %156 = vector.broadcast %cst_89 : f32 to vector<128x16xf32>
    %157 = arith.mulf %156, %155 : vector<128x16xf32>
    %158 = arith.mulf %145, %157 : vector<128x16xf32>
    %c0_90 = arith.constant 0 : index
    %c0_91 = arith.constant 0 : index
    %159 = vector.load %arg28[%c0_90, %c0_91] : memref<64x128xbf16, #tpu.memory_space<vmem>>, vector<64x128xbf16>
    %c0_92 = arith.constant 0 : index
    %c0_93 = arith.constant 0 : index
    %160 = vector.load %arg29[%c0_92, %c0_93] : memref<64x1xf32, #tpu.memory_space<vmem>>, vector<64x1xf32>
    %161 = arith.truncf %158 : vector<128x16xf32> to vector<128x16xbf16>
    %cst_94 = arith.constant dense<0.000000e+00> : vector<64x16xf32>
    %162 = tpu.matmul %159, %161, %cst_94 {dimension_numbers = #tpu.dot_dimension_numbers<[1], [0], [0], [1], [0, 0, 1, 1], [], []>} : vector<64x128xbf16>, vector<128x16xbf16>, vector<64x16xf32> -> vector<64x16xf32>
    %163 = vector.broadcast %160 : vector<64x1xf32> to vector<64x16xf32>
    %164 = arith.addf %162, %163 : vector<64x16xf32>
    %165 = arith.addf %164, %139 : vector<64x16xf32>
    %c0_95 = arith.constant 0 : index
    %c0_96 = arith.constant 0 : index
    %166 = vector.load %arg30[%c0_95, %c0_96] : memref<16x32xbf16, #tpu.memory_space<vmem>>, vector<16x32xbf16>
    %c0_97 = arith.constant 0 : index
    %c0_98 = arith.constant 0 : index
    %167 = vector.load %arg31[%c0_97, %c0_98] : memref<1x32xf32, #tpu.memory_space<vmem>>, vector<1x32xf32>
    %168 = arith.truncf %165 : vector<64x16xf32> to vector<64x16xbf16>
    %cst_99 = arith.constant dense<0.000000e+00> : vector<64x32xf32>
    %169 = tpu.matmul %168, %166, %cst_99 {dimension_numbers = #tpu.dot_dimension_numbers<[1], [0], [0], [1], [0, 0, 1, 1], [], []>} : vector<64x16xbf16>, vector<16x32xbf16>, vector<64x32xf32> -> vector<64x32xf32>
    %170 = vector.broadcast %167 : vector<1x32xf32> to vector<64x32xf32>
    %171 = arith.addf %169, %170 : vector<64x32xf32>
    %172 = arith.mulf %171, %171 : vector<64x32xf32>
    %173 = arith.mulf %171, %172 : vector<64x32xf32>
    %cst_100 = arith.constant 4.471500e-02 : f32
    %174 = vector.broadcast %cst_100 : f32 to vector<64x32xf32>
    %175 = arith.mulf %174, %173 : vector<64x32xf32>
    %176 = arith.addf %171, %175 : vector<64x32xf32>
    %cst_101 = arith.constant 0.797884583 : f32
    %177 = vector.broadcast %cst_101 : f32 to vector<64x32xf32>
    %178 = arith.mulf %177, %176 : vector<64x32xf32>
    %179 = math.tanh %178 : vector<64x32xf32>
    %cst_102 = arith.constant 1.000000e+00 : f32
    %180 = vector.broadcast %cst_102 : f32 to vector<64x32xf32>
    %181 = arith.addf %180, %179 : vector<64x32xf32>
    %cst_103 = arith.constant 5.000000e-01 : f32
    %182 = vector.broadcast %cst_103 : f32 to vector<64x32xf32>
    %183 = arith.mulf %182, %181 : vector<64x32xf32>
    %184 = arith.mulf %171, %183 : vector<64x32xf32>
    %c0_104 = arith.constant 0 : index
    %c0_105 = arith.constant 0 : index
    %185 = vector.load %arg32[%c0_104, %c0_105] : memref<32x16xbf16, #tpu.memory_space<vmem>>, vector<32x16xbf16>
    %c0_106 = arith.constant 0 : index
    %c0_107 = arith.constant 0 : index
    %186 = vector.load %arg33[%c0_106, %c0_107] : memref<1x16xf32, #tpu.memory_space<vmem>>, vector<1x16xf32>
    %187 = arith.truncf %184 : vector<64x32xf32> to vector<64x32xbf16>
    %cst_108 = arith.constant dense<0.000000e+00> : vector<64x16xf32>
    %188 = tpu.matmul %187, %185, %cst_108 {dimension_numbers = #tpu.dot_dimension_numbers<[1], [0], [0], [1], [0, 0, 1, 1], [], []>} : vector<64x32xbf16>, vector<32x16xbf16>, vector<64x16xf32> -> vector<64x16xf32>
    %189 = vector.broadcast %186 : vector<1x16xf32> to vector<64x16xf32>
    %190 = arith.addf %188, %189 : vector<64x16xf32>
    %191 = arith.addf %190, %165 : vector<64x16xf32>
    %c0_109 = arith.constant 0 : index
    %c0_110 = arith.constant 0 : index
    %192 = vector.load %arg34[%c0_109, %c0_110] : memref<128x64xbf16, #tpu.memory_space<vmem>>, vector<128x64xbf16>
    %c0_111 = arith.constant 0 : index
    %c0_112 = arith.constant 0 : index
    %193 = vector.load %arg35[%c0_111, %c0_112] : memref<128x1xf32, #tpu.memory_space<vmem>>, vector<128x1xf32>
    %194 = arith.truncf %191 : vector<64x16xf32> to vector<64x16xbf16>
    %cst_113 = arith.constant dense<0.000000e+00> : vector<128x16xf32>
    %195 = tpu.matmul %192, %194, %cst_113 {dimension_numbers = #tpu.dot_dimension_numbers<[1], [0], [0], [1], [0, 0, 1, 1], [], []>} : vector<128x64xbf16>, vector<64x16xbf16>, vector<128x16xf32> -> vector<128x16xf32>
    %196 = vector.broadcast %193 : vector<128x1xf32> to vector<128x16xf32>
    %197 = arith.addf %195, %196 : vector<128x16xf32>
    %198 = arith.mulf %197, %197 : vector<128x16xf32>
    %199 = arith.mulf %197, %198 : vector<128x16xf32>
    %cst_114 = arith.constant 4.471500e-02 : f32
    %200 = vector.broadcast %cst_114 : f32 to vector<128x16xf32>
    %201 = arith.mulf %200, %199 : vector<128x16xf32>
    %202 = arith.addf %197, %201 : vector<128x16xf32>
    %cst_115 = arith.constant 0.797884583 : f32
    %203 = vector.broadcast %cst_115 : f32 to vector<128x16xf32>
    %204 = arith.mulf %203, %202 : vector<128x16xf32>
    %205 = math.tanh %204 : vector<128x16xf32>
    %cst_116 = arith.constant 1.000000e+00 : f32
    %206 = vector.broadcast %cst_116 : f32 to vector<128x16xf32>
    %207 = arith.addf %206, %205 : vector<128x16xf32>
    %cst_117 = arith.constant 5.000000e-01 : f32
    %208 = vector.broadcast %cst_117 : f32 to vector<128x16xf32>
    %209 = arith.mulf %208, %207 : vector<128x16xf32>
    %210 = arith.mulf %197, %209 : vector<128x16xf32>
    %c0_118 = arith.constant 0 : index
    %c0_119 = arith.constant 0 : index
    %211 = vector.load %arg36[%c0_118, %c0_119] : memref<64x128xbf16, #tpu.memory_space<vmem>>, vector<64x128xbf16>
    %c0_120 = arith.constant 0 : index
    %c0_121 = arith.constant 0 : index
    %212 = vector.load %arg37[%c0_120, %c0_121] : memref<64x1xf32, #tpu.memory_space<vmem>>, vector<64x1xf32>
    %213 = arith.truncf %210 : vector<128x16xf32> to vector<128x16xbf16>
    %cst_122 = arith.constant dense<0.000000e+00> : vector<64x16xf32>
    %214 = tpu.matmul %211, %213, %cst_122 {dimension_numbers = #tpu.dot_dimension_numbers<[1], [0], [0], [1], [0, 0, 1, 1], [], []>} : vector<64x128xbf16>, vector<128x16xbf16>, vector<64x16xf32> -> vector<64x16xf32>
    %215 = vector.broadcast %212 : vector<64x1xf32> to vector<64x16xf32>
    %216 = arith.addf %214, %215 : vector<64x16xf32>
    %c0_123 = arith.constant 0 : index
    %c0_124 = arith.constant 0 : index
    %217 = vector.load %arg38[%c0_123, %c0_124] : memref<128x64xbf16, #tpu.memory_space<vmem>>, vector<128x64xbf16>
    %c0_125 = arith.constant 0 : index
    %c0_126 = arith.constant 0 : index
    %218 = vector.load %arg39[%c0_125, %c0_126] : memref<128x1xf32, #tpu.memory_space<vmem>>, vector<128x1xf32>
    %219 = arith.truncf %216 : vector<64x16xf32> to vector<64x16xbf16>
    %cst_127 = arith.constant dense<0.000000e+00> : vector<128x16xf32>
    %220 = tpu.matmul %217, %219, %cst_127 {dimension_numbers = #tpu.dot_dimension_numbers<[1], [0], [0], [1], [0, 0, 1, 1], [], []>} : vector<128x64xbf16>, vector<64x16xbf16>, vector<128x16xf32> -> vector<128x16xf32>
    %221 = vector.broadcast %218 : vector<128x1xf32> to vector<128x16xf32>
    %222 = arith.addf %220, %221 : vector<128x16xf32>
    %223 = arith.mulf %222, %222 : vector<128x16xf32>
    %224 = arith.mulf %222, %223 : vector<128x16xf32>
    %cst_128 = arith.constant 4.471500e-02 : f32
    %225 = vector.broadcast %cst_128 : f32 to vector<128x16xf32>
    %226 = arith.mulf %225, %224 : vector<128x16xf32>
    %227 = arith.addf %222, %226 : vector<128x16xf32>
    %cst_129 = arith.constant 0.797884583 : f32
    %228 = vector.broadcast %cst_129 : f32 to vector<128x16xf32>
    %229 = arith.mulf %228, %227 : vector<128x16xf32>
    %230 = math.tanh %229 : vector<128x16xf32>
    %cst_130 = arith.constant 1.000000e+00 : f32
    %231 = vector.broadcast %cst_130 : f32 to vector<128x16xf32>
    %232 = arith.addf %231, %230 : vector<128x16xf32>
    %cst_131 = arith.constant 5.000000e-01 : f32
    %233 = vector.broadcast %cst_131 : f32 to vector<128x16xf32>
    %234 = arith.mulf %233, %232 : vector<128x16xf32>
    %235 = arith.mulf %222, %234 : vector<128x16xf32>
    %c0_132 = arith.constant 0 : index
    %c0_133 = arith.constant 0 : index
    %236 = vector.load %arg40[%c0_132, %c0_133] : memref<64x128xbf16, #tpu.memory_space<vmem>>, vector<64x128xbf16>
    %c0_134 = arith.constant 0 : index
    %c0_135 = arith.constant 0 : index
    %237 = vector.load %arg41[%c0_134, %c0_135] : memref<64x1xf32, #tpu.memory_space<vmem>>, vector<64x1xf32>
    %238 = arith.truncf %235 : vector<128x16xf32> to vector<128x16xbf16>
    %cst_136 = arith.constant dense<0.000000e+00> : vector<64x16xf32>
    %239 = tpu.matmul %236, %238, %cst_136 {dimension_numbers = #tpu.dot_dimension_numbers<[1], [0], [0], [1], [0, 0, 1, 1], [], []>} : vector<64x128xbf16>, vector<128x16xbf16>, vector<64x16xf32> -> vector<64x16xf32>
    %240 = vector.broadcast %237 : vector<64x1xf32> to vector<64x16xf32>
    %241 = arith.addf %239, %240 : vector<64x16xf32>
    %c0_137 = arith.constant 0 : index
    %c0_138 = arith.constant 0 : index
    %242 = vector.load %arg42[%c0_137, %c0_138] : memref<16x32xbf16, #tpu.memory_space<vmem>>, vector<16x32xbf16>
    %c0_139 = arith.constant 0 : index
    %c0_140 = arith.constant 0 : index
    %243 = vector.load %arg43[%c0_139, %c0_140] : memref<1x32xf32, #tpu.memory_space<vmem>>, vector<1x32xf32>
    %244 = arith.truncf %241 : vector<64x16xf32> to vector<64x16xbf16>
    %cst_141 = arith.constant dense<0.000000e+00> : vector<64x32xf32>
    %245 = tpu.matmul %244, %242, %cst_141 {dimension_numbers = #tpu.dot_dimension_numbers<[1], [0], [0], [1], [0, 0, 1, 1], [], []>} : vector<64x16xbf16>, vector<16x32xbf16>, vector<64x32xf32> -> vector<64x32xf32>
    %246 = vector.broadcast %243 : vector<1x32xf32> to vector<64x32xf32>
    %247 = arith.addf %245, %246 : vector<64x32xf32>
    %248 = arith.mulf %247, %247 : vector<64x32xf32>
    %249 = arith.mulf %247, %248 : vector<64x32xf32>
    %cst_142 = arith.constant 4.471500e-02 : f32
    %250 = vector.broadcast %cst_142 : f32 to vector<64x32xf32>
    %251 = arith.mulf %250, %249 : vector<64x32xf32>
    %252 = arith.addf %247, %251 : vector<64x32xf32>
    %cst_143 = arith.constant 0.797884583 : f32
    %253 = vector.broadcast %cst_143 : f32 to vector<64x32xf32>
    %254 = arith.mulf %253, %252 : vector<64x32xf32>
    %255 = math.tanh %254 : vector<64x32xf32>
    %cst_144 = arith.constant 1.000000e+00 : f32
    %256 = vector.broadcast %cst_144 : f32 to vector<64x32xf32>
    %257 = arith.addf %256, %255 : vector<64x32xf32>
    %cst_145 = arith.constant 5.000000e-01 : f32
    %258 = vector.broadcast %cst_145 : f32 to vector<64x32xf32>
    %259 = arith.mulf %258, %257 : vector<64x32xf32>
    %260 = arith.mulf %247, %259 : vector<64x32xf32>
    %c0_146 = arith.constant 0 : index
    %c0_147 = arith.constant 0 : index
    %261 = vector.load %arg44[%c0_146, %c0_147] : memref<32x16xbf16, #tpu.memory_space<vmem>>, vector<32x16xbf16>
    %c0_148 = arith.constant 0 : index
    %c0_149 = arith.constant 0 : index
    %262 = vector.load %arg45[%c0_148, %c0_149] : memref<1x16xf32, #tpu.memory_space<vmem>>, vector<1x16xf32>
    %263 = arith.truncf %260 : vector<64x32xf32> to vector<64x32xbf16>
    %cst_150 = arith.constant dense<0.000000e+00> : vector<64x16xf32>
    %264 = tpu.matmul %263, %261, %cst_150 {dimension_numbers = #tpu.dot_dimension_numbers<[1], [0], [0], [1], [0, 0, 1, 1], [], []>} : vector<64x32xbf16>, vector<32x16xbf16>, vector<64x16xf32> -> vector<64x16xf32>
    %265 = vector.broadcast %262 : vector<1x16xf32> to vector<64x16xf32>
    %266 = arith.addf %264, %265 : vector<64x16xf32>
    %c0_151 = arith.constant 0 : index
    %c0_152 = arith.constant 0 : index
    %c0_153 = arith.constant 0 : index
    %267 = vector.load %arg46[%c0_151, %c0_152, %c0_153] : memref<1x64x16xf32, #tpu.memory_space<vmem>>, vector<1x64x16xf32>
    %268 = vector.shape_cast %267 : vector<1x64x16xf32> to vector<64x16xf32>
    %269 = vector.shape_cast %266 : vector<64x16xf32> to vector<1x64x16xf32>
    tpu.vector_store %arg46[%c0_151, %c0_152, %c0_153], %269 {strides = array<i32>} : memref<1x64x16xf32, #tpu.memory_space<vmem>>, vector<1x64x16xf32>,
    return
  }
  func.func @transform_0(%arg0: i32) -> (i32, i32, i32) {
    %c0_i32 = arith.constant 0 : i32
    %c0_i32_0 = arith.constant 0 : i32
    %c0_i32_1 = arith.constant 0 : i32
    return %arg0, %c0_i32, %c0_i32_0 : i32, i32, i32
  }
  func.func @transform_1(%arg0: i32) -> (i32, i32, i32) {
    %c0_i32 = arith.constant 0 : i32
    %c0_i32_0 = arith.constant 0 : i32
    %c0_i32_1 = arith.constant 0 : i32
    return %arg0, %c0_i32, %c0_i32_0 : i32, i32, i32
  }
  func.func @transform_2(%arg0: i32) -> (i32, i32, i32) {
    %c0_i32 = arith.constant 0 : i32
    %c0_i32_0 = arith.constant 0 : i32
    %c0_i32_1 = arith.constant 0 : i32
    return %arg0, %c0_i32, %c0_i32_0 : i32, i32, i32
  }
  func.func @transform_3(%arg0: i32) -> (i32, i32, i32) {
    %c0_i32 = arith.constant 0 : i32
    %c0_i32_0 = arith.constant 0 : i32
    %c0_i32_1 = arith.constant 0 : i32
    return %arg0, %c0_i32, %c0_i32_0 : i32, i32, i32
  }
  func.func @transform_4(%arg0: i32) -> (i32, i32, i32) {
    %c0_i32 = arith.constant 0 : i32
    %c0_i32_0 = arith.constant 0 : i32
    %c0_i32_1 = arith.constant 0 : i32
    return %arg0, %c0_i32, %c0_i32_0 : i32, i32, i32
  }
  func.func @transform_5(%arg0: i32) -> (i32, i32) {
    %c0_i32 = arith.constant 0 : i32
    %c0_i32_0 = arith.constant 0 : i32
    %c0_i32_1 = arith.constant 0 : i32
    return %c0_i32, %c0_i32_0 : i32, i32
  }
  func.func @transform_6(%arg0: i32) -> (i32, i32) {
    %c0_i32 = arith.constant 0 : i32
    %c0_i32_0 = arith.constant 0 : i32
    %c0_i32_1 = arith.constant 0 : i32
    return %c0_i32, %c0_i32_0 : i32, i32
  }
  func.func @transform_7(%arg0: i32) -> (i32, i32) {
    %c0_i32 = arith.constant 0 : i32
    %c0_i32_0 = arith.constant 0 : i32
    %c0_i32_1 = arith.constant 0 : i32
    return %c0_i32, %c0_i32_0 : i32, i32
  }
  func.func @transform_8(%arg0: i32) -> (i32, i32) {
    %c0_i32 = arith.constant 0 : i32
    %c0_i32_0 = arith.constant 0 : i32
    %c0_i32_1 = arith.constant 0 : i32
    return %c0_i32, %c0_i32_0 : i32, i32
  }
  func.func @transform_9(%arg0: i32) -> (i32, i32) {
    %c0_i32 = arith.constant 0 : i32
    %c0_i32_0 = arith.constant 0 : i32
    %c0_i32_1 = arith.constant 0 : i32
    return %c0_i32, %c0_i32_0 : i32, i32
  }
  func.func @transform_10(%arg0: i32) -> (i32, i32) {
    %c0_i32 = arith.constant 0 : i32
    %c0_i32_0 = arith.constant 0 : i32
    %c0_i32_1 = arith.constant 0 : i32
    return %c0_i32, %c0_i32_0 : i32, i32
  }
  func.func @transform_11(%arg0: i32) -> (i32, i32) {
    %c0_i32 = arith.constant 0 : i32
    %c0_i32_0 = arith.constant 0 : i32
    %c0_i32_1 = arith.constant 0 : i32
    return %c0_i32, %c0_i32_0 : i32, i32
  }
  func.func @transform_12(%arg0: i32) -> (i32, i32) {
    %c0_i32 = arith.constant 0 : i32
    %c0_i32_0 = arith.constant 0 : i32
    %c0_i32_1 = arith.constant 0 : i32
    return %c0_i32, %c0_i32_0 : i32, i32
  }
  func.func @transform_13(%arg0: i32) -> (i32, i32) {
    %c0_i32 = arith.constant 0 : i32
    %c0_i32_0 = arith.constant 0 : i32
    %c0_i32_1 = arith.constant 0 : i32
    return %c0_i32, %c0_i32_0 : i32, i32
  }
  func.func @transform_14(%arg0: i32) -> (i32, i32) {
    %c0_i32 = arith.constant 0 : i32
    %c0_i32_0 = arith.constant 0 : i32
    %c0_i32_1 = arith.constant 0 : i32
    return %c0_i32, %c0_i32_0 : i32, i32
  }
  func.func @transform_15(%arg0: i32) -> (i32, i32) {
    %c0_i32 = arith.constant 0 : i32
    %c0_i32_0 = arith.constant 0 : i32
    %c0_i32_1 = arith.constant 0 : i32
    return %c0_i32, %c0_i32_0 : i32, i32
  }
  func.func @transform_16(%arg0: i32) -> (i32, i32) {
    %c0_i32 = arith.constant 0 : i32
    %c0_i32_0 = arith.constant 0 : i32
    %c0_i32_1 = arith.constant 0 : i32
    return %c0_i32, %c0_i32_0 : i32, i32
  }
  func.func @transform_17(%arg0: i32) -> (i32, i32, i32) {
    %c0_i32 = arith.constant 0 : i32
    %c0_i32_0 = arith.constant 0 : i32
    %c0_i32_1 = arith.constant 0 : i32
    return %arg0, %c0_i32, %c0_i32_0 : i32, i32, i32
  }
  func.func @transform_18(%arg0: i32) -> (i32, i32, i32) {
    %c0_i32 = arith.constant 0 : i32
    %c0_i32_0 = arith.constant 0 : i32
    %c0_i32_1 = arith.constant 0 : i32
    return %arg0, %c0_i32, %c0_i32_0 : i32, i32, i32
  }
  func.func @transform_19(%arg0: i32) -> (i32, i32, i32) {
    %c0_i32 = arith.constant 0 : i32
    %c0_i32_0 = arith.constant 0 : i32
    %c0_i32_1 = arith.constant 0 : i32
    return %arg0, %c0_i32, %c0_i32_0 : i32, i32, i32
  }
  func.func @transform_20(%arg0: i32) -> (i32, i32, i32) {
    %c0_i32 = arith.constant 0 : i32
    %c0_i32_0 = arith.constant 0 : i32
    %c0_i32_1 = arith.constant 0 : i32
    return %arg0, %c0_i32, %c0_i32_0 : i32, i32, i32
  }
  func.func @transform_21(%arg0: i32) -> (i32, i32) {
    %c0_i32 = arith.constant 0 : i32
    %c0_i32_0 = arith.constant 0 : i32
    %c0_i32_1 = arith.constant 0 : i32
    return %c0_i32, %c0_i32_0 : i32, i32
  }
  func.func @transform_22(%arg0: i32) -> (i32, i32) {
    %c0_i32 = arith.constant 0 : i32
    %c0_i32_0 = arith.constant 0 : i32
    %c0_i32_1 = arith.constant 0 : i32
    return %c0_i32, %c0_i32_0 : i32, i32
  }
  func.func @transform_23(%arg0: i32) -> (i32, i32) {
    %c0_i32 = arith.constant 0 : i32
    %c0_i32_0 = arith.constant 0 : i32
    %c0_i32_1 = arith.constant 0 : i32
    return %c0_i32, %c0_i32_0 : i32, i32
  }
  func.func @transform_24(%arg0: i32) -> (i32, i32) {
    %c0_i32 = arith.constant 0 : i32
    %c0_i32_0 = arith.constant 0 : i32
    %c0_i32_1 = arith.constant 0 : i32
    return %c0_i32, %c0_i32_0 : i32, i32
  }
  func.func @transform_25(%arg0: i32) -> (i32, i32) {
    %c0_i32 = arith.constant 0 : i32
    %c0_i32_0 = arith.constant 0 : i32
    %c0_i32_1 = arith.constant 0 : i32
    return %c0_i32, %c0_i32_0 : i32, i32
  }
  func.func @transform_26(%arg0: i32) -> (i32, i32) {
    %c0_i32 = arith.constant 0 : i32
    %c0_i32_0 = arith.constant 0 : i32
    %c0_i32_1 = arith.constant 0 : i32
    return %c0_i32, %c0_i32_0 : i32, i32
  }
  func.func @transform_27(%arg0: i32) -> (i32, i32) {
    %c0_i32 = arith.constant 0 : i32
    %c0_i32_0 = arith.constant 0 : i32
    %c0_i32_1 = arith.constant 0 : i32
    return %c0_i32, %c0_i32_0 : i32, i32
  }
  func.func @transform_28(%arg0: i32) -> (i32, i32) {
    %c0_i32 = arith.constant 0 : i32
    %c0_i32_0 = arith.constant 0 : i32
    %c0_i32_1 = arith.constant 0 : i32
    return %c0_i32, %c0_i32_0 : i32, i32
  }
  func.func @transform_29(%arg0: i32) -> (i32, i32) {
    %c0_i32 = arith.constant 0 : i32
    %c0_i32_0 = arith.constant 0 : i32
    %c0_i32_1 = arith.constant 0 : i32
    return %c0_i32, %c0_i32_0 : i32, i32
  }
  func.func @transform_30(%arg0: i32) -> (i32, i32) {
    %c0_i32 = arith.constant 0 : i32
    %c0_i32_0 = arith.constant 0 : i32
    %c0_i32_1 = arith.constant 0 : i32
    return %c0_i32, %c0_i32_0 : i32, i32
  }
  func.func @transform_31(%arg0: i32) -> (i32, i32) {
    %c0_i32 = arith.constant 0 : i32
    %c0_i32_0 = arith.constant 0 : i32
    %c0_i32_1 = arith.constant 0 : i32
    return %c0_i32, %c0_i32_0 : i32, i32
  }
  func.func @transform_32(%arg0: i32) -> (i32, i32) {
    %c0_i32 = arith.constant 0 : i32
    %c0_i32_0 = arith.constant 0 : i32
    %c0_i32_1 = arith.constant 0 : i32
    return %c0_i32, %c0_i32_0 : i32, i32
  }
  func.func @transform_33(%arg0: i32) -> (i32, i32) {
    %c0_i32 = arith.constant 0 : i32
    %c0_i32_0 = arith.constant 0 : i32
    %c0_i32_1 = arith.constant 0 : i32
    return %c0_i32, %c0_i32_0 : i32, i32
  }
  func.func @transform_34(%arg0: i32) -> (i32, i32) {
    %c0_i32 = arith.constant 0 : i32
    %c0_i32_0 = arith.constant 0 : i32
    %c0_i32_1 = arith.constant 0 : i32
    return %c0_i32, %c0_i32_0 : i32, i32
  }
  func.func @transform_35(%arg0: i32) -> (i32, i32) {
    %c0_i32 = arith.constant 0 : i32
    %c0_i32_0 = arith.constant 0 : i32
    %c0_i32_1 = arith.constant 0 : i32
    return %c0_i32, %c0_i32_0 : i32, i32
  }
  func.func @transform_36(%arg0: i32) -> (i32, i32) {
    %c0_i32 = arith.constant 0 : i32
    %c0_i32_0 = arith.constant 0 : i32
    %c0_i32_1 = arith.constant 0 : i32
    return %c0_i32, %c0_i32_0 : i32, i32
  }
  func.func @transform_37(%arg0: i32) -> (i32, i32) {
    %c0_i32 = arith.constant 0 : i32
    %c0_i32_0 = arith.constant 0 : i32
    %c0_i32_1 = arith.constant 0 : i32
    return %c0_i32, %c0_i32_0 : i32, i32
  }
  func.func @transform_38(%arg0: i32) -> (i32, i32) {
    %c0_i32 = arith.constant 0 : i32
    %c0_i32_0 = arith.constant 0 : i32
    %c0_i32_1 = arith.constant 0 : i32
    return %c0_i32, %c0_i32_0 : i32, i32
  }
  func.func @transform_39(%arg0: i32) -> (i32, i32) {
    %c0_i32 = arith.constant 0 : i32
    %c0_i32_0 = arith.constant 0 : i32
    %c0_i32_1 = arith.constant 0 : i32
    return %c0_i32, %c0_i32_0 : i32, i32
  }
  func.func @transform_40(%arg0: i32) -> (i32, i32) {
    %c0_i32 = arith.constant 0 : i32
    %c0_i32_0 = arith.constant 0 : i32
    %c0_i32_1 = arith.constant 0 : i32
    return %c0_i32, %c0_i32_0 : i32, i32
  }
  func.func @transform_41(%arg0: i32) -> (i32, i32) {
    %c0_i32 = arith.constant 0 : i32
    %c0_i32_0 = arith.constant 0 : i32
    %c0_i32_1 = arith.constant 0 : i32
    return %c0_i32, %c0_i32_0 : i32, i32
  }
  func.func @transform_42(%arg0: i32) -> (i32, i32) {
    %c0_i32 = arith.constant 0 : i32
    %c0_i32_0 = arith.constant 0 : i32
    %c0_i32_1 = arith.constant 0 : i32
    return %c0_i32, %c0_i32_0 : i32, i32
  }
  func.func @transform_43(%arg0: i32) -> (i32, i32) {
    %c0_i32 = arith.constant 0 : i32
    %c0_i32_0 = arith.constant 0 : i32
    %c0_i32_1 = arith.constant 0 : i32
    return %c0_i32, %c0_i32_0 : i32, i32
  }
  func.func @transform_44(%arg0: i32) -> (i32, i32) {
    %c0_i32 = arith.constant 0 : i32
    %c0_i32_0 = arith.constant 0 : i32
    %c0_i32_1 = arith.constant 0 : i32
    return %c0_i32, %c0_i32_0 : i32, i32
  }
  func.func @transform_45(%arg0: i32) -> (i32, i32, i32) {
    %c0_i32 = arith.constant 0 : i32
    %c0_i32_0 = arith.constant 0 : i32
    %c0_i32_1 = arith.constant 0 : i32
    return %arg0, %c0_i32, %c0_i32_0 : i32, i32, i32
  }
}

</mosaic_0001>

<bundles_post_ra>
// kernel: _lambda_.1
= control target key start
LH: loop header
LB: loop body
LE: loop exit
PB: predicated region body
PF: predicated region fallthrough
CT: control target
= control target key end

     0   :  { %s7510_s6 = smov 1   ;;  %s7511_s10 = smov 2   ;;  %s9528_s0 = inlined_call_operand.smem [shape: u32[46], index: -1, kind: input, shape index: {}] }
   0x1   :  { %s7567_s5 = sld [smem:[%s9528_s0]]   ;;  %s7512_s14 = smov 3  }
   0x2   :  { %s7572_s9 = sld [smem:[%s9528_s0 + %s7510_s6]]   ;;  %s7513_s18 = smov 4  }
   0x3   :  { %s7577_s13 = sld [smem:[%s9528_s0 + %s7511_s10]]   ;;  %s7514_s22 = smov 5  }
   0x4   :  { %s7582_s17 = sld [smem:[%s9528_s0 + %s7512_s14]]   ;;  %s7515_s26 = smov 6  }
   0x5   :  { %s7587_s21 = sld [smem:[%s9528_s0 + %s7513_s18]]   ;;  %s7516_s30 = smov 7  }
   0x6   :  { %s7592_s25 = sld [smem:[%s9528_s0 + %s7514_s22]]   ;;  %s7517_s4 = smov 8  }
   0x7   :  { %9567 = sst [smem:[#allocation5_spill]] %s7567_s5  ;;  %s7518_s10 = smov 9  }
   0x8   :  { %9568 = sst [smem:[#allocation6_spill]] %s7572_s9  ;;  %s7519_s15 = smov 10  }
   0x9   :  { %9569 = sst [smem:[#allocation7_spill]] %s7577_s13  ;;  %s7520_s20 = smov 11  }
   0xa   :  { %s7597_s29 = sld [smem:[%s9528_s0 + %s7515_s26]]   ;;  %s7521_s26 = smov 12  }
   0xb   :  { %s7602_s3 = sld [smem:[%s9528_s0 + %s7516_s30]]   ;;  %s7522_s1 = smov 13  }
   0xc   :  { %s7607_s8 = sld [smem:[%s9528_s0 + %s7517_s4]]   ;;  %s7523_s7 = smov 14  }
   0xd   :  { %s7612_s14 = sld [smem:[%s9528_s0 + %s7518_s10]]   ;;  %s7525_s22 = smov 16  }
   0xe   :  { %s7617_s19 = sld [smem:[%s9528_s0 + %s7519_s15]]   ;;  %s7524_s15 = smov 15  }
   0xf   :  { %s7622_s24 = sld [smem:[%s9528_s0 + %s7520_s20]]   ;;  %s7526_s28 = smov 17  }
  0x10   :  { %s7627_s30 = sld [smem:[%s9528_s0 + %s7521_s26]]  }
  0x11   :  { %9570 = sst [smem:[#allocation8_spill]] %s7602_s3 }
  0x12   :  { %9571 = sst [smem:[#allocation9_spill]] %s7607_s8 }
  0x13   :  { %9572 = sst [smem:[#allocation10_spill]] %s7612_s14 }
  0x14   :  { %s7632_s6 = sld [smem:[%s9528_s0 + %s7522_s1]]  }
  0x15   :  { %9573 = sst [smem:[#allocation11_spill]] %s7622_s24 }
  0x16   :  { %s7637_s12 = sld [smem:[%s9528_s0 + %s7523_s7]]   ;;  %s7527_s7 = smov 18  }
  0x17   :  { %s7642_s20 = sld [smem:[%s9528_s0 + %s7524_s15]]   ;;  %s7528_s15 = smov 19  }
  0x18   :  { %s7647_s27 = sld [smem:[%s9528_s0 + %s7525_s22]]   ;;  %s7529_s22 = smov 20  }
  0x19   :  { %s7652_s4 = sld [smem:[%s9528_s0 + %s7526_s28]]   ;;  %s7530_s28 = smov 21  }
  0x1a   :  { %9574 = sst [smem:[#allocation12_spill]] %s7632_s6 }
  0x1b   :  { %s7672_s6 = sld [smem:[%s9528_s0 + %s7530_s28]]   ;;  %s7534_s28 = smov 25  }
  0x1c   :  { %9575 = sst [smem:[#allocation13_spill]] %s7637_s12 }
  0x1d   :  { %9576 = sst [smem:[#allocation14_spill]] %s7642_s20 }
  0x1e   :  { %9577 = sst [smem:[#allocation15_spill]] %s7647_s27 }
  0x1f   :  { %9578 = sst [smem:[#allocation16_spill]] %s7652_s4 }
  0x20   :  { %s7657_s12 = sld [smem:[%s9528_s0 + %s7527_s7]]   ;;  %s7531_s7 = smov 22  }
  0x21   :  { %s7662_s20 = sld [smem:[%s9528_s0 + %s7528_s15]]   ;;  %s7532_s15 = smov 23  }
  0x22   :  { %s7667_s27 = sld [smem:[%s9528_s0 + %s7529_s22]]   ;;  %s7533_s22 = smov 24  }
  0x23   :  { %9581 = sst [smem:[#allocation19_spill]] %s7672_s6 }
  0x24   :  { %s7682_s24 = sld [smem:[%s9528_s0 + %s7532_s15]]   ;;  %s7536_s15 = smov 27  }
  0x25   :  { %s7692_s6 = sld [smem:[%s9528_s0 + %s7534_s28]]   ;;  %s7538_s28 = smov 29  }
  0x26   :  { %9579 = sst [smem:[#allocation17_spill]] %s7657_s12 }
  0x27   :  { %s7677_s12 = sld [smem:[%s9528_s0 + %s7531_s7]]   ;;  %s7535_s7 = smov 26  }
  0x28   :  { %9580 = sst [smem:[#allocation18_spill]] %s7667_s27 }
  0x29   :  { %s7687_s27 = sld [smem:[%s9528_s0 + %s7533_s22]]   ;;  %s7537_s22 = smov 28  }
  0x2a   :  { %9583 = sst [smem:[#allocation21_spill]] %s7682_s24 }
  0x2b   :  { %9584 = sst [smem:[#allocation22_spill]] %s7692_s6 }
  0x2c   :  { %s7697_s14 = sld [smem:[%s9528_s0 + %s7535_s7]]   ;;  %s7539_s7 = smov 30  }
  0x2d   :  { %9582 = sst [smem:[#allocation20_spill]] %s7677_s12 }
  0x2e   :  { %s7702_s24 = sld [smem:[%s9528_s0 + %s7536_s15]]   ;;  %s7540_s15 = smov 31  }
  0x2f   :  { %s7707_s3 = sld [smem:[%s9528_s0 + %s7537_s22]]   ;;  %s7541_s22 = smov 32  }
  0x30   :  { %s7712_s6 = sld [smem:[%s9528_s0 + %s7538_s28]]   ;;  %s7542_s28 = smov 33  }
  0x32   :  { %9585 = sst [smem:[#allocation23_spill]] %s7697_s14 }
  0x33   :  { %s7717_s14 = sld [smem:[%s9528_s0 + %s7539_s7]]   ;;  %s7543_s7 = smov 34  }
  0x34   :  { %9586 = sst [smem:[#allocation24_spill]] %s7702_s24 }
  0x35   :  { %9587 = sst [smem:[#allocation25_spill]] %s7707_s3 }
  0x36   :  { %9588 = sst [smem:[#allocation26_spill]] %s7712_s6 }
  0x37   :  { %s7722_s24 = sld [smem:[%s9528_s0 + %s7540_s15]]   ;;  %s7544_s15 = smov 35  }
  0x38   :  { %s7727_s3 = sld [smem:[%s9528_s0 + %s7541_s22]]   ;;  %s7545_s22 = smov 36  }
  0x39   :  { %9589 = sst [smem:[#allocation27_spill]] %s7717_s14 }
  0x3a   :  { %s7732_s6 = sld [smem:[%s9528_s0 + %s7542_s28]]   ;;  %s7546_s28 = smov 37  }
  0x3b   :  { %s7737_s14 = sld [smem:[%s9528_s0 + %s7543_s7]]   ;;  %s7547_s7 = smov 38  }
  0x3d   :  { %9590 = sst [smem:[#allocation28_spill]] %s7722_s24 }
  0x3e   :  { %9591 = sst [smem:[#allocation29_spill]] %s7727_s3 }
  0x3f   :  { %s7742_s24 = sld [smem:[%s9528_s0 + %s7544_s15]]   ;;  %s7548_s15 = smov 39  }
  0x40   :  { %9592 = sst [smem:[#allocation30_spill]] %s7732_s6 }
  0x41   :  { %9593 = sst [smem:[#allocation31_spill]] %s7737_s14 }
  0x42   :  { %s7747_s3 = sld [smem:[%s9528_s0 + %s7545_s22]]   ;;  %s7549_s22 = smov 40  }
  0x43   :  { %s7752_s6 = sld [smem:[%s9528_s0 + %s7546_s28]]   ;;  %s7550_s28 = smov 41  }
  0x44   :  { %s7757_s14 = sld [smem:[%s9528_s0 + %s7547_s7]]   ;;  %s7551_s7 = smov 42  }
  0x45   :  { %9594 = sst [smem:[#allocation32_spill]] %s7742_s24 }
  0x46   :  { %s7762_s24 = sld [smem:[%s9528_s0 + %s7548_s15]]   ;;  %s7552_s15 = smov 43  }
  0x48   :  { %9595 = sst [smem:[#allocation33_spill]] %s7747_s3 }
  0x49   :  { %9596 = sst [smem:[#allocation34_spill]] %s7752_s6 }
  0x4a   :  { %9597 = sst [smem:[#allocation35_spill]] %s7757_s14 }
  0x4b   :  { %s7767_s3 = sld [smem:[%s9528_s0 + %s7549_s22]]   ;;  %s7553_s22 = smov 44  }
  0x4c   :  { %9598 = sst [smem:[#allocation36_spill]] %s7762_s24 }
  0x4d   :  { %s7772_s6 = sld [smem:[%s9528_s0 + %s7550_s28]]   ;;  %s7554_s28 = smov 45  }
  0x4e   :  { %s7777_s14 = sld [smem:[%s9528_s0 + %s7551_s7]]  }
  0x4f   :  { %s7782_s24 = sld [smem:[%s9528_s0 + %s7552_s15]]  }
  0x51   :  { %9599 = sst [smem:[#allocation37_spill]] %s7767_s3 }
  0x52   :  { %s7787_s3 = sld [smem:[%s9528_s0 + %s7553_s22]]  }
  0x53   :  { %9600 = sst [smem:[#allocation38_spill]] %s7772_s6 }
  0x54   :  { %s7792_s6 = sld [smem:[%s9528_s0 + %s7554_s28]]  }
  0x58   :  { %9601 = sst [smem:[#allocation39_spill]] %s7787_s3 }
  0x59   :  { %96 = vsyncpa [#allocation3], 0 }
  0x5a   :  { %98 = vsyncpa [#allocation3 + $0x1], 0  ;;  %s7794_s7 = smov 0   ;;  %s7796_s10 = smov 0  }
  0x5b   :  { %s7798_s11 = smov 0   ;;  %s7800_s15 = smov 0  }
  0x5c LB: > { %s9602_s12 = sld [smem:[#allocation20_spill]]  ;;  %s7815_s0 = sadd.s32 4294967295, %s7508_s15   ;;  %s7500_s10 = sphi %s7796_s10, %s9711_s10   ;;  %s7496_s7 = sphi %s7794_s7, %s9710_s7   ;;  %s7508_s15 = sphi %s7800_s15, %s9713_s15   ;;  %s7504_s11 = sphi %s7798_s11, %s9712_s11  }
  0x5d   : > { %s9603_s8 = sld [smem:[#allocation9_spill]]  ;;  %s6318_s16 = sadd.s32 4294967294, %s7508_s15  }
  0x5e   : > { %s7819_s18 = sadd.s32 1, %s7508_s15   ;;  %s1101_s22 = sadd.s32 1, %s7504_s11 }
  0x5f   : > { %s1098_s23 = ssub.s32 %s7508_s15, %s7819_s18  ;;  %p1111_p0 = scmp.ne.s32.totalorder %s7504_s11, %s7500_s10 }
  0x60   : > { %p1099_p1 = scmp.eq.s32.totalorder %s1098_s23, 0  ;;  %p1112_p2 = scmp.eq.s32.totalorder %s7815_s0, 1 }
  0x61   : > { %p1117_p3 = scmp.ne.s32.totalorder %s7500_s10, %s7496_s7  ;;  %p1118_p4 = scmp.eq.s32.totalorder %s6318_s16, 1 }
  0x62   : > { %s7830_s26 = scalar_select %p1099_p1, %s7504_s11, %s1101_s22  }
  0x63   : > { %p7832_p5 = por %p1112_p2, %p1111_p0  ;;  %p7836_p6 = por %p1118_p4, %p1117_p3 }
  0x64   : > { %p6321_p7 = scmp.ge.s32.totalorder %s7508_s15, 1  ;;  %p1308_p8 = scmp.lt.s32.totalorder %s7508_s15, 3 }
  0x66   : > { %p1309_p9 = pnand %p6321_p7, %p1308_p8 }
  0x68   : > { %1312 = sbr.rel (%p1309_p9) target bundleno = 4681 (0x1249), region = 200 }
  0x6d   : > { %s9606_s9 = sld [smem:[#allocation6_spill]]  ;;  %p1448_p10 = scmp.lt.s32.totalorder %s7815_s0, 1  ;;  %v7555_v0 = vmov 0   ;;  %v1675_v17 = vld [vmem:[%s7597_s29 + $0x78] sm:$0xff]  ;;  %v1674_v18 = vld [vmem:[%s7597_s29 + $0x70] sm:$0xff]  ;;  %v1673_v19 = vld [vmem:[%s7597_s29 + $0x68] sm:$0xff] }
  0x6e   : > { %7126 = vset.pattern.permute.xlu1 %v7555_v0  ;;  %7125 = vset.pattern.permute.xlu0 %v7555_v0  ;;  %v1672_v20 = vld [vmem:[%s7597_s29 + $0x60] sm:$0xff]  ;;  %vm1800_vm0 = vcmask 523264   ;;  %v1671_v22 = vld [vmem:[%s7597_s29 + $0x58] sm:$0xff]  ;;  %v1670_v23 = vld [vmem:[%s7597_s29 + $0x50] sm:$0xff]  ;;  %s9607_s13 = sld [smem:[#allocation7_spill]]  ;;  %vm2828_vm1 = vcmask 130048  }
  0x6f   : > { %s7844_s2 = scalar_select %p1448_p10, %s7815_s0, 1  ;;  %v7127_v21 = vld [vmem:[%s7592_s25] sm:$0xff]   ;;  %v1669_v24 = vld [vmem:[%s7597_s29 + $0x48] sm:$0xff]  ;;  %v1667_v26 = vld [vmem:[%s7597_s29 + $0x38] sm:$0xff]  ;;  %vm3005_vm2 = vcmask 261120  }
  0x70   : > { %6692 = vmatprep.mubr.msk.bf16.mxu0 %vm1800_vm0, %v7127_v21  ;;  %v1668_v25 = vld [vmem:[%s7597_s29 + $0x40] sm:$0xff]  ;;  %v1666_v27 = vld [vmem:[%s7597_s29 + $0x30] sm:$0xff]  ;;  %v1665_v28 = vld [vmem:[%s7597_s29 + $0x28] sm:$0xff]  ;;  %s9608_s5 = sld [smem:[#allocation5_spill]] }
  0x71   : > { %s7847_s16 = sshll.u32 %s7844_s2, 6  ;;  %v1664_v29 = vld [vmem:[%s7597_s29 + $0x20] sm:$0xff]  ;;  %v1663_v30 = vld [vmem:[%s7597_s29 + $0x18] sm:$0xff]  ;;  %v1662_v31 = vld [vmem:[%s7597_s29 + $0x10] sm:$0xff]  ;;  %s9609_s4 = sld [smem:[#allocation16_spill]] }
  0x72   : > { %s7851_s22 = scalar_lea.vmem %s7582_s17, %s7847_s16  ;;  %v1661_v32 = vld [vmem:[%s7597_s29 + $0x8] sm:$0xff]  ;;  %v1660_v33 = vld [vmem:[%s7597_s29] sm:$0xff]  ;;  %v2081_v34 = vld [vmem:[%s9603_s8 + $0x38] sm:$0xff]  ;;  %s9708_s3 = sld [smem:[#allocation39_spill]] }
  0x73   : > { %s1457_s23 = scalar_lea.vmem %s9606_s9, %s7847_s16  ;;  %v1509_v1 = vld [vmem:[%s7851_s22 + $0x30] sm:$0xff]  ;;  %v1510_v3 = vld [vmem:[%s7851_s22 + $0x38] sm:$0xff]  ;;  %v1508_v7 = vld [vmem:[%s7851_s22 + $0x28] sm:$0xff] }
  0x74   : > { %v1500_v2 = vld [vmem:[%s1457_s23 + $0x30] sm:$0xff]  ;;  %1598 = vperm.xlu1 %7126, %v1509_v1   ;;  %v1501_v4 = vld [vmem:[%s1457_s23 + $0x38] sm:$0xff]  ;;  %v1499_v5 = vld [vmem:[%s1457_s23 + $0x28] sm:$0xff] }
  0x75   : > { %1544 = vperm.xlu0 %7125, %v1500_v2   ;;  %v1498_v6 = vld [vmem:[%s1457_s23 + $0x20] sm:$0xff]  ;;  %v1497_v9 = vld [vmem:[%s1457_s23 + $0x18] sm:$0xff]  ;;  %v1496_v10 = vld [vmem:[%s1457_s23 + $0x10] sm:$0xff] }
  0x76   : > { %v1507_v8 = vld [vmem:[%s7851_s22 + $0x20] sm:$0xff]  ;;  %v1506_v11 = vld [vmem:[%s7851_s22 + $0x18] sm:$0xff]  ;;  %v1505_v12 = vld [vmem:[%s7851_s22 + $0x10] sm:$0xff] }
  0x77   : > { %v1495_v13 = vld [vmem:[%s1457_s23 + $0x8] sm:$0xff]  ;;  %v1494_v14 = vld [vmem:[%s1457_s23] sm:$0xff]  ;;  %v2080_v35 = vld [vmem:[%s9603_s8 + $0x30] sm:$0xff]  ;;  %s1460_s23 = scalar_lea.vmem %s9607_s13, %s7844_s2  ;;  %s7927_s9 = scalar_lea.vmem %s9609_s4, %s7847_s16 }
  0x78   : > { %1603 = vperm.xlu1 %7126, %v1510_v3   ;;  %v1504_v15 = vld [vmem:[%s7851_s22 + $0x8] sm:$0xff]  ;;  %v1503_v16 = vld [vmem:[%s7851_s22] sm:$0xff]  ;;  %v2077_v38 = vld [vmem:[%s9603_s8 + $0x18] sm:$0xff]  ;;  %s1468_s22 = scalar_lea.vmem %s7587_s21, %s7844_s2  ;;  %s9636_s4 = sld [smem:[#allocation8_spill]] }
  0x79   : > { %1549 = vperm.xlu0 %7125, %v1501_v4   ;;  %v2079_v36 = vld [vmem:[%s9603_s8 + $0x28] sm:$0xff]  ;;  %v2078_v37 = vld [vmem:[%s9603_s8 + $0x20] sm:$0xff]  ;;  %v2076_v39 = vld [vmem:[%s9603_s8 + $0x10] sm:$0xff] }
  0x7a   : > { %v2075_v40 = vld [vmem:[%s9603_s8 + $0x8] sm:$0xff]  ;;  %v2074_v41 = vld [vmem:[%s9603_s8] sm:$0xff]  ;;  %v2258_v42 = vld [vmem:[%s7617_s19 + $0x78] sm:$0xff]  ;;  %s7919_s8 = scalar_lea.vmem %s9608_s5, %s7847_s16  ;;  %s9641_s5 = sld [smem:[#allocation37_spill]] }
  0x7b   : > { %v2257_v43 = vld [vmem:[%s7617_s19 + $0x70] sm:$0xff]  ;;  %v2256_v44 = vld [vmem:[%s7617_s19 + $0x68] sm:$0xff]  ;;  %v2255_v45 = vld [vmem:[%s7617_s19 + $0x60] sm:$0xff] }
  0x7c   : > { %1539 = vperm.xlu1 %7126, %v1499_v5   ;;  %v2254_v46 = vld [vmem:[%s7617_s19 + $0x58] sm:$0xff]  ;;  %v2253_v47 = vld [vmem:[%s7617_s19 + $0x50] sm:$0xff]  ;;  %v2252_v48 = vld [vmem:[%s7617_s19 + $0x48] sm:$0xff] }
  0x7d   : > { %1534 = vperm.xlu0 %7125, %v1498_v6   ;;  %v2251_v49 = vld [vmem:[%s7617_s19 + $0x40] sm:$0xff]  ;;  %v2250_v50 = vld [vmem:[%s7617_s19 + $0x38] sm:$0xff]  ;;  %v2249_v51 = vld [vmem:[%s7617_s19 + $0x30] sm:$0xff] }
  0x7e   : > { %v2248_v52 = vld [vmem:[%s7617_s19 + $0x28] sm:$0xff]  ;;  %v2247_v53 = vld [vmem:[%s7617_s19 + $0x20] sm:$0xff]  ;;  %v2246_v54 = vld [vmem:[%s7617_s19 + $0x18] sm:$0xff] }
  0x7f   : > { %v2245_v55 = vld [vmem:[%s7617_s19 + $0x10] sm:$0xff]  ;;  %v2244_v56 = vld [vmem:[%s7617_s19 + $0x8] sm:$0xff]  ;;  %v2243_v57 = vld [vmem:[%s7617_s19] sm:$0xff] }
  0x80   : > { %1593 = vperm.xlu1 %7126, %v1508_v7   ;;  %v2657_v58 = vld [vmem:[%s7627_s30 + $0x8] sm:$0xff]  ;;  %v2656_v59 = vld [vmem:[%s7627_s30] sm:$0xff]  ;;  %v2659_v60 = vld [vmem:[%s7627_s30 + $0x18] sm:$0xff] }
  0x81   : > { %1588 = vperm.xlu0 %7125, %v1507_v8   ;;  %v2658_v61 = vld [vmem:[%s7627_s30 + $0x10] sm:$0xff]  ;;  %v2661_v62 = vld [vmem:[%s7627_s30 + $0x28] sm:$0xff]  ;;  %v2660_v63 = vld [vmem:[%s7627_s30 + $0x20] sm:$0xff] }
  0x82   : > { %v7915_v0 = vld [vmem:[%s1468_s22] ss:$0 sm:$0xff]  ;;  %v2663_v2 = vld [vmem:[%s7627_s30 + $0x38] sm:$0xff]  ;;  %v2662_v3 = vld [vmem:[%s7627_s30 + $0x30] sm:$0xff]  ;;  %s7936_s22 = scalar_lea.vmem %s7662_s20, %s7847_s16  ;;  %s9614_s16 = sld [smem:[#allocation31_spill]] }
  0x83   : > { %v7921_v1 = vld [vmem:[%s1460_s23] ss:$0 sm:$0xff]  ;;  %v1492_v6 = vld [vmem:[%s7919_s8 + $0x30] sm:$0xff]  ;;  %s9624_s23 = sld [smem:[#allocation33_spill]] }
  0x84   : > { %1529 = vperm.xlu1 %7126, %v1497_v9   ;;  %v3098_v9 = vld [vmem:[%s7927_s9 + $0x38] sm:$0xff] }
  0x85   : > { %1524 = vperm.xlu0 %7125, %v1496_v10   ;;  %v3097_v10 = vld [vmem:[%s7927_s9 + $0x30] sm:$0xff] }
  0x88   : > { %1583 = vperm.xlu1 %7126, %v1506_v11  }
  0x89   : > { %1578 = vperm.xlu0 %7125, %v1505_v12  }
  0x8c   : > { %1519 = vperm.xlu1 %7126, %v1495_v13   ;;  %v1493_v13 = vld [vmem:[%s7919_s8 + $0x38] sm:$0xff] }
  0x8d   : > { %1514 = vperm.xlu0 %7125, %v1494_v14  }
  0x90   : > { %1573 = vperm.xlu1 %7126, %v1504_v15  }
  0x91   : > { %1568 = vperm.xlu0 %7125, %v1503_v16  }
  0x94   : > { %1757 = vperm.xlu1 %7126, %v1675_v17  }
  0x95   : > { %1752 = vperm.xlu0 %7125, %v1674_v18   ;;  %v3107_v18 = vld [vmem:[%s7936_s22 + $0x38] sm:$0xff] }
  0x98   : > { %1747 = vperm.xlu1 %7126, %v1673_v19   ;;  %v3106_v19 = vld [vmem:[%s7936_s22 + $0x30] sm:$0xff] }
  0x99   : > { %1742 = vperm.xlu0 %7125, %v1672_v20  }
  0x9c   : > { %1737 = vperm.xlu1 %7126, %v1671_v22  }
  0x9d   : > { %1732 = vperm.xlu0 %7125, %v1670_v23  }
  0xa0   : > { %1727 = vperm.xlu1 %7126, %v1669_v24  }
  0xa1   : > { %1722 = vperm.xlu0 %7125, %v1668_v25  }
  0xa4   : > { %1717 = vperm.xlu1 %7126, %v1667_v26   ;;  %v3096_v26 = vld [vmem:[%s7927_s9 + $0x28] sm:$0xff] }
  0xa5   : > { %1712 = vperm.xlu0 %7125, %v1666_v27   ;;  %v3095_v27 = vld [vmem:[%s7927_s9 + $0x20] sm:$0xff] }
  0xa8   : > { %1707 = vperm.xlu1 %7126, %v1665_v28  }
  0xa9   : > { %1702 = vperm.xlu0 %7125, %v1664_v29  }
  0xac   : > { %1697 = vperm.xlu1 %7126, %v1663_v30  }
  0xad   : > { %1692 = vperm.xlu0 %7125, %v1662_v31   ;;  %v1491_v31 = vld [vmem:[%s7919_s8 + $0x28] sm:$0xff] }
  0xb0   : > { %1687 = vperm.xlu1 %7126, %v1661_v32   ;;  %v1490_v32 = vld [vmem:[%s7919_s8 + $0x20] sm:$0xff] }
  0xb1   : > { %1682 = vperm.xlu0 %7125, %v1660_v33  }
  0xb4   : > { %2127 = vperm.xlu1 %7126, %v2081_v34  }
  0xb5   : > { %2122 = vperm.xlu0 %7125, %v2080_v35  }
  0xb8   : > { %2117 = vperm.xlu1 %7126, %v2079_v36  }
  0xb9   : > { %2112 = vperm.xlu0 %7125, %v2078_v37   ;;  %v3105_v37 = vld [vmem:[%s7936_s22 + $0x28] sm:$0xff] }
  0xbc   : > { %2107 = vperm.xlu1 %7126, %v2077_v38  }
  0xbd   : > { %2102 = vperm.xlu0 %7125, %v2076_v39  }
  0xc0   : > { %2097 = vperm.xlu1 %7126, %v2075_v40  }
  0xc1   : > { %2092 = vperm.xlu0 %7125, %v2074_v41  }
  0xc4   : > { %2340 = vperm.xlu1 %7126, %v2258_v42   ;;  %v3104_v42 = vld [vmem:[%s7936_s22 + $0x20] sm:$0xff] }
  0xc5   : > { %2335 = vperm.xlu0 %7125, %v2257_v43  }
  0xc8   : > { %2330 = vperm.xlu1 %7126, %v2256_v44  }
  0xc9   : > { %2325 = vperm.xlu0 %7125, %v2255_v45  }
  0xcc   : > { %2320 = vperm.xlu1 %7126, %v2254_v46  }
  0xcd   : > { %2315 = vperm.xlu0 %7125, %v2253_v47   ;;  %v3094_v47 = vld [vmem:[%s7927_s9 + $0x18] sm:$0xff] }
  0xd0   : > { %2310 = vperm.xlu1 %7126, %v2252_v48  }
  0xd1   : > { %2305 = vperm.xlu0 %7125, %v2251_v49  }
  0xd4   : > { %2300 = vperm.xlu1 %7126, %v2250_v50   ;;  %v3093_v50 = vld [vmem:[%s7927_s9 + $0x10] sm:$0xff] }
  0xd5   : > { %2295 = vperm.xlu0 %7125, %v2249_v51  }
  0xd8   : > { %2290 = vperm.xlu1 %7126, %v2248_v52   ;;  %v1489_v52 = vld [vmem:[%s7919_s8 + $0x18] sm:$0xff] }
  0xd9   : > { %2285 = vperm.xlu0 %7125, %v2247_v53   ;;  %v1488_v53 = vld [vmem:[%s7919_s8 + $0x10] sm:$0xff] }
  0xdc   : > { %2280 = vperm.xlu1 %7126, %v2246_v54  }
  0xdd   : > { %2275 = vperm.xlu0 %7125, %v2245_v55  }
  0xe0   : > { %2270 = vperm.xlu1 %7126, %v2244_v56  }
  0xe1   : > { %2265 = vperm.xlu0 %7125, %v2243_v57  }
  0xe4   : > { %2679 = vperm.xlu1 %7126, %v2657_v58   ;;  %v3103_v58 = vld [vmem:[%s7936_s22 + $0x18] sm:$0xff] }
  0xe5   : > { %2674 = vperm.xlu0 %7125, %v2656_v59  }
  0xe8   : > { %2689 = vperm.xlu1 %7126, %v2659_v60  }
  0xe9   : > { %2684 = vperm.xlu0 %7125, %v2658_v61  }
  0xec   : > { %2699 = vperm.xlu1 %7126, %v2661_v62  }
  0xed   : > { %2694 = vperm.xlu0 %7125, %v2660_v63   ;;  %v3102_v63 = vld [vmem:[%s7936_s22 + $0x10] sm:$0xff] }
  0xef   : > { %v1599_v4 = vpop.permute.xlu1 %1598 }
  0xf0   : > { %v1545_v5 = vpop.permute.xlu0 %1544  ;;  %v1618_v7 = vadd.f32 %v7915_v0, %v1599_v4  ;;  %2709 = vperm.xlu1 %7126, %v2663_v2  }
  0xf1   : > { %v1564_v8 = vadd.f32 %v7921_v1, %v1545_v5  ;;  %2704 = vperm.xlu0 %7125, %v2662_v3  }
  0xf2   : > { %v1634_v11 = vmul.f32 %v1618_v7, %v1492_v6 }
  0xf3   : > { %v1604_v12 = vpop.permute.xlu1 %1603  ;;  %v1626_v15 = vadd.f32 %v1564_v8, %v1492_v6  ;;  %v3092_v6 = vld [vmem:[%s7927_s9 + $0x8] sm:$0xff] }
  0xf4   : > { %v1550_v14 = vpop.permute.xlu0 %1549  ;;  %v1619_v16 = vadd.f32 %v7915_v0, %v1604_v12  ;;  %3146 = vperm.xlu1 %7126, %v3098_v9   ;;  %v3091_v9 = vld [vmem:[%s7927_s9] sm:$0xff]  ;;  %s9610_s9 = sld [smem:[#allocation23_spill]] }
  0xf5   : > { %v1565_v17 = vadd.f32 %v7921_v1, %v1550_v14  ;;  %3141 = vperm.xlu0 %7125, %v3097_v10   ;;  %v7943_v24 = vadd.f32 %v1634_v11, %v1626_v15  ;;  %v1487_v11 = vld [vmem:[%s7919_s8 + $0x8] sm:$0xff]  ;;  %v1486_v12 = vld [vmem:[%s7919_s8] sm:$0xff]  ;;  %s9611_s8 = sld [smem:[#allocation25_spill]] }
  0xf6   : > { %v1635_v20 = vmul.f32 %v1619_v16, %v1493_v13 }
  0xf7   : > { %v1627_v21 = vadd.f32 %v1565_v17, %v1493_v13  ;;  %v1540_v22 = vpop.permute.xlu1 %1539 }
  0xf8   : > { %v1535_v23 = vpop.permute.xlu0 %1534  ;;  %3200 = vperm.xlu1 %7126, %v3107_v18   ;;  %v1563_v28 = vadd.f32 %v7921_v1, %v1540_v22 }
  0xf9   : > { %3195 = vperm.xlu0 %7125, %v3106_v19   ;;  %v7945_v25 = vadd.f32 %v1635_v20, %v1627_v21  ;;  %v1562_v29 = vadd.f32 %v7921_v1, %v1535_v23  ;;  %v3100_v21 = vld [vmem:[%s7936_s22] sm:$0xff] }
  0xfa   : > { %v1625_v38 = vadd.f32 %v1563_v28, %v1491_v31  ;;  %v7128_v28 = vld [vmem:[%s7592_s25 + $0x8] sm:$0xff]  }
  0xfb   : > { %v1679_v30 = vpack.c.bf16 %v7945_v25, %v7943_v24  ;;  %v1594_v33 = vpop.permute.xlu1 %1593  ;;  %v1624_v39 = vadd.f32 %v1562_v29, %v1490_v32  ;;  %v3270_v29 = vld [vmem:[%s9602_s12 + $0x68] sm:$0xff] }
  0xfc   : > { %v1589_v34 = vpop.permute.xlu0 %1588  ;;  %v1617_v35 = vadd.f32 %v7915_v0, %v1594_v33  ;;  %3136 = vperm.xlu1 %7126, %v3096_v26   ;;  %v3271_v26 = vld [vmem:[%s9602_s12 + $0x70] sm:$0xff] }
  0xfd   : > { %v1616_v36 = vadd.f32 %v7915_v0, %v1589_v34  ;;  %3131 = vperm.xlu0 %7125, %v3095_v27   ;;  %6684 = vmatprep.subr.bf16.mxu0 %v1679_v30  ;;  %v3267_v33 = vld [vmem:[%s9602_s12 + $0x50] sm:$0xff] }
  0xfe   : > { %v1633_v40 = vmul.f32 %v1617_v35, %v1491_v31  ;;  %6685 = vmatpush3.bf16.msra.mxu0 %v1679_v30  ;;  %v7129_v30 = vld [vmem:[%s7592_s25 + $0x10] sm:$0xff]   ;;  %v3269_v31 = vld [vmem:[%s9602_s12 + $0x60] sm:$0xff]  ;;  %v7130_v35 = vld [vmem:[%s7592_s25 + $0x18] sm:$0xff]  }
  0xff   : > { %v1632_v41 = vmul.f32 %v1616_v36, %v1490_v32  ;;  %v1530_v43 = vpop.permute.xlu1 %1529  ;;  %v3268_v32 = vld [vmem:[%s9602_s12 + $0x58] sm:$0xff] }
 0x100   : > { %v1525_v44 = vpop.permute.xlu0 %1524  ;;  %v7959_v45 = vadd.f32 %v1633_v40, %v1625_v38  ;;  %3190 = vperm.xlu1 %7126, %v3105_v37   ;;  %v1561_v48 = vadd.f32 %v7921_v1, %v1530_v43  ;;  %v3266_v37 = vld [vmem:[%s9602_s12 + $0x48] sm:$0xff]  ;;  %v7131_v38 = vld [vmem:[%s7592_s25 + $0x20] sm:$0xff]   ;;  %v3264_v40 = vld [vmem:[%s9602_s12 + $0x38] sm:$0xff] }
 0x101   : > { %v7961_v46 = vadd.f32 %v1632_v41, %v1624_v39  ;;  %3185 = vperm.xlu0 %7125, %v3104_v42   ;;  %v1560_v49 = vadd.f32 %v7921_v1, %v1525_v44  ;;  %v3265_v39 = vld [vmem:[%s9602_s12 + $0x40] sm:$0xff]  ;;  %v3263_v42 = vld [vmem:[%s9602_s12 + $0x30] sm:$0xff]  ;;  %v7132_v44 = vld [vmem:[%s7592_s25 + $0x28] sm:$0xff]  }
 0x102   : > { %v1623_v59 = vadd.f32 %v1561_v48, %v1489_v52  ;;  %v7133_v48 = vld [vmem:[%s7592_s25 + $0x30] sm:$0xff]  }
 0x103   : > { %v1678_v51 = vpack.c.bf16 %v7959_v45, %v7961_v46  ;;  %v1584_v54 = vpop.permute.xlu1 %1583  ;;  %v1622_v60 = vadd.f32 %v1560_v49, %v1488_v53  ;;  %v3261_v49 = vld [vmem:[%s9602_s12 + $0x20] sm:$0xff] }
 0x104   : > { %v1579_v55 = vpop.permute.xlu0 %1578  ;;  %v1615_v56 = vadd.f32 %v7915_v0, %v1584_v54  ;;  %3126 = vperm.xlu1 %7126, %v3094_v47   ;;  %v3262_v47 = vld [vmem:[%s9602_s12 + $0x28] sm:$0xff]  ;;  %v7134_v54 = vld [vmem:[%s7592_s25 + $0x38] sm:$0xff]  }
 0x105   : > { %v1614_v57 = vadd.f32 %v7915_v0, %v1579_v55  ;;  %6686 = vmatprep.subr.bf16.mxu0 %v1678_v51  ;;  %3121 = vperm.xlu0 %7125, %v3093_v50   ;;  %v3258_v55 = vld [vmem:[%s9602_s12 + $0x8] sm:$0xff] }
 0x106   : > { %6687 = vmatpush3.bf16.msra.mxu0 %v1678_v51  ;;  %v1631_v61 = vmul.f32 %v1615_v56, %v1489_v52  ;;  %v3260_v52 = vld [vmem:[%s9602_s12 + $0x18] sm:$0xff] }
 0x107   : > { %v1630_v62 = vmul.f32 %v1614_v57, %v1488_v53  ;;  %v1520_v2 = vpop.permute.xlu1 %1519  ;;  %v3259_v53 = vld [vmem:[%s9602_s12 + $0x10] sm:$0xff]  ;;  %v3257_v57 = vld [vmem:[%s9602_s12] sm:$0xff] }
 0x108   : > { %v1515_v3 = vpop.permute.xlu0 %1514  ;;  %v7975_v4 = vadd.f32 %v1631_v61, %v1623_v59  ;;  %3180 = vperm.xlu1 %7126, %v3103_v58   ;;  %v1559_v7 = vadd.f32 %v7921_v1, %v1520_v2  ;;  %v3677_v59 = vld [vmem:[%s7687_s27 + $0x38] sm:$0xff]  ;;  %v3674_v2 = vld [vmem:[%s7687_s27 + $0x20] sm:$0xff] }
 0x109   : > { %v7977_v5 = vadd.f32 %v1630_v62, %v1622_v60  ;;  %3175 = vperm.xlu0 %7125, %v3102_v63   ;;  %v1558_v8 = vadd.f32 %v7921_v1, %v1515_v3  ;;  %v3101_v1 = vld [vmem:[%s7936_s22 + $0x8] sm:$0xff]  ;;  %v3676_v60 = vld [vmem:[%s7687_s27 + $0x30] sm:$0xff]  ;;  %v3673_v3 = vld [vmem:[%s7687_s27 + $0x18] sm:$0xff]  ;;  %s9629_s22 = sld [smem:[#allocation35_spill]] }
 0x10a   : > { %v1621_v17 = vadd.f32 %v1559_v7, %v1487_v11  ;;  %v3675_v63 = vld [vmem:[%s7687_s27 + $0x28] sm:$0xff]  ;;  %v3672_v7 = vld [vmem:[%s7687_s27 + $0x10] sm:$0xff] }
 0x10b   : > { %v1677_v10 = vpack.c.bf16 %v7975_v4, %v7977_v5  ;;  %v1574_v13 = vpop.permute.xlu1 %1573  ;;  %v1620_v18 = vadd.f32 %v1558_v8, %v1486_v12 }
 0x10c   : > { %v1569_v14 = vpop.permute.xlu0 %1568  ;;  %v1613_v15 = vadd.f32 %v7915_v0, %v1574_v13  ;;  %3116 = vperm.xlu1 %7126, %v3092_v6   ;;  %v3854_v13 = vld [vmem:[%s9610_s9 + $0x78] sm:$0xff] }
 0x10d   : > { %v1612_v16 = vadd.f32 %v7915_v0, %v1569_v14  ;;  %6688 = vmatprep.subr.bf16.mxu0 %v1677_v10  ;;  %3111 = vperm.xlu0 %7125, %v3091_v9   ;;  %v3272_v0 = vld [vmem:[%s9602_s12 + $0x78] sm:$0xff]  ;;  %v3671_v9 = vld [vmem:[%s7687_s27 + $0x8] sm:$0xff]  ;;  %v3853_v14 = vld [vmem:[%s9610_s9 + $0x70] sm:$0xff] }
 0x10e   : > { %6689 = vmatpush3.bf16.msra.mxu0 %v1677_v10  ;;  %v1629_v19 = vmul.f32 %v1613_v15, %v1487_v11  ;;  %v3670_v10 = vld [vmem:[%s7687_s27] sm:$0xff]  ;;  %v3852_v15 = vld [vmem:[%s9610_s9 + $0x68] sm:$0xff] }
 0x10f   : > { %v1628_v20 = vmul.f32 %v1612_v16, %v1486_v12  ;;  %v8007_v34 = vpop.permute.xlu1 %1757 }
 0x110   : > { %v7991_v22 = vadd.f32 %v1629_v19, %v1621_v17  ;;  %3170 = vperm.xlu1 %7126, %v3101_v1   ;;  %v8010_v36 = vpop.permute.xlu0 %1752  ;;  %v3851_v1 = vld [vmem:[%s9610_s9 + $0x60] sm:$0xff]  ;;  %v3849_v19 = vld [vmem:[%s9610_s9 + $0x50] sm:$0xff] }
 0x111   : > { %v7993_v23 = vadd.f32 %v1628_v20, %v1620_v18  ;;  %3165 = vperm.xlu0 %7125, %v3100_v21   ;;  %v3850_v18 = vld [vmem:[%s9610_s9 + $0x58] sm:$0xff] }
 0x113   : > { %v1676_v27 = vpack.c.bf16 %v7991_v22, %v7993_v23  ;;  %v8018_v41 = vpop.permute.xlu1 %1747 }
 0x114   : > { %3354 = vperm.xlu1 %7126, %v3272_v0   ;;  %v8021_v43 = vpop.permute.xlu0 %1742  ;;  %v3848_v0 = vld [vmem:[%s9610_s9 + $0x48] sm:$0xff] }
 0x115   : > { %6690 = vmatprep.subr.bf16.mxu0 %v1676_v27  ;;  %3349 = vperm.xlu0 %7125, %v3271_v26   ;;  %v3847_v26 = vld [vmem:[%s9610_s9 + $0x40] sm:$0xff] }
 0x116   : > { %6691 = vmatpush3.bf16.msra.mxu0 %v1676_v27  ;;  %v3846_v27 = vld [vmem:[%s9610_s9 + $0x38] sm:$0xff] }
 0x117   : > { %v8027_v50 = vpop.permute.xlu1 %1737 }
 0x118   : > { %3344 = vperm.xlu1 %7126, %v3270_v29   ;;  %v8030_v51 = vpop.permute.xlu0 %1732  ;;  %v3845_v29 = vld [vmem:[%s9610_s9 + $0x30] sm:$0xff] }
 0x119   : > { %6693 = vmatmul.mubr.msk.bf16.vlgmr.msra.gmra.mxu0 %vm1800_vm0, %v7128_v28  ;;  %3339 = vperm.xlu0 %7125, %v3269_v31   ;;  %v3844_v31 = vld [vmem:[%s9610_s9 + $0x28] sm:$0xff] }
 0x11a   : > { %6696 = vmatprep.mubr.msk.bf16.mxu0 %vm1800_vm0, %v7129_v30 }
 0x11b   : > { %v8037_v56 = vpop.permute.xlu1 %1727 }
 0x11c   : > { %3334 = vperm.xlu1 %7126, %v3268_v32   ;;  %v8040_v58 = vpop.permute.xlu0 %1722  ;;  %v3843_v32 = vld [vmem:[%s9610_s9 + $0x20] sm:$0xff] }
 0x11d   : > { %3329 = vperm.xlu0 %7125, %v3267_v33  }
 0x11f   : > { %v8045_v61 = vpop.permute.xlu1 %1717 }
 0x120   : > { %3324 = vperm.xlu1 %7126, %v3266_v37   ;;  %v8047_v62 = vpop.permute.xlu0 %1712  ;;  %v3842_v37 = vld [vmem:[%s9610_s9 + $0x18] sm:$0xff] }
 0x121   : > { %6697 = vmatmul.mubr.msk.bf16.gmra.mxu0 %vm1800_vm0, %v7130_v35  ;;  %3319 = vperm.xlu0 %7125, %v3265_v39   ;;  %v3840_v39 = vld [vmem:[%s9610_s9 + $0x8] sm:$0xff] }
 0x122   : > { %6700 = vmatprep.mubr.msk.bf16.mxu0 %vm1800_vm0, %v7131_v38  ;;  %v3841_v38 = vld [vmem:[%s9610_s9 + $0x10] sm:$0xff] }
 0x123   : > { %v8052_v6 = vpop.permute.xlu1 %1707 }
 0x124   : > { %3314 = vperm.xlu1 %7126, %v3264_v40   ;;  %v8055_v8 = vpop.permute.xlu0 %1702 }
 0x125   : > { %3309 = vperm.xlu0 %7125, %v3263_v42   ;;  %v3839_v42 = vld [vmem:[%s9610_s9] sm:$0xff]  ;;  %s9681_s9 = sld [smem:[#allocation15_spill]] }
 0x127   : > { %v8059_v11 = vpop.permute.xlu1 %1697 }
 0x128   : > { %3304 = vperm.xlu1 %7126, %v3262_v47   ;;  %v8061_v12 = vpop.permute.xlu0 %1692  ;;  %v4253_v47 = vld [vmem:[%s9611_s8 + $0x8] sm:$0xff] }
 0x129   : > { %6701 = vmatmul.mubr.msk.bf16.gmra.mxu0 %vm1800_vm0, %v7132_v44  ;;  %3299 = vperm.xlu0 %7125, %v3261_v49  }
 0x12a   : > { %6704 = vmatprep.mubr.msk.bf16.mxu0 %vm1800_vm0, %v7133_v48  ;;  %v4252_v48 = vld [vmem:[%s9611_s8] sm:$0xff] }
 0x12b   : > { %v8066_v16 = vpop.permute.xlu1 %1687 }
 0x12c   : > { %3294 = vperm.xlu1 %7126, %v3260_v52   ;;  %v8069_v17 = vpop.permute.xlu0 %1682 }
 0x12d   : > { %3289 = vperm.xlu0 %7125, %v3259_v53   ;;  %v4255_v53 = vld [vmem:[%s9611_s8 + $0x18] sm:$0xff] }
 0x12f   : > { %v8073_v20 = vpop.permute.xlu1 %2127 }
 0x130   : > { %3284 = vperm.xlu1 %7126, %v3258_v55   ;;  %v8075_v21 = vpop.permute.xlu0 %2122  ;;  %v4257_v55 = vld [vmem:[%s9611_s8 + $0x28] sm:$0xff] }
 0x131   : > { %6705 = vmatmul.mubr.msk.bf16.gmra.mxu0 %vm1800_vm0, %v7134_v54  ;;  %3279 = vperm.xlu0 %7125, %v3257_v57   ;;  %v4254_v54 = vld [vmem:[%s9611_s8 + $0x10] sm:$0xff] }
 0x133   : > { %v8080_v28 = vpop.permute.xlu1 %2117 }
 0x134   : > { %3723 = vperm.xlu1 %7126, %v3677_v59   ;;  %v8083_v30 = vpop.permute.xlu0 %2112  ;;  %v4256_v59 = vld [vmem:[%s9611_s8 + $0x20] sm:$0xff] }
 0x135   : > { %3718 = vperm.xlu0 %7125, %v3676_v60  }
 0x137   : > { %v8087_v33 = vpop.permute.xlu1 %2107 }
 0x138   : > { %3713 = vperm.xlu1 %7126, %v3675_v63   ;;  %v8089_v35 = vpop.permute.xlu0 %2102  ;;  %v4259_v63 = vld [vmem:[%s9611_s8 + $0x38] sm:$0xff] }
 0x139   : > { %3708 = vperm.xlu0 %7125, %v3674_v2   ;;  %v4258_v2 = vld [vmem:[%s9611_s8 + $0x30] sm:$0xff]  ;;  %s9654_s8 = sld [smem:[#allocation12_spill]] }
 0x13b   : > { %v8094_v40 = vpop.permute.xlu1 %2097 }
 0x13c   : > { %3703 = vperm.xlu1 %7126, %v3673_v3   ;;  %v8097_v44 = vpop.permute.xlu0 %2092 }
 0x13d   : > { %3698 = vperm.xlu0 %7125, %v3672_v7  }
 0x13f   : > { %v8101_v49 = vpop.permute.xlu1 %2340 }
 0x140   : > { %3693 = vperm.xlu1 %7126, %v3671_v9   ;;  %9612 = vst [vmem:[#allocation40_spill] sm:$0xff] %v8101_v49  ;;  %v8103_v52 = vpop.permute.xlu0 %2335  ;;  %v4716_v9 = vld [vmem:[%s9614_s16 + $0x78] sm:$0xff] }
 0x141   : > { %3688 = vperm.xlu0 %7125, %v3670_v10   ;;  %9613 = vst [vmem:[#allocation41_spill] sm:$0xff] %v8103_v52  ;;  %v4715_v10 = vld [vmem:[%s9614_s16 + $0x70] sm:$0xff] }
 0x143   : > { %v8108_v57 = vpop.permute.xlu1 %2330 }
 0x144   : > { %3936 = vperm.xlu1 %7126, %v3854_v13   ;;  %9615 = vst [vmem:[#allocation42_spill] sm:$0xff] %v8108_v57  ;;  %v8111_v60 = vpop.permute.xlu0 %2325  ;;  %v4714_v13 = vld [vmem:[%s9614_s16 + $0x68] sm:$0xff] }
 0x145   : > { %3931 = vperm.xlu0 %7125, %v3853_v14   ;;  %9616 = vst [vmem:[#allocation43_spill] sm:$0xff] %v8111_v60 }
 0x147   : > { %v8115_v3 = vpop.permute.xlu1 %2320 }
 0x148   : > { %3926 = vperm.xlu1 %7126, %v3852_v15   ;;  %9617 = vst [vmem:[#allocation44_spill] sm:$0xff] %v8115_v3  ;;  %v8117_v7 = vpop.permute.xlu0 %2315  ;;  %v4713_v15 = vld [vmem:[%s9614_s16 + $0x60] sm:$0xff] }
 0x149   : > { %3921 = vperm.xlu0 %7125, %v3851_v1  }
 0x14b   : > { %v8122_v14 = vpop.permute.xlu1 %2310 }
 0x14c   : > { %3916 = vperm.xlu1 %7126, %v3850_v18   ;;  %9618 = vst [vmem:[#allocation45_spill] sm:$0xff] %v8122_v14  ;;  %v8125_v1 = vpop.permute.xlu0 %2305  ;;  %v4712_v18 = vld [vmem:[%s9614_s16 + $0x58] sm:$0xff] }
 0x14d   : > { %3911 = vperm.xlu0 %7125, %v3849_v19   ;;  %9619 = vst [vmem:[#allocation46_spill] sm:$0xff] %v8125_v1  ;;  %v4711_v19 = vld [vmem:[%s9614_s16 + $0x50] sm:$0xff] }
 0x150   : > { %3906 = vperm.xlu1 %7126, %v3848_v0   ;;  %v8129_v0 = vpop.permute.xlu1 %2300 }
 0x151   : > { %3901 = vperm.xlu0 %7125, %v3847_v26   ;;  %9620 = vst [vmem:[#allocation47_spill] sm:$0xff] %v8129_v0  ;;  %v8131_v26 = vpop.permute.xlu0 %2295 }
 0x152   : > { %9621 = vst [vmem:[#allocation48_spill] sm:$0xff] %v8131_v26 }
 0x154   : > { %3896 = vperm.xlu1 %7126, %v3846_v27   ;;  %v4710_v27 = vld [vmem:[%s9614_s16 + $0x48] sm:$0xff] }
 0x155   : > { %3891 = vperm.xlu0 %7125, %v3845_v29   ;;  %v4709_v29 = vld [vmem:[%s9614_s16 + $0x40] sm:$0xff] }
 0x158   : > { %3886 = vperm.xlu1 %7126, %v3844_v31   ;;  %v4708_v31 = vld [vmem:[%s9614_s16 + $0x38] sm:$0xff] }
 0x159   : > { %3881 = vperm.xlu0 %7125, %v3843_v32   ;;  %v8136_v32 = vpop.permute.xlu1 %2290 }
 0x15a   : > { %9622 = vst [vmem:[#allocation49_spill] sm:$0xff] %v8136_v32 }
 0x15c   : > { %3876 = vperm.xlu1 %7126, %v3842_v37   ;;  %v4707_v37 = vld [vmem:[%s9614_s16 + $0x30] sm:$0xff] }
 0x15d   : > { %3871 = vperm.xlu0 %7125, %v3841_v38   ;;  %v8139_v38 = vpop.permute.xlu0 %2285 }
 0x15e   : > { %9623 = vst [vmem:[#allocation50_spill] sm:$0xff] %v8139_v38 }
 0x160   : > { %3866 = vperm.xlu1 %7126, %v3840_v39   ;;  %v4706_v39 = vld [vmem:[%s9614_s16 + $0x28] sm:$0xff] }
 0x161   : > { %3861 = vperm.xlu0 %7125, %v3839_v42   ;;  %v4705_v42 = vld [vmem:[%s9614_s16 + $0x20] sm:$0xff] }
 0x164   : > { %4275 = vperm.xlu1 %7126, %v4253_v47   ;;  %v8143_v47 = vpop.permute.xlu1 %2280 }
 0x165   : > { %4270 = vperm.xlu0 %7125, %v4252_v48   ;;  %v8145_v48 = vpop.permute.xlu0 %2275 }
 0x168   : > { %4285 = vperm.xlu1 %7126, %v4255_v53   ;;  %v4704_v53 = vld [vmem:[%s9614_s16 + $0x18] sm:$0xff] }
 0x169   : > { %4280 = vperm.xlu0 %7125, %v4254_v54   ;;  %v4703_v54 = vld [vmem:[%s9614_s16 + $0x10] sm:$0xff] }
 0x16c   : > { %4295 = vperm.xlu1 %7126, %v4257_v55   ;;  %v4702_v55 = vld [vmem:[%s9614_s16 + $0x8] sm:$0xff] }
 0x16d   : > { %4290 = vperm.xlu0 %7125, %v4256_v59   ;;  %v8150_v59 = vpop.permute.xlu1 %2270 }
 0x16e   : > { %9625 = vst [vmem:[#allocation51_spill] sm:$0xff] %v8150_v59 }
 0x170   : > { %4305 = vperm.xlu1 %7126, %v4259_v63   ;;  %v4701_v63 = vld [vmem:[%s9614_s16] sm:$0xff] }
 0x171   : > { %4300 = vperm.xlu0 %7125, %v4258_v2   ;;  %v8153_v2 = vpop.permute.xlu0 %2265 }
 0x172   : > { %9626 = vst [vmem:[#allocation52_spill] sm:$0xff] %v8153_v2 }
 0x174   : > { %4798 = vperm.xlu1 %7126, %v4716_v9   ;;  %v5121_v9 = vld [vmem:[%s9624_s23 + $0x38] sm:$0xff] }
 0x175   : > { %4793 = vperm.xlu0 %7125, %v4715_v10   ;;  %v5120_v10 = vld [vmem:[%s9624_s23 + $0x30] sm:$0xff] }
 0x178   : > { %4788 = vperm.xlu1 %7126, %v4714_v13   ;;  %v8157_v13 = vpop.permute.xlu1 %2679 }
 0x179   : > { %4783 = vperm.xlu0 %7125, %v4713_v15   ;;  %9627 = vst [vmem:[#allocation53_spill] sm:$0xff] %v8157_v13  ;;  %v8159_v15 = vpop.permute.xlu0 %2674 }
 0x17a   : > { %9628 = vst [vmem:[#allocation54_spill] sm:$0xff] %v8159_v15 }
 0x17c   : > { %4778 = vperm.xlu1 %7126, %v4712_v18   ;;  %v5119_v18 = vld [vmem:[%s9624_s23 + $0x28] sm:$0xff] }
 0x17d   : > { %4773 = vperm.xlu0 %7125, %v4711_v19   ;;  %v5118_v19 = vld [vmem:[%s9624_s23 + $0x20] sm:$0xff] }
 0x180   : > { %4768 = vperm.xlu1 %7126, %v4710_v27   ;;  %v5117_v27 = vld [vmem:[%s9624_s23 + $0x18] sm:$0xff] }
 0x181   : > { %4763 = vperm.xlu0 %7125, %v4709_v29   ;;  %v8164_v29 = vpop.permute.xlu1 %2689 }
 0x182   : > { %9630 = vst [vmem:[#allocation55_spill] sm:$0xff] %v8164_v29 }
 0x184   : > { %4758 = vperm.xlu1 %7126, %v4708_v31   ;;  %v5116_v31 = vld [vmem:[%s9624_s23 + $0x10] sm:$0xff] }
 0x185   : > { %4753 = vperm.xlu0 %7125, %v4707_v37   ;;  %v8167_v37 = vpop.permute.xlu0 %2684 }
 0x186   : > { %9631 = vst [vmem:[#allocation56_spill] sm:$0xff] %v8167_v37 }
 0x188   : > { %4748 = vperm.xlu1 %7126, %v4706_v39   ;;  %v5115_v39 = vld [vmem:[%s9624_s23 + $0x8] sm:$0xff] }
 0x189   : > { %4743 = vperm.xlu0 %7125, %v4705_v42   ;;  %v5114_v42 = vld [vmem:[%s9624_s23] sm:$0xff] }
 0x18c   : > { %4738 = vperm.xlu1 %7126, %v4704_v53   ;;  %v8171_v53 = vpop.permute.xlu1 %2699 }
 0x18d   : > { %4733 = vperm.xlu0 %7125, %v4703_v54   ;;  %9632 = vst [vmem:[#allocation57_spill] sm:$0xff] %v8171_v53  ;;  %v8173_v54 = vpop.permute.xlu0 %2694  ;;  %v5282_v53 = vld [vmem:[%s9629_s22 + $0x38] sm:$0xff] }
 0x18e   : > { %9633 = vst [vmem:[#allocation58_spill] sm:$0xff] %v8173_v54  ;;  %v5694_v54 = vld [vmem:[%s9641_s5 + $0x30] sm:$0xff] }
 0x190   : > { %4728 = vperm.xlu1 %7126, %v4702_v55   ;;  %v5290_v55 = vld [vmem:[%s9629_s22 + $0x78] sm:$0xff] }
 0x191   : > { %4723 = vperm.xlu0 %7125, %v4701_v63   ;;  %v5289_v63 = vld [vmem:[%s9629_s22 + $0x70] sm:$0xff] }
 0x194   : > { %5167 = vperm.xlu1 %7126, %v5121_v9   ;;  %v5288_v9 = vld [vmem:[%s9629_s22 + $0x68] sm:$0xff] }
 0x195   : > { %5162 = vperm.xlu0 %7125, %v5120_v10   ;;  %v8178_v10 = vpop.permute.xlu1 %2709 }
 0x196   : > { %9634 = vst [vmem:[#allocation59_spill] sm:$0xff] %v8178_v10 }
 0x198   : > { %5157 = vperm.xlu1 %7126, %v5119_v18   ;;  %v5287_v18 = vld [vmem:[%s9629_s22 + $0x60] sm:$0xff] }
 0x199   : > { %5152 = vperm.xlu0 %7125, %v5118_v19   ;;  %v8181_v19 = vpop.permute.xlu0 %2704 }
 0x19a   : > { %9635 = vst [vmem:[#allocation60_spill] sm:$0xff] %v8181_v19 }
 0x19c   : > { %5147 = vperm.xlu1 %7126, %v5117_v27   ;;  %v5286_v27 = vld [vmem:[%s9629_s22 + $0x58] sm:$0xff] }
 0x19d   : > { %5142 = vperm.xlu0 %7125, %v5116_v31   ;;  %v5285_v31 = vld [vmem:[%s9629_s22 + $0x50] sm:$0xff] }
 0x1a0   : > { %5137 = vperm.xlu1 %7126, %v5115_v39   ;;  %v8185_v39 = vpop.permute.xlu1 %3146 }
 0x1a1   : > { %5132 = vperm.xlu0 %7125, %v5114_v42   ;;  %9637 = vst [vmem:[#allocation61_spill] sm:$0xff] %v8185_v39  ;;  %v8187_v42 = vpop.permute.xlu0 %3141  ;;  %v7135_v39 = vld [vmem:[%s9636_s4] sm:$0xff]  }
 0x1a2   : > { %9638 = vst [vmem:[#allocation62_spill] sm:$0xff] %v8187_v42  ;;  %v5279_v42 = vld [vmem:[%s9629_s22 + $0x20] sm:$0xff]  ;;  %6724 = vmatprep.mubr.bf16.mxu1 %v7135_v39 }
 0x1a4   : > { %5372 = vperm.xlu1 %7126, %v5290_v55   ;;  %v5284_v55 = vld [vmem:[%s9629_s22 + $0x48] sm:$0xff] }
 0x1a5   : > { %5367 = vperm.xlu0 %7125, %v5289_v63   ;;  %v5283_v63 = vld [vmem:[%s9629_s22 + $0x40] sm:$0xff]  ;;  %v8195_v19 = vpop.permute.xlu0 %3195 }
 0x1a6   : > { %9640 = vst [vmem:[#allocation64_spill] sm:$0xff] %v8195_v19  ;;  %v5275_v19 = vld [vmem:[%s9629_s22] sm:$0xff] }
 0x1a8   : > { %5362 = vperm.xlu1 %7126, %v5288_v9   ;;  %v8192_v9 = vpop.permute.xlu1 %3200 }
 0x1a9   : > { %5357 = vperm.xlu0 %7125, %v5287_v18   ;;  %9639 = vst [vmem:[#allocation63_spill] sm:$0xff] %v8192_v9  ;;  %v5281_v18 = vld [vmem:[%s9629_s22 + $0x30] sm:$0xff] }
 0x1aa   : > { %v5277_v9 = vld [vmem:[%s9629_s22 + $0x10] sm:$0xff] }
 0x1ac   : > { %5352 = vperm.xlu1 %7126, %v5286_v27   ;;  %v5280_v27 = vld [vmem:[%s9629_s22 + $0x28] sm:$0xff] }
 0x1ad   : > { %5347 = vperm.xlu0 %7125, %v5285_v31   ;;  %v8200_v31 = vpop.permute.xlu1 %3136 }
 0x1ae   : > { %9642 = vst [vmem:[#allocation65_spill] sm:$0xff] %v8200_v31 }
 0x1b0   : > { %5342 = vperm.xlu1 %7126, %v5284_v55   ;;  %v8202_v55 = vpop.permute.xlu0 %3131 }
 0x1b1   : > { %5337 = vperm.xlu0 %7125, %v5283_v63   ;;  %9643 = vst [vmem:[#allocation66_spill] sm:$0xff] %v8202_v55  ;;  %v5278_v63 = vld [vmem:[%s9629_s22 + $0x18] sm:$0xff]  ;;  %v5688_v55 = vld [vmem:[%s9641_s5] sm:$0xff] }
 0x1b4   : > { %5332 = vperm.xlu1 %7126, %v5282_v53   ;;  %v5276_v53 = vld [vmem:[%s9629_s22 + $0x8] sm:$0xff]  ;;  %v8210_v39 = vpop.permute.xlu0 %3185 }
 0x1b5   : > { %5327 = vperm.xlu0 %7125, %v5281_v18   ;;  %v8207_v18 = vpop.permute.xlu1 %3190  ;;  %9645 = vst [vmem:[#allocation68_spill] sm:$0xff] %v8210_v39  ;;  %v5692_v39 = vld [vmem:[%s9641_s5 + $0x20] sm:$0xff] }
 0x1b6   : > { %9644 = vst [vmem:[#allocation67_spill] sm:$0xff] %v8207_v18  ;;  %v5693_v18 = vld [vmem:[%s9641_s5 + $0x28] sm:$0xff] }
 0x1b8   : > { %5322 = vperm.xlu1 %7126, %v5280_v27   ;;  %v5689_v27 = vld [vmem:[%s9641_s5 + $0x8] sm:$0xff]  ;;  %v8216_v31 = vpop.permute.xlu0 %3121 }
 0x1b9   : > { %5317 = vperm.xlu0 %7125, %v5279_v42   ;;  %v8214_v42 = vpop.permute.xlu1 %3126  ;;  %9647 = vst [vmem:[#allocation70_spill] sm:$0xff] %v8216_v31 }
 0x1ba   : > { %9646 = vst [vmem:[#allocation69_spill] sm:$0xff] %v8214_v42 }
 0x1bc   : > { %5312 = vperm.xlu1 %7126, %v5278_v63   ;;  %v5690_v63 = vld [vmem:[%s9641_s5 + $0x10] sm:$0xff] }
 0x1bd   : > { %5307 = vperm.xlu0 %7125, %v5277_v9   ;;  %v5691_v9 = vld [vmem:[%s9641_s5 + $0x18] sm:$0xff]  ;;  %v8221_v10 = vpop.permute.xlu1 %3180 }
 0x1be   : > { %9648 = vst [vmem:[#allocation71_spill] sm:$0xff] %v8221_v10 }
 0x1c0   : > { %5302 = vperm.xlu1 %7126, %v5276_v53   ;;  %v8224_v53 = vpop.permute.xlu0 %3175 }
 0x1c1   : > { %5297 = vperm.xlu0 %7125, %v5275_v19   ;;  %9649 = vst [vmem:[#allocation72_spill] sm:$0xff] %v8224_v53  ;;  %v5695_v19 = vld [vmem:[%s9641_s5 + $0x38] sm:$0xff]  ;;  %v8228_v13 = vpop.permute.xlu1 %3116  ;;  %s9652_s5 = sld [smem:[#allocation10_spill]] }
 0x1c2   : > { %9650 = vst [vmem:[#allocation73_spill] sm:$0xff] %v8228_v13 }
 0x1c4   : > { %5711 = vperm.xlu1 %7126, %v5689_v27   ;;  %v8230_v27 = vpop.permute.xlu0 %3111 }
 0x1c5   : > { %5706 = vperm.xlu0 %7125, %v5688_v55   ;;  %9651 = vst [vmem:[#allocation74_spill] sm:$0xff] %v8230_v27 }
 0x1c8   : > { %5721 = vperm.xlu1 %7126, %v5691_v9  }
 0x1c9   : > { %5716 = vperm.xlu0 %7125, %v5690_v63  }
 0x1cc   : > { %5731 = vperm.xlu1 %7126, %v5693_v18  }
 0x1cd   : > { %5726 = vperm.xlu0 %7125, %v5692_v39  }
 0x1d0   : > { %5741 = vperm.xlu1 %7126, %v5695_v19  }
 0x1d1   : > { %5736 = vperm.xlu0 %7125, %v5694_v54  }
 0x1d9   : > { %v6694_v55 = vpop.f32.mrf.mxu0 }
 0x1da   : > { %v8241_v54 = vadd.f32 %v6694_v55, %v8061_v12 }
 0x1db   : > { %v1859_v31 = vpop.f32.mrf.mxu0 }
 0x1dd   : > { %v6695_v9 = vpop.f32.mrf.mxu0 }
 0x1de   : > { %v8236_v39 = vadd.f32 %v6695_v9, %v8059_v11 }
 0x1df   : > { %v1862_v63 = vpop.f32.mrf.mxu0 }
 0x1e1   : > { %v6698_v42 = vpop.f32.mrf.mxu0 }
 0x1e2   : > { %v8252_v11 = vadd.f32 %v6698_v42, %v8047_v62  ;;  %v8271_v62 = vadd.f32 %v1862_v63, %v8066_v16 }
 0x1e3   : > { %v1875_v37 = vpop.f32.mrf.mxu0 }
 0x1e4   : > { %v1928_v16 = vmul.f32 %v8252_v11, %v8252_v11  ;;  %v1923_v49 = vmul.f32 %v8271_v62, %v8271_v62 }
 0x1e5   : > { %v6699_v10 = vpop.f32.mrf.mxu0 }
 0x1e6   : > { %v8255_v9 = vadd.f32 %v6699_v10, %v8045_v61 }
 0x1e7   : > { %v1878_v29 = vpop.f32.mrf.mxu0 }
 0x1e8   : > { %v1929_v63 = vmul.f32 %v8255_v9, %v8255_v9 }
 0x1e9   : > { %v6702_v15 = vpop.f32.mrf.mxu0 }
 0x1ea   : > { %v8233_v18 = vadd.f32 %v6702_v15, %v8030_v51  ;;  %v1925_v51 = vmul.f32 %v8236_v39, %v8236_v39  ;;  %v1945_v38 = vmul.f32 %v1929_v63, %v8255_v9 }
 0x1eb   : > { %v1891_v13 = vpop.f32.mrf.mxu0 }
 0x1ec   : > { %v1932_v19 = vmul.f32 %v8233_v18, %v8233_v18  ;;  %v8244_v53 = vadd.f32 %v1891_v13, %v8040_v58  ;;  %v8262_v58 = vmul.f32 %v8241_v54, %v8241_v54  ;;  %v8277_v42 = vmul.f32 %v1925_v51, %v8236_v39 }
 0x1ed   : > { %v6703_v27 = vpop.f32.mrf.mxu0  ;;  %v8292_v51 = vadd.f32 %v1875_v37, %v8055_v8  ;;  %v1961_v14 = vmul.f32 0.044715, %v1945_v38 }
 0x1ee   : > { %v8247_v57 = vadd.f32 %v6703_v27, %v8027_v50  ;;  %v1948_v12 = vmul.f32 %v1932_v19, %v8233_v18  ;;  %v8268_v27 = vadd.f32 %v1859_v31, %v8069_v17  ;;  %v1930_v61 = vmul.f32 %v8244_v53, %v8244_v53 }
 0x1ef   : > { %v1894_v15 = vpop.f32.mrf.mxu0  ;;  %v8280_v19 = vadd.f32 %v1878_v29, %v8052_v6 }
 0x1f0   : > { %v1933_v55 = vmul.f32 %v8247_v57, %v8247_v57  ;;  %v8265_v50 = vadd.f32 %v1894_v15, %v8037_v56  ;;  %v1964_v15 = vmul.f32 0.044715, %v1948_v12  ;;  %v1946_v60 = vmul.f32 %v1930_v61, %v8244_v53 }
 0x1f1   : > { %v6706_v13 = vpop.f32.mrf.mxu0  ;;  %v1927_v8 = vmul.f32 %v8280_v19, %v8280_v19 }
 0x1f2   : > { %v1949_v10 = vmul.f32 %v1933_v55, %v8247_v57  ;;  %v1931_v56 = vmul.f32 %v8265_v50, %v8265_v50  ;;  %v8285_v17 = vadd.f32 %v6706_v13, %v8010_v36  ;;  %v1980_v52 = vadd.f32 %v1964_v15, %v8233_v18 }
 0x1f3   : > { %v1907_v31 = vpop.f32.mrf.mxu0  ;;  %v1962_v32 = vmul.f32 0.044715, %v1946_v60  ;;  %v1943_v2 = vmul.f32 %v1927_v8, %v8280_v19 }
 0x1f4   : > { %v1965_v55 = vmul.f32 0.044715, %v1949_v10  ;;  %v1947_v6 = vmul.f32 %v1931_v56, %v8265_v50  ;;  %v1936_v29 = vmul.f32 %v8285_v17, %v8285_v17  ;;  %v8298_v36 = vadd.f32 %v1907_v31, %v8021_v43 }
 0x1f5   : > { %v6707_v13 = vpop.f32.mrf.mxu0  ;;  %v1996_v0 = vmul.f32 0.7978846, %v1980_v52  ;;  %v1978_v3 = vadd.f32 %v1962_v32, %v8244_v53  ;;  %v1959_v1 = vmul.f32 0.044715, %v1943_v2  ;;  %v1977_v52 = vadd.f32 %v1961_v14, %v8255_v9 }
 0x1f6   : > { %v1981_v12 = vadd.f32 %v1965_v55, %v8247_v57  ;;  %v8305_v10 = vadd.f32 %v6707_v13, %v8007_v34  ;;  %v1963_v37 = vmul.f32 0.044715, %v1947_v6  ;;  %v1952_v56 = vmul.f32 %v1936_v29, %v8285_v17 }
 0x1f7   : > { %v1934_v43 = vmul.f32 %v8298_v36, %v8298_v36  ;;  %v1910_v31 = vpop.f32.mrf.mxu0  ;;  %v1944_v55 = vmul.f32 %v1928_v16, %v8252_v11  ;;  %v1926_v6 = vmul.f32 %v8292_v51, %v8292_v51  ;;  %v1922_v32 = vmul.f32 %v8268_v27, %v8268_v27 }
 0x1f8   : > { %v1937_v61 = vmul.f32 %v8305_v10, %v8305_v10  ;;  %v8317_v34 = vadd.f32 %v1910_v31, %v8018_v41  ;;  %v1968_v29 = vmul.f32 0.044715, %v1952_v56  ;;  %v1997_v59 = vmul.f32 0.7978846, %v1981_v12 }
 0x1f9   : > { %v1950_v13 = vmul.f32 %v1934_v43, %v8298_v36  ;;  %v1979_v41 = vadd.f32 %v1963_v37, %v8265_v50  ;;  %v1960_v43 = vmul.f32 0.044715, %v1944_v55  ;;  %v1942_v60 = vmul.f32 %v1926_v6, %v8292_v51 }
 0x1fa   : > { %v1953_v63 = vmul.f32 %v1937_v61, %v8305_v10  ;;  %v1935_v15 = vmul.f32 %v8317_v34, %v8317_v34  ;;  %v1984_v31 = vadd.f32 %v1968_v29, %v8285_v17  ;;  %7208 = vtanh.f32 %v1997_v59 }
 0x1fb   : > { %v1966_v16 = vmul.f32 0.044715, %v1950_v13  ;;  %v1995_v29 = vmul.f32 0.7978846, %v1979_v41  ;;  %v1940_v6 = vmul.f32 %v8262_v58, %v8241_v54  ;;  %v1976_v59 = vadd.f32 %v1960_v43, %v8252_v11 }
 0x1fc   : > { %v1969_v26 = vmul.f32 0.044715, %v1953_v63  ;;  %v1951_v56 = vmul.f32 %v1935_v15, %v8317_v34  ;;  %v2000_v12 = vmul.f32 0.7978846, %v1984_v31  ;;  %v1994_v2 = vmul.f32 0.7978846, %v1978_v3 }
 0x1fd   : > { %v1982_v61 = vadd.f32 %v1966_v16, %v8298_v36  ;;  %v1939_v15 = vmul.f32 %v1923_v49, %v8271_v62  ;;  %v1957_v14 = vmul.f32 0.044715, %v8277_v42  ;;  %v1975_v41 = vadd.f32 %v1959_v1, %v8280_v19 }
 0x1fe   : > { %v1985_v8 = vadd.f32 %v1969_v26, %v8305_v10  ;;  %v1967_v37 = vmul.f32 0.044715, %v1951_v56  ;;  %7210 = vtanh.f32 %v2000_v12  ;;  %v1958_v26 = vmul.f32 0.044715, %v1942_v60 }
 0x1ff   : > { %v1998_v13 = vmul.f32 0.7978846, %v1982_v61  ;;  %7212 = vtanh.f32 %v1996_v0  ;;  %v1993_v0 = vmul.f32 0.7978846, %v1977_v52  ;;  %v1938_v58 = vmul.f32 %v1922_v32, %v8268_v27 }
 0x200   : > { %v2001_v38 = vmul.f32 0.7978846, %v1985_v8  ;;  %v1983_v55 = vadd.f32 %v1967_v37, %v8317_v34  ;;  %v1956_v31 = vmul.f32 0.044715, %v1940_v6  ;;  %v1992_v16 = vmul.f32 0.7978846, %v1976_v59 }
 0x201   : > { %7214 = vtanh.f32 %v1998_v13  ;;  %v1974_v56 = vadd.f32 %v1958_v26, %v8292_v51  ;;  %v1955_v43 = vmul.f32 0.044715, %v1939_v15  ;;  %v1973_v3 = vadd.f32 %v1957_v14, %v8236_v39 }
 0x202   : > { %v1999_v63 = vmul.f32 0.7978846, %v1983_v55  ;;  %7216 = vtanh.f32 %v2001_v38  ;;  %v1991_v60 = vmul.f32 0.7978846, %v1975_v41  ;;  %v1954_v49 = vmul.f32 0.044715, %v1938_v58 }
 0x203   : > { %7218 = vtanh.f32 %v1995_v29  ;;  %v1972_v12 = vadd.f32 %v1956_v31, %v8241_v54  ;;  %v1990_v42 = vmul.f32 0.7978846, %v1974_v56  ;;  %v1971_v1 = vadd.f32 %v1955_v43, %v8271_v62 }
 0x204   : > { %7220 = vtanh.f32 %v1999_v63  ;;  %v1989_v37 = vmul.f32 0.7978846, %v1973_v3  ;;  %v1970_v13 = vadd.f32 %v1954_v49, %v8268_v27 }
 0x205   : > { %7222 = vtanh.f32 %v1994_v2  ;;  %v1988_v55 = vmul.f32 0.7978846, %v1972_v12  ;;  %v1987_v32 = vmul.f32 0.7978846, %v1971_v1 }
 0x206   : > { %7224 = vtanh.f32 %v1993_v0  ;;  %v1986_v0 = vmul.f32 0.7978846, %v1970_v13 }
 0x207   : > { %7226 = vtanh.f32 %v1992_v16  ;;  %v7209_v61 = vpop.eup %7208 }
 0x208   : > { %7228 = vtanh.f32 %v1991_v60  ;;  %v2029_v26 = vadd.f32 1.0, %v7209_v61 }
 0x209   : > { %7230 = vtanh.f32 %v1990_v42 }
 0x20a   : > { %7232 = vtanh.f32 %v1989_v37  ;;  %v2045_v43 = vmul.f32 0.5, %v2029_v26 }
 0x20b   : > { %v7211_v8 = vpop.eup %7210  ;;  %7234 = vtanh.f32 %v1988_v55 }
 0x20c   : > { %v7213_v29 = vpop.eup %7212  ;;  %v2032_v52 = vadd.f32 1.0, %v7211_v8  ;;  %7236 = vtanh.f32 %v1987_v32 }
 0x20d   : > { %v2028_v41 = vadd.f32 1.0, %v7213_v29  ;;  %7238 = vtanh.f32 %v1986_v0 }
 0x20e   : > { %v7215_v38 = vpop.eup %7214  ;;  %v2048_v15 = vmul.f32 0.5, %v2032_v52 }
 0x20f   : > { %v7217_v6 = vpop.eup %7216  ;;  %v2030_v59 = vadd.f32 1.0, %v7215_v38  ;;  %v2044_v61 = vmul.f32 0.5, %v2028_v41  ;;  %v2061_v38 = vmul.f32 %v2045_v43, %v8247_v57 }
 0x210   : > { %v7219_v2 = vpop.eup %7218  ;;  %v2033_v63 = vadd.f32 1.0, %v7217_v6  ;;  %v2064_v3 = vmul.f32 %v2048_v15, %v8285_v17 }
 0x211   : > { %v7221_v14 = vpop.eup %7220  ;;  %v2046_v16 = vmul.f32 0.5, %v2030_v59  ;;  %v2027_v12 = vadd.f32 1.0, %v7219_v2 }
 0x212   : > { %v2049_v58 = vmul.f32 0.5, %v2033_v63  ;;  %v2031_v31 = vadd.f32 1.0, %v7221_v14  ;;  %v7223_v56 = vpop.eup %7222 }
 0x213   : > { %v7225_v42 = vpop.eup %7224  ;;  %v2062_v8 = vmul.f32 %v2046_v16, %v8298_v36  ;;  %v2026_v29 = vadd.f32 1.0, %v7223_v56  ;;  %v2043_v55 = vmul.f32 0.5, %v2027_v12 }
 0x214   : > { %v2065_v60 = vmul.f32 %v2049_v58, %v8305_v10  ;;  %v2047_v49 = vmul.f32 0.5, %v2031_v31  ;;  %v7227_v13 = vpop.eup %7226  ;;  %v2025_v17 = vadd.f32 1.0, %v7225_v42  ;;  %v2060_v10 = vmul.f32 %v2044_v61, %v8233_v18 }
 0x215   : > { %v7229_v6 = vpop.eup %7228  ;;  %v2042_v32 = vmul.f32 0.5, %v2026_v29  ;;  %v2024_v59 = vadd.f32 1.0, %v7227_v13  ;;  %v2059_v36 = vmul.f32 %v2043_v55, %v8265_v50  ;;  %v7137_v55 = vld [vmem:[%s9636_s4 + $0x10] sm:$0xff]  }
 0x216   : > { %v2089_v1 = vpack.c.bf16 %v2065_v60, %v2064_v3  ;;  %v2063_v37 = vmul.f32 %v2047_v49, %v8317_v34  ;;  %v7231_v26 = vpop.eup %7230  ;;  %v2087_v2 = vpack.c.bf16 %v2061_v38, %v2060_v10  ;;  %v2041_v34 = vmul.f32 0.5, %v2025_v17  ;;  %v7138_v17 = vld [vmem:[%s9636_s4 + $0x18] sm:$0xff]  }
 0x217   : > { %v2023_v63 = vadd.f32 1.0, %v7229_v6  ;;  %v7233_v15 = vpop.eup %7232  ;;  %v2058_v57 = vmul.f32 %v2042_v32, %v8244_v53  ;;  %v2040_v14 = vmul.f32 0.5, %v2024_v59  ;;  %v2022_v0 = vadd.f32 1.0, %v7231_v26 }
 0x218   : > { %6708 = vmatprep.subr.bf16.mxu1 %v2089_v1  ;;  %v2088_v52 = vpack.c.bf16 %v2063_v37, %v2062_v8  ;;  %v7235_v41 = vpop.eup %7234  ;;  %v2057_v18 = vmul.f32 %v2041_v34, %v8255_v9  ;;  %v2021_v56 = vadd.f32 1.0, %v7233_v15 }
 0x219   : > { %6709 = vmatpush3.bf16.msra.mxu1 %v2089_v1  ;;  %v7237_v58 = vpop.eup %7236  ;;  %v2086_v31 = vpack.c.bf16 %v2059_v36, %v2058_v57  ;;  %v2039_v16 = vmul.f32 0.5, %v2023_v63  ;;  %v2056_v50 = vmul.f32 %v2040_v14, %v8252_v11  ;;  %v2038_v3 = vmul.f32 0.5, %v2022_v0 }
 0x21a   : > { %6710 = vmatprep.subr.bf16.mxu1 %v2088_v52  ;;  %v7239_v43 = vpop.eup %7238  ;;  %v2020_v60 = vadd.f32 1.0, %v7235_v41  ;;  %v2037_v53 = vmul.f32 0.5, %v2021_v56  ;;  %v2019_v42 = vadd.f32 1.0, %v7237_v58  ;;  %v7143_v58 = vld [vmem:[%s9652_s5 + $0x20] sm:$0xff]  }
 0x21b   : > { %v2085_v49 = vpack.c.bf16 %v2057_v18, %v2056_v50  ;;  %v2055_v12 = vmul.f32 %v2039_v16, %v8280_v19  ;;  %v2054_v61 = vmul.f32 %v2038_v3, %v8292_v51  ;;  %v2018_v9 = vadd.f32 1.0, %v7239_v43  ;;  %v7146_v18 = vld [vmem:[%s9652_s5 + $0x38] sm:$0xff]   ;;  %v7151_v56 = vld [vmem:[%s9654_s8] sm:$0xff]   ;;  %s9673_s8 = sld [smem:[#allocation14_spill]] }
 0x21c   : > { %v2036_v1 = vmul.f32 0.5, %v2020_v60  ;;  %v2053_v37 = vmul.f32 %v2037_v53, %v8236_v39  ;;  %v2035_v29 = vmul.f32 0.5, %v2019_v42  ;;  %v7136_v39 = vld [vmem:[%s9636_s4 + $0x8] sm:$0xff]   ;;  %s9653_s4 = sld [smem:[#allocation11_spill]] }
 0x21d   : > { %6711 = vmatpush3.bf16.msra.mxu1 %v2088_v52  ;;  %v2084_v8 = vpack.c.bf16 %v2055_v12, %v2054_v61  ;;  %v2034_v19 = vmul.f32 0.5, %v2018_v9 }
 0x21e   : > { %6712 = vmatprep.subr.bf16.mxu1 %v2087_v2  ;;  %v2052_v11 = vmul.f32 %v2036_v1, %v8241_v54  ;;  %v2051_v52 = vmul.f32 %v2035_v29, %v8271_v62  ;;  %v7139_v54 = vld [vmem:[%s9652_s5] sm:$0xff]  }
 0x21f   : > { %v2050_v51 = vmul.f32 %v2034_v19, %v8268_v27  ;;  %6740 = vmatprep.mubr.msk.bf16.mxu0 %vm1800_vm0, %v7139_v54  ;;  %v9655_v19 = vld [vmem:[#allocation46_spill] sm:$0xff] }
 0x220   : > { %v2083_v13 = vpack.c.bf16 %v2053_v37, %v2052_v11 }
 0x221   : > { %6713 = vmatpush3.bf16.msra.mxu1 %v2087_v2  ;;  %v2082_v38 = vpack.c.bf16 %v2051_v52, %v2050_v51  ;;  %v9656_v52 = vld [vmem:[#allocation44_spill] sm:$0xff] }
 0x222   : > { %6714 = vmatprep.subr.bf16.mxu1 %v2086_v31  ;;  %v7147_v16 = vld [vmem:[%s9653_s4] sm:$0xff]  }
 0x225   : > { %6715 = vmatpush3.bf16.msra.mxu1 %v2086_v31  ;;  %v7145_v31 = vld [vmem:[%s9652_s5 + $0x30] sm:$0xff]  }
 0x226   : > { %6716 = vmatprep.subr.bf16.mxu1 %v2085_v49 }
 0x229   : > { %6717 = vmatpush3.bf16.msra.mxu1 %v2085_v49 }
 0x22a   : > { %6718 = vmatprep.subr.bf16.mxu1 %v2084_v8 }
 0x22d   : > { %6719 = vmatpush3.bf16.msra.mxu1 %v2084_v8 }
 0x22e   : > { %6720 = vmatprep.subr.bf16.mxu1 %v2083_v13 }
 0x231   : > { %6721 = vmatpush3.bf16.msra.mxu1 %v2083_v13 }
 0x232   : > { %6722 = vmatprep.subr.bf16.mxu1 %v2082_v38 }
 0x235   : > { %6723 = vmatpush3.bf16.msra.mxu1 %v2082_v38 }
 0x238   : > { %6725 = vmatmul.mubr.bf16.vlgmr.msra.gmra.mxu1 %v7136_v39 }
 0x239   : > { %6728 = vmatprep.mubr.bf16.mxu1 %v7137_v55  ;;  %v9658_v55 = vld [vmem:[#allocation47_spill] sm:$0xff] }
 0x240   : > { %6729 = vmatmul.mubr.bf16.gmra.mxu1 %v7138_v17 }
 0x241   : > { %6772 = vmatprep.mubr.bf16.mxu1 %v7147_v16 }
 0x2f8   : > { %v6726_v6 = vpop.f32.mrf.mxu1 }
 0x2f9   : > { %v2197_v41 = vadd.f32 %v6726_v6, %v8089_v35 }
 0x2fa   : > { %v2188_v10 = vpop.f32.mrf.mxu1 }
 0x2fc   : > { %v6727_v62 = vpop.f32.mrf.mxu1 }
 0x2fd   : > { %v2200_v15 = vadd.f32 %v6727_v62, %v8087_v33 }
 0x2fe   : > { %v2191_v32 = vpop.f32.mrf.mxu1 }
 0x2ff   : > { %v8392_v33 = vadd.f32 %v2200_v15, %v7975_v4  ;;  %v9662_v15 = vld [vmem:[#allocation49_spill] sm:$0xff] }
 0x300   : > { %v6730_v59 = vpop.f32.mrf.mxu1 }
 0x301   : > { %v2213_v27 = vadd.f32 %v6730_v59, %v8075_v21  ;;  %v9660_v59 = vld [vmem:[#allocation52_spill] sm:$0xff] }
 0x302   : > { %v2204_v26 = vpop.f32.mrf.mxu1 }
 0x303   : > { %v2205_v36 = vadd.f32 %v2204_v26, %v8083_v30  ;;  %v8376_v57 = vadd.f32 %v2213_v27, %v7943_v24  ;;  %v2192_v24 = vadd.f32 %v2191_v32, %v8094_v40  ;;  %v7140_v40 = vld [vmem:[%s9652_s5 + $0x8] sm:$0xff]   ;;  %v9661_v27 = vld [vmem:[#allocation51_spill] sm:$0xff] }
 0x304   : > { %v6731_v2 = vpop.f32.mrf.mxu1 }
 0x305   : > { %v2216_v34 = vadd.f32 %v6731_v2, %v8073_v20  ;;  %v8384_v21 = vadd.f32 %v2205_v36, %v7961_v46  ;;  %v8398_v46 = vadd.f32 %v2197_v41, %v7977_v5  ;;  %v8402_v4 = vadd.f32 %v2192_v24, %v7991_v22  ;;  %v7141_v22 = vld [vmem:[%s9652_s5 + $0x10] sm:$0xff]  }
 0x306   : > { %v2207_v63 = vpop.f32.mrf.mxu1 }
 0x307   : > { %v8379_v14 = vadd.f32 %v2216_v34, %v7945_v25  ;;  %v2208_v0 = vadd.f32 %v2207_v63, %v8080_v28  ;;  %v2260_v28 = vpack.c.bf16 %v8392_v33, %v8398_v46 }
 0x309   : > { %v8387_v30 = vadd.f32 %v2208_v0, %v7959_v45  ;;  %v2262_v20 = vpack.c.bf16 %v8379_v14, %v8376_v57  ;;  %v2189_v45 = vadd.f32 %v2188_v10, %v8097_v44  ;;  %v7142_v44 = vld [vmem:[%s9652_s5 + $0x18] sm:$0xff]   ;;  %v9659_v10 = vld [vmem:[#allocation45_spill] sm:$0xff] }
 0x30b   : > { %6732 = vmatprep.subr.bf16.mxu0 %v2262_v20  ;;  %v2261_v25 = vpack.c.bf16 %v8387_v30, %v8384_v21  ;;  %v8407_v35 = vadd.f32 %v2189_v45, %v7993_v23  ;;  %v7144_v23 = vld [vmem:[%s9652_s5 + $0x28] sm:$0xff]   ;;  %s9679_s5 = sld [smem:[#allocation17_spill]] }
 0x30c   : > { %6733 = vmatpush3.bf16.msra.mxu0 %v2262_v20  ;;  %v9663_v20 = vld [vmem:[#allocation41_spill] sm:$0xff] }
 0x30d   : > { %6734 = vmatprep.subr.bf16.mxu0 %v2261_v25  ;;  %v2259_v5 = vpack.c.bf16 %v8402_v4, %v8407_v35 }
 0x310   : > { %6735 = vmatpush3.bf16.msra.mxu0 %v2261_v25 }
 0x311   : > { %6736 = vmatprep.subr.bf16.mxu0 %v2260_v28  ;;  %s1476_s12 = scalar_lea.vmem %s9679_s5, %s7844_s2  ;;  %s9696_s5 = sld [smem:[#allocation21_spill]] }
 0x314   : > { %6737 = vmatpush3.bf16.msra.mxu0 %v2260_v28 }
 0x315   : > { %6738 = vmatprep.subr.bf16.mxu0 %v2259_v5 }
 0x318   : > { %6739 = vmatpush3.bf16.msra.mxu0 %v2259_v5 }
 0x319   : > { %6780 = vmatprep.subr.bf16.mxu0 %v7151_v56 }
 0x31b   : > { %6741 = vmatmul.mubr.msk.bf16.vlgmr.msra.gmra.mxu0 %vm1800_vm0, %v7140_v40 }
 0x31c   : > { %6744 = vmatprep.mubr.msk.bf16.mxu0 %vm1800_vm0, %v7141_v22  ;;  %6781 = vmatpush3.bf16.msra.mxu0 %v7151_v56  ;;  %v9664_v22 = vld [vmem:[#allocation50_spill] sm:$0xff] }
 0x323   : > { %6745 = vmatmul.mubr.msk.bf16.gmra.mxu0 %vm1800_vm0, %v7142_v44 }
 0x324   : > { %6748 = vmatprep.mubr.msk.bf16.mxu0 %vm1800_vm0, %v7143_v58 }
 0x32b   : > { %6749 = vmatmul.mubr.msk.bf16.gmra.mxu0 %vm1800_vm0, %v7144_v23 }
 0x32c   : > { %6752 = vmatprep.mubr.msk.bf16.mxu0 %vm1800_vm0, %v7145_v31  ;;  %v9665_v31 = vld [vmem:[#allocation43_spill] sm:$0xff] }
 0x333   : > { %6753 = vmatmul.mubr.msk.bf16.gmra.mxu0 %vm1800_vm0, %v7146_v18 }
 0x3db   : > { %v6742_v43 = vpop.f32.mrf.mxu0 }
 0x3dc   : > { %v8436_v29 = vadd.f32 %v6742_v43, %v8145_v48 }
 0x3dd   : > { %v2441_v50 = vpop.f32.mrf.mxu0 }
 0x3de   : > { %v8457_v6 = vmul.f32 %v8436_v29, %v8436_v29  ;;  %v8463_v26 = vadd.f32 %v2441_v50, %v9660_v59 }
 0x3df   : > { %v6743_v3 = vpop.f32.mrf.mxu0 }
 0x3e0   : > { %v8431_v9 = vadd.f32 %v6743_v3, %v8143_v47  ;;  %v9657_v47 = vld [vmem:[#allocation48_spill] sm:$0xff] }
 0x3e1   : > { %v2444_v60 = vpop.f32.mrf.mxu0  ;;  %v9666_v3 = vld [vmem:[#allocation40_spill] sm:$0xff] }
 0x3e2   : > { %v8466_v2 = vadd.f32 %v2444_v60, %v9661_v27 }
 0x3e3   : > { %v6746_v49 = vpop.f32.mrf.mxu0 }
 0x3e4   : > { %v8447_v39 = vadd.f32 %v6746_v49, %v9657_v47  ;;  %v2505_v56 = vmul.f32 %v8466_v2, %v8466_v2 }
 0x3e5   : > { %v2457_v12 = vpop.f32.mrf.mxu0 }
 0x3e6   : > { %v2510_v45 = vmul.f32 %v8447_v39, %v8447_v39  ;;  %v8487_v44 = vadd.f32 %v2457_v12, %v9664_v22 }
 0x3e7   : > { %v6747_v53 = vpop.f32.mrf.mxu0 }
 0x3e8   : > { %v8450_v17 = vadd.f32 %v6747_v53, %v9658_v55 }
 0x3e9   : > { %v2460_v42 = vpop.f32.mrf.mxu0 }
 0x3ea   : > { %v8475_v0 = vadd.f32 %v2460_v42, %v9662_v15  ;;  %v2511_v28 = vmul.f32 %v8450_v17, %v8450_v17 }
 0x3eb   : > { %v6750_v61 = vpop.f32.mrf.mxu0 }
 0x3ec   : > { %v8428_v1 = vadd.f32 %v6750_v61, %v8117_v7  ;;  %v2507_v7 = vmul.f32 %v8431_v9, %v8431_v9  ;;  %v2509_v49 = vmul.f32 %v8475_v0, %v8475_v0 }
 0x3ed   : > { %v2473_v8 = vpop.f32.mrf.mxu0 }
 0x3ee   : > { %v2514_v37 = vmul.f32 %v8428_v1, %v8428_v1  ;;  %v8439_v13 = vadd.f32 %v2473_v8, %v9655_v19  ;;  %v8472_v63 = vmul.f32 %v2507_v7, %v8431_v9  ;;  %v2527_v8 = vmul.f32 %v2511_v28, %v8450_v17  ;;  %v9667_v19 = vld [vmem:[#allocation42_spill] sm:$0xff] }
 0x3ef   : > { %v6751_v11 = vpop.f32.mrf.mxu0  ;;  %v2526_v7 = vmul.f32 %v2510_v45, %v8447_v39  ;;  %v2525_v59 = vmul.f32 %v2509_v49, %v8475_v0 }
 0x3f0   : > { %v8442_v51 = vadd.f32 %v6751_v11, %v9656_v52  ;;  %v2530_v48 = vmul.f32 %v2514_v37, %v8428_v1  ;;  %v2512_v36 = vmul.f32 %v8439_v13, %v8439_v13  ;;  %v2543_v15 = vmul.f32 0.044715, %v2527_v8 }
 0x3f1   : > { %v2476_v38 = vpop.f32.mrf.mxu0  ;;  %v2542_v45 = vmul.f32 0.044715, %v2526_v7 }
 0x3f2   : > { %v2515_v54 = vmul.f32 %v8442_v51, %v8442_v51  ;;  %v8460_v62 = vadd.f32 %v2476_v38, %v9659_v10  ;;  %v2546_v5 = vmul.f32 0.044715, %v2530_v48  ;;  %v2528_v43 = vmul.f32 %v2512_v36, %v8439_v13 }
 0x3f3   : > { %v6754_v32 = vpop.f32.mrf.mxu0  ;;  %v2508_v38 = vmul.f32 %v8487_v44, %v8487_v44 }
 0x3f4   : > { %v2531_v34 = vmul.f32 %v2515_v54, %v8442_v51  ;;  %v2513_v41 = vmul.f32 %v8460_v62, %v8460_v62  ;;  %v8480_v24 = vadd.f32 %v6754_v32, %v9663_v20  ;;  %v2562_v37 = vadd.f32 %v2546_v5, %v8428_v1 }
 0x3f5   : > { %v2489_v25 = vpop.f32.mrf.mxu0  ;;  %v2544_v48 = vmul.f32 0.044715, %v2528_v43  ;;  %v2524_v28 = vmul.f32 %v2508_v38, %v8487_v44 }
 0x3f6   : > { %v2547_v40 = vmul.f32 0.044715, %v2531_v34  ;;  %v2529_v58 = vmul.f32 %v2513_v41, %v8460_v62  ;;  %v2518_v23 = vmul.f32 %v8480_v24, %v8480_v24  ;;  %v8493_v18 = vadd.f32 %v2489_v25, %v9665_v31 }
 0x3f7   : > { %v6755_v16 = vpop.f32.mrf.mxu0  ;;  %v2578_v41 = vmul.f32 0.7978846, %v2562_v37  ;;  %v2560_v22 = vadd.f32 %v2544_v48, %v8439_v13  ;;  %v2541_v31 = vmul.f32 0.044715, %v2525_v59 }
 0x3f8   : > { %v2563_v50 = vadd.f32 %v2547_v40, %v8442_v51  ;;  %v8500_v60 = vadd.f32 %v6755_v16, %v9666_v3  ;;  %v2545_v12 = vmul.f32 0.044715, %v2529_v58  ;;  %v2534_v53 = vmul.f32 %v2518_v23, %v8480_v24 }
 0x3f9   : > { %v2516_v42 = vmul.f32 %v8493_v18, %v8493_v18  ;;  %v2492_v61 = vpop.f32.mrf.mxu0  ;;  %v2576_v8 = vmul.f32 0.7978846, %v2560_v22  ;;  %v2557_v38 = vadd.f32 %v2541_v31, %v8475_v0 }
 0x3fa   : > { %v2519_v11 = vmul.f32 %v8500_v60, %v8500_v60  ;;  %v8512_v52 = vadd.f32 %v2492_v61, %v9667_v19  ;;  %v2550_v47 = vmul.f32 0.044715, %v2534_v53  ;;  %v2579_v54 = vmul.f32 0.7978846, %v2563_v50 }
 0x3fb   : > { %v2532_v55 = vmul.f32 %v2516_v42, %v8493_v18  ;;  %v2561_v27 = vadd.f32 %v2545_v12, %v8460_v62  ;;  %v2559_v50 = vadd.f32 %v2543_v15, %v8450_v17  ;;  %v2522_v12 = vmul.f32 %v8457_v6, %v8436_v29 }
 0x3fc   : > { %v2535_v10 = vmul.f32 %v2519_v11, %v8500_v60  ;;  %v2517_v32 = vmul.f32 %v8512_v52, %v8512_v52  ;;  %v2566_v36 = vadd.f32 %v2550_v47, %v8480_v24  ;;  %7240 = vtanh.f32 %v2579_v54 }
 0x3fd   : > { %v2548_v34 = vmul.f32 0.044715, %v2532_v55  ;;  %v2577_v16 = vmul.f32 0.7978846, %v2561_v27  ;;  %v2504_v53 = vmul.f32 %v8463_v26, %v8463_v26  ;;  %v2558_v42 = vadd.f32 %v2542_v45, %v8447_v39 }
 0x3fe   : > { %v2551_v20 = vmul.f32 0.044715, %v2535_v10  ;;  %v2533_v25 = vmul.f32 %v2517_v32, %v8512_v52  ;;  %v2582_v5 = vmul.f32 0.7978846, %v2566_v36  ;;  %v2540_v61 = vmul.f32 0.044715, %v2524_v28 }
 0x3ff   : > { %v2564_v40 = vadd.f32 %v2548_v34, %v8493_v18  ;;  %v2521_v11 = vmul.f32 %v2505_v56, %v8466_v2  ;;  %v2539_v19 = vmul.f32 0.044715, %v8472_v63  ;;  %v2575_v7 = vmul.f32 0.7978846, %v2559_v50 }
 0x400   : > { %v2567_v58 = vadd.f32 %v2551_v20, %v8500_v60  ;;  %v2549_v23 = vmul.f32 0.044715, %v2533_v25  ;;  %7242 = vtanh.f32 %v2582_v5  ;;  %v2520_v6 = vmul.f32 %v2504_v53, %v8463_v26 }
 0x401   : > { %v2580_v43 = vmul.f32 0.7978846, %v2564_v40  ;;  %7244 = vtanh.f32 %v2578_v41  ;;  %v2538_v47 = vmul.f32 0.044715, %v2522_v12  ;;  %v2574_v55 = vmul.f32 0.7978846, %v2558_v42 }
 0x402   : > { %v2583_v3 = vmul.f32 0.7978846, %v2567_v58  ;;  %v2565_v49 = vadd.f32 %v2549_v23, %v8512_v52  ;;  %v2556_v48 = vadd.f32 %v2540_v61, %v8487_v44  ;;  %v2537_v54 = vmul.f32 0.044715, %v2521_v11 }
 0x403   : > { %7246 = vtanh.f32 %v2580_v43  ;;  %v2555_v10 = vadd.f32 %v2539_v19, %v8431_v9  ;;  %v2573_v32 = vmul.f32 0.7978846, %v2557_v38  ;;  %v2536_v56 = vmul.f32 0.044715, %v2520_v6 }
 0x404   : > { %7248 = vtanh.f32 %v2583_v3  ;;  %v2581_v37 = vmul.f32 0.7978846, %v2565_v49  ;;  %v2554_v59 = vadd.f32 %v2538_v47, %v8436_v29  ;;  %v2572_v63 = vmul.f32 0.7978846, %v2556_v48 }
 0x405   : > { %7250 = vtanh.f32 %v2577_v16  ;;  %v2553_v36 = vadd.f32 %v2537_v54, %v8466_v2  ;;  %v2571_v15 = vmul.f32 0.7978846, %v2555_v10  ;;  %v2552_v20 = vadd.f32 %v2536_v56, %v8463_v26 }
 0x406   : > { %7252 = vtanh.f32 %v2581_v37  ;;  %v2570_v28 = vmul.f32 0.7978846, %v2554_v59 }
 0x407   : > { %7254 = vtanh.f32 %v2576_v8  ;;  %v2569_v40 = vmul.f32 0.7978846, %v2553_v36  ;;  %v2568_v50 = vmul.f32 0.7978846, %v2552_v20 }
 0x408   : > { %7256 = vtanh.f32 %v2575_v7 }
 0x409   : > { %7258 = vtanh.f32 %v2574_v55  ;;  %v7241_v27 = vpop.eup %7240 }
 0x40a   : > { %7260 = vtanh.f32 %v2573_v32  ;;  %v2611_v58 = vadd.f32 1.0, %v7241_v27 }
 0x40b   : > { %7262 = vtanh.f32 %v2572_v63 }
 0x40c   : > { %7264 = vtanh.f32 %v2571_v15  ;;  %v2627_v61 = vmul.f32 0.5, %v2611_v58 }
 0x40d   : > { %v7243_v34 = vpop.eup %7242  ;;  %7266 = vtanh.f32 %v2570_v28 }
 0x40e   : > { %v7245_v41 = vpop.eup %7244  ;;  %v2614_v25 = vadd.f32 1.0, %v7243_v34  ;;  %7268 = vtanh.f32 %v2569_v40  ;;  %v2643_v32 = vmul.f32 %v2627_v61, %v8442_v51 }
 0x40f   : > { %v2610_v3 = vadd.f32 1.0, %v7245_v41  ;;  %7270 = vtanh.f32 %v2568_v50 }
 0x410   : > { %v7247_v45 = vpop.eup %7246  ;;  %v2630_v16 = vmul.f32 0.5, %v2614_v25 }
 0x411   : > { %v7249_v5 = vpop.eup %7248  ;;  %v2612_v22 = vadd.f32 1.0, %v7247_v45  ;;  %v2626_v38 = vmul.f32 0.5, %v2610_v3 }
 0x412   : > { %v7251_v23 = vpop.eup %7250  ;;  %v2615_v31 = vadd.f32 1.0, %v7249_v5  ;;  %v2646_v8 = vmul.f32 %v2630_v16, %v8480_v24 }
 0x413   : > { %v7253_v43 = vpop.eup %7252  ;;  %v2628_v53 = vmul.f32 0.5, %v2612_v22  ;;  %v2609_v19 = vadd.f32 1.0, %v7251_v23 }
 0x414   : > { %v2631_v49 = vmul.f32 0.5, %v2615_v31  ;;  %v2613_v12 = vadd.f32 1.0, %v7253_v43  ;;  %v7255_v42 = vpop.eup %7254 }
 0x415   : > { %v7257_v7 = vpop.eup %7256  ;;  %v2644_v47 = vmul.f32 %v2628_v53, %v8493_v18  ;;  %v2608_v48 = vadd.f32 1.0, %v7255_v42  ;;  %v2625_v56 = vmul.f32 0.5, %v2609_v19  ;;  %v7150_v19 = vld [vmem:[%s9653_s4 + $0x18] sm:$0xff]  }
 0x416   : > { %v2647_v37 = vmul.f32 %v2631_v49, %v8500_v60  ;;  %v2629_v11 = vmul.f32 0.5, %v2613_v12  ;;  %v7259_v54 = vpop.eup %7258  ;;  %v2607_v24 = vadd.f32 1.0, %v7257_v7  ;;  %v2642_v60 = vmul.f32 %v2626_v38, %v8428_v1 }
 0x417   : > { %v7261_v59 = vpop.eup %7260  ;;  %v2624_v63 = vmul.f32 0.5, %v2608_v48  ;;  %v2606_v27 = vadd.f32 1.0, %v7259_v54  ;;  %v2641_v18 = vmul.f32 %v2625_v56, %v8460_v62  ;;  %v9670_v48 = vld [vmem:[#allocation56_spill] sm:$0xff] }
 0x418   : > { %v2671_v6 = vpack.c.bf16 %v2647_v37, %v2646_v8  ;;  %v2645_v55 = vmul.f32 %v2629_v11, %v8512_v52  ;;  %v7263_v36 = vpop.eup %7262  ;;  %v2669_v34 = vpack.c.bf16 %v2643_v32, %v2642_v60  ;;  %v2623_v52 = vmul.f32 0.5, %v2607_v24  ;;  %v7148_v11 = vld [vmem:[%s9653_s4 + $0x8] sm:$0xff]  }
 0x419   : > { %v2605_v15 = vadd.f32 1.0, %v7261_v59  ;;  %v7265_v41 = vpop.eup %7264  ;;  %v2640_v51 = vmul.f32 %v2624_v63, %v8439_v13  ;;  %v2622_v20 = vmul.f32 0.5, %v2606_v27  ;;  %v2604_v25 = vadd.f32 1.0, %v7263_v36 }
 0x41a   : > { %6756 = vmatprep.subr.bf16.mxu1 %v2671_v6  ;;  %v2670_v10 = vpack.c.bf16 %v2645_v55, %v2644_v47  ;;  %v7267_v45 = vpop.eup %7266  ;;  %v2639_v1 = vmul.f32 %v2623_v52, %v8450_v17  ;;  %v2603_v22 = vadd.f32 1.0, %v7265_v41 }
 0x41b   : > { %6757 = vmatpush3.bf16.msra.mxu1 %v2671_v6  ;;  %v7269_v28 = vpop.eup %7268  ;;  %v2668_v5 = vpack.c.bf16 %v2641_v18, %v2640_v51  ;;  %v2621_v40 = vmul.f32 0.5, %v2605_v15  ;;  %v2638_v62 = vmul.f32 %v2622_v20, %v8447_v39  ;;  %v2620_v23 = vmul.f32 0.5, %v2604_v25  ;;  %v9668_v6 = vld [vmem:[#allocation54_spill] sm:$0xff]  ;;  %v9676_v51 = vld [vmem:[#allocation57_spill] sm:$0xff] }
 0x41c   : > { %6758 = vmatprep.subr.bf16.mxu1 %v2670_v10  ;;  %v7271_v58 = vpop.eup %7270  ;;  %v2602_v31 = vadd.f32 1.0, %v7267_v45  ;;  %v2619_v13 = vmul.f32 0.5, %v2603_v22  ;;  %v2601_v50 = vadd.f32 1.0, %v7269_v28  ;;  %v9672_v18 = vld [vmem:[#allocation58_spill] sm:$0xff] }
 0x41d   : > { %v2667_v16 = vpack.c.bf16 %v2639_v1, %v2638_v62  ;;  %v2637_v43 = vmul.f32 %v2621_v40, %v8475_v0  ;;  %v2636_v3 = vmul.f32 %v2620_v23, %v8487_v44  ;;  %v2600_v17 = vadd.f32 1.0, %v7271_v58 }
 0x41e   : > { %v2618_v49 = vmul.f32 0.5, %v2602_v31  ;;  %v2635_v53 = vmul.f32 %v2619_v13, %v8431_v9  ;;  %v2617_v42 = vmul.f32 0.5, %v2601_v50  ;;  %v7149_v9 = vld [vmem:[%s9653_s4 + $0x10] sm:$0xff]   ;;  %s9677_s4 = sld [smem:[#allocation13_spill]] }
 0x41f   : > { %6759 = vmatpush3.bf16.msra.mxu1 %v2670_v10  ;;  %v2666_v12 = vpack.c.bf16 %v2637_v43, %v2636_v3  ;;  %v2616_v0 = vmul.f32 0.5, %v2600_v17  ;;  %v9671_v10 = vld [vmem:[#allocation53_spill] sm:$0xff] }
 0x420   : > { %6760 = vmatprep.subr.bf16.mxu1 %v2669_v34  ;;  %v2634_v39 = vmul.f32 %v2618_v49, %v8436_v29  ;;  %v2633_v8 = vmul.f32 %v2617_v42, %v8466_v2  ;;  %v9669_v2 = vld [vmem:[#allocation55_spill] sm:$0xff] }
 0x421   : > { %v2632_v44 = vmul.f32 %v2616_v0, %v8463_v26 }
 0x422   : > { %v2665_v61 = vpack.c.bf16 %v2635_v53, %v2634_v39 }
 0x423   : > { %6761 = vmatpush3.bf16.msra.mxu1 %v2669_v34  ;;  %v2664_v37 = vpack.c.bf16 %v2633_v8, %v2632_v44 }
 0x424   : > { %6762 = vmatprep.subr.bf16.mxu1 %v2668_v5 }
 0x427   : > { %6763 = vmatpush3.bf16.msra.mxu1 %v2668_v5 }
 0x428   : > { %6764 = vmatprep.subr.bf16.mxu1 %v2667_v16 }
 0x42b   : > { %6765 = vmatpush3.bf16.msra.mxu1 %v2667_v16 }
 0x42c   : > { %6766 = vmatprep.subr.bf16.mxu1 %v2666_v12 }
 0x42f   : > { %6767 = vmatpush3.bf16.msra.mxu1 %v2666_v12 }
 0x430   : > { %6768 = vmatprep.subr.bf16.mxu1 %v2665_v61 }
 0x433   : > { %6769 = vmatpush3.bf16.msra.mxu1 %v2665_v61 }
 0x434   : > { %6770 = vmatprep.subr.bf16.mxu1 %v2664_v37 }
 0x437   : > { %6771 = vmatpush3.bf16.msra.mxu1 %v2664_v37 }
 0x43a   : > { %6773 = vmatmul.mubr.bf16.vlgmr.msra.gmra.mxu1 %v7148_v11 }
 0x43b   : > { %6776 = vmatprep.mubr.bf16.mxu1 %v7149_v9 }
 0x442   : > { %6777 = vmatmul.mubr.bf16.gmra.mxu1 %v7150_v19 }
 0x4fa   : > { %v6774_v7 = vpop.f32.mrf.mxu1 }
 0x4fb   : > { %v2779_v54 = vadd.f32 %v6774_v7, %v9670_v48 }
 0x4fc   : > { %v2770_v29 = vpop.f32.mrf.mxu1 }
 0x4fd   : > { %v2771_v47 = vadd.f32 %v2770_v29, %v9668_v6  ;;  %v8578_v63 = vadd.f32 %v2779_v54, %v8398_v46 }
 0x4fe   : > { %v6775_v38 = vpop.f32.mrf.mxu1 }
 0x4ff   : > { %v2782_v55 = vadd.f32 %v6775_v38, %v9669_v2  ;;  %v8572_v59 = vadd.f32 %v2771_v47, %v8407_v35  ;;  %v9674_v35 = vld [vmem:[#allocation59_spill] sm:$0xff] }
 0x500   : > { %v2773_v26 = vpop.f32.mrf.mxu1 }
 0x501   : > { %v2774_v32 = vadd.f32 %v2773_v26, %v9671_v10  ;;  %v8569_v56 = vadd.f32 %v2782_v55, %v8392_v33 }
 0x502   : > { %v6778_v24 = vpop.f32.mrf.mxu1 }
 0x503   : > { %v8575_v60 = vadd.f32 %v2774_v32, %v8402_v4  ;;  %v2813_v34 = vpack.c.bf16 %v8569_v56, %v8578_v63  ;;  %v9675_v4 = vld [vmem:[#allocation60_spill] sm:$0xff] }
 0x504   : > { %v2786_v27 = vpop.f32.mrf.mxu1  ;;  %v2795_v46 = vadd.f32 %v6778_v24, %v9675_v4 }
 0x505   : > { %v2812_v36 = vpack.c.bf16 %v8575_v60, %v8572_v59  ;;  %v2787_v52 = vadd.f32 %v2786_v27, %v9672_v18 }
 0x506   : > { %v6779_v33 = vpop.f32.mrf.mxu1  ;;  %v8600_v5 = vadd.f32 %v2795_v46, %v8376_v57 }
 0x507   : > { %v2798_v15 = vadd.f32 %v6779_v33, %v9674_v35  ;;  %6782 = vmatprep.mubr.msk.bf16.mxu0 %vm2828_vm1, %v2812_v36  ;;  %v8594_v45 = vadd.f32 %v2787_v52, %v8384_v21  ;;  %v7153_v21 = vld [vmem:[%s9673_s8] sm:$0xff]  }
 0x508   : > { %v2789_v41 = vpop.f32.mrf.mxu1  ;;  %6783 = vmatmul.mubr.msk.bf16.vlgmr.msra.gmra.mxu0 %vm2828_vm1, %v2813_v34 }
 0x509   : > { %v2790_v20 = vadd.f32 %v2789_v41, %v9676_v51  ;;  %v8591_v25 = vadd.f32 %v2798_v15, %v8379_v14  ;;  %v7152_v14 = vld [vmem:[%s9673_s8 + $0x8] sm:$0xff]   ;;  %s9680_s8 = sld [smem:[#allocation18_spill]] }
 0x50a   : > { %6790 = vmatprep.subr.bf16.mxu1 %v7152_v14 }
 0x50b   : > { %v8597_v28 = vadd.f32 %v2790_v20, %v8387_v30  ;;  %v2815_v40 = vpack.c.bf16 %v8591_v25, %v8600_v5  ;;  %6791 = vmatpush3.bf16.msra.mxu1 %v7152_v14  ;;  %v6375_v30 = vld [vmem:[%s9677_s4] ss:$0 sm:$0xff]  ;;  %s9678_s4 = sld [smem:[#allocation19_spill]] }
 0x50c   : > { %6792 = vmatprep.subr.bf16.mxu1 %v7153_v21 }
 0x50d   : > { %v2814_v1 = vpack.c.bf16 %v8597_v28, %v8594_v45 }
 0x50f   : > { %6786 = vmatprep.mubr.msk.bf16.mxu0 %vm2828_vm1, %v2814_v1  ;;  %6793 = vmatpush3.bf16.msra.mxu1 %v7153_v21  ;;  %s1484_s13 = scalar_lea.vmem %s9680_s8, %s7844_s2  ;;  %s9699_s2 = sld [smem:[#allocation26_spill]] }
 0x510   : > { %6787 = vmatmul.mubr.msk.bf16.gmra.mxu0 %vm2828_vm1, %v2815_v40  ;;  %s9701_s8 = sld [smem:[#allocation27_spill]] }
 0x5c8   : > { %v6784_v22 = vpop.f32.mrf.mxu0 }
 0x5c9   : > { %v8611_v57 = vadd.f32 %v6784_v22, %v6375_v30 }
 0x5ca   : > { %v2875_v58 = vpop.f32.mrf.mxu0 }
 0x5cb   : > { %v2908_v62 = vmul.f32 %v8611_v57, %v8611_v57  ;;  %v8615_v23 = vadd.f32 %v6375_v30, %v2875_v58 }
 0x5cc   : > { %v6785_v31 = vpop.f32.mrf.mxu0 }
 0x5cd   : > { %v2916_v16 = vmul.f32 %v2908_v62, %v8611_v57  ;;  %v2906_v43 = vmul.f32 %v8615_v23, %v8615_v23  ;;  %v8620_v13 = vadd.f32 %v6785_v31, %v6375_v30 }
 0x5ce   : > { %v2878_v50 = vpop.f32.mrf.mxu0 }
 0x5cf   : > { %v2924_v3 = vmul.f32 0.044715, %v2916_v16  ;;  %v2914_v49 = vmul.f32 %v2906_v43, %v8615_v23  ;;  %v2909_v17 = vmul.f32 %v8620_v13, %v8620_v13  ;;  %v8625_v12 = vadd.f32 %v6375_v30, %v2878_v50 }
 0x5d0   : > { %v6788_v53 = vpop.f32.mrf.mxu0 }
 0x5d1   : > { %v2932_v42 = vadd.f32 %v2924_v3, %v8611_v57  ;;  %v2922_v39 = vmul.f32 0.044715, %v2914_v49  ;;  %v2917_v0 = vmul.f32 %v2909_v17, %v8620_v13  ;;  %v2907_v61 = vmul.f32 %v8625_v12, %v8625_v12 }
 0x5d2   : > { %v8631_v8 = vadd.f32 %v6788_v53, %v6375_v30  ;;  %v2891_v44 = vpop.f32.mrf.mxu0 }
 0x5d3   : > { %v2940_v37 = vmul.f32 0.7978846, %v2932_v42  ;;  %v2930_v11 = vadd.f32 %v2922_v39, %v8615_v23  ;;  %v2925_v9 = vmul.f32 0.044715, %v2917_v0  ;;  %v2915_v19 = vmul.f32 %v2907_v61, %v8625_v12 }
 0x5d4   : > { %v2912_v7 = vmul.f32 %v8631_v8, %v8631_v8  ;;  %v8637_v29 = vadd.f32 %v6375_v30, %v2891_v44  ;;  %v6789_v38 = vpop.f32.mrf.mxu0 }
 0x5d5   : > { %v2938_v6 = vmul.f32 0.7978846, %v2930_v11  ;;  %v2933_v47 = vadd.f32 %v2925_v9, %v8620_v13  ;;  %v2923_v2 = vmul.f32 0.044715, %v2915_v19  ;;  %7272 = vtanh.f32 %v2940_v37 }
 0x5d6   : > { %v2920_v55 = vmul.f32 %v2912_v7, %v8631_v8  ;;  %v2910_v48 = vmul.f32 %v8637_v29, %v8637_v29  ;;  %v8643_v54 = vadd.f32 %v6789_v38, %v6375_v30  ;;  %v2894_v26 = vpop.f32.mrf.mxu0 }
 0x5d7   : > { %7274 = vtanh.f32 %v2938_v6  ;;  %v2941_v10 = vmul.f32 0.7978846, %v2933_v47  ;;  %v2931_v32 = vadd.f32 %v2923_v2, %v8625_v12  ;;  %v2895_v24 = vadd.f32 %v6375_v30, %v2894_v26 }
 0x5d8   : > { %v2928_v27 = vmul.f32 0.044715, %v2920_v55  ;;  %v2918_v36 = vmul.f32 %v2910_v48, %v8637_v29  ;;  %v2913_v34 = vmul.f32 %v8643_v54, %v8643_v54 }
 0x5d9   : > { %7276 = vtanh.f32 %v2941_v10  ;;  %v2939_v33 = vmul.f32 0.7978846, %v2931_v32  ;;  %v2911_v18 = vmul.f32 %v2895_v24, %v2895_v24 }
 0x5da   : > { %v2936_v52 = vadd.f32 %v2928_v27, %v8631_v8  ;;  %v2926_v35 = vmul.f32 0.044715, %v2918_v36  ;;  %v2921_v15 = vmul.f32 %v2913_v34, %v8643_v54  ;;  %v7154_v34 = vld [vmem:[%s9678_s4] sm:$0xff]  }
 0x5db   : > { %7278 = vtanh.f32 %v2939_v33  ;;  %v2919_v4 = vmul.f32 %v2911_v18, %v2895_v24  ;;  %6810 = vmatprep.mubr.msk.bf16.mxu0 %vm1800_vm0, %v7154_v34 }
 0x5dc   : > { %v2944_v46 = vmul.f32 0.7978846, %v2936_v52  ;;  %v2934_v41 = vadd.f32 %v2926_v35, %v8637_v29  ;;  %v2929_v51 = vmul.f32 0.044715, %v2921_v15  ;;  %v6381_v35 = vld [vmem:[%s9681_s9] ss:$0 sm:$0xff] }
 0x5dd   : > { %v2927_v20 = vmul.f32 0.044715, %v2919_v4  ;;  %v9682_v4 = vld [vmem:[#allocation61_spill] sm:$0xff]  ;;  %s9700_s9 = sld [smem:[#allocation28_spill]] }
 0x5de   : > { %7280 = vtanh.f32 %v2944_v46  ;;  %v2942_v1 = vmul.f32 0.7978846, %v2934_v41  ;;  %v2937_v40 = vadd.f32 %v2929_v51, %v8643_v54 }
 0x5df   : > { %v2935_v14 = vadd.f32 %v2927_v20, %v2895_v24  ;;  %v9683_v20 = vld [vmem:[#allocation62_spill] sm:$0xff] }
 0x5e0   : > { %7282 = vtanh.f32 %v2942_v1  ;;  %v2945_v21 = vmul.f32 0.7978846, %v2937_v40  ;;  %v9684_v40 = vld [vmem:[#allocation63_spill] sm:$0xff] }
 0x5e1   : > { %v2943_v30 = vmul.f32 0.7978846, %v2935_v14 }
 0x5e2   : > { %7284 = vtanh.f32 %v2945_v21  ;;  %v7273_v22 = vpop.eup %7272 }
 0x5e3   : > { %7286 = vtanh.f32 %v2943_v30  ;;  %v2956_v16 = vadd.f32 1.0, %v7273_v22  ;;  %v9685_v22 = vld [vmem:[#allocation64_spill] sm:$0xff] }
 0x5e4   : > { %v7275_v58 = vpop.eup %7274 }
 0x5e5   : > { %v2954_v62 = vadd.f32 1.0, %v7275_v58  ;;  %v2964_v53 = vmul.f32 0.5, %v2956_v16  ;;  %v9687_v16 = vld [vmem:[#allocation66_spill] sm:$0xff] }
 0x5e6   : > { %v7277_v31 = vpop.eup %7276 }
 0x5e7   : > { %v2957_v43 = vadd.f32 1.0, %v7277_v31  ;;  %v2962_v3 = vmul.f32 0.5, %v2954_v62  ;;  %v2972_v11 = vmul.f32 %v2964_v53, %v8611_v57  ;;  %v9686_v62 = vld [vmem:[#allocation65_spill] sm:$0xff]  ;;  %v9689_v53 = vld [vmem:[#allocation68_spill] sm:$0xff] }
 0x5e8   : > { %v7279_v50 = vpop.eup %7278 }
 0x5e9   : > { %v2965_v49 = vmul.f32 0.5, %v2957_v43  ;;  %v2955_v17 = vadd.f32 1.0, %v7279_v50  ;;  %v2970_v44 = vmul.f32 %v2962_v3, %v8615_v23 }
 0x5eb   : > { %v7281_v42 = vpop.eup %7280  ;;  %v2963_v39 = vmul.f32 0.5, %v2955_v17  ;;  %v2973_v0 = vmul.f32 %v2965_v49, %v8620_v13  ;;  %v9688_v49 = vld [vmem:[#allocation67_spill] sm:$0xff] }
 0x5ec   : > { %v2960_v9 = vadd.f32 1.0, %v7281_v42 }
 0x5ed   : > { %v7283_v61 = vpop.eup %7282  ;;  %v2971_v37 = vmul.f32 %v2963_v39, %v8625_v12  ;;  %v2984_v47 = vpack.c.bf16 %v2973_v0, %v2972_v11 }
 0x5ee   : > { %v2958_v19 = vadd.f32 1.0, %v7283_v61  ;;  %v2968_v13 = vmul.f32 0.5, %v2960_v9  ;;  %v9690_v61 = vld [vmem:[#allocation69_spill] sm:$0xff] }
 0x5ef   : > { %v7285_v7 = vpop.eup %7284  ;;  %v2983_v38 = vpack.c.bf16 %v2971_v37, %v2970_v44  ;;  %v9691_v37 = vld [vmem:[#allocation70_spill] sm:$0xff] }
 0x5f0   : > { %v7287_v6 = vpop.eup %7286  ;;  %v2961_v2 = vadd.f32 1.0, %v7285_v7  ;;  %v2966_v55 = vmul.f32 0.5, %v2958_v19  ;;  %v2976_v32 = vmul.f32 %v2968_v13, %v8631_v8 }
 0x5f1   : > { %v2959_v48 = vadd.f32 1.0, %v7287_v6  ;;  %6794 = vmatprep.mubr.msk.bf16.mxu1 %vm3005_vm2, %v2983_v38 }
 0x5f2   : > { %v2969_v23 = vmul.f32 0.5, %v2961_v2  ;;  %6795 = vmatmul.mubr.msk.bf16.vlgmr.msra.gmra.mxu1 %vm3005_vm2, %v2984_v47  ;;  %v2974_v26 = vmul.f32 %v2966_v55, %v8637_v29  ;;  %v6388_v29 = vld [vmem:[%s1476_s12] ss:$0 sm:$0xff]  ;;  %v9692_v2 = vld [vmem:[#allocation71_spill] sm:$0xff]  ;;  %s9698_s12 = sld [smem:[#allocation24_spill]] }
 0x5f3   : > { %v2967_v57 = vmul.f32 0.5, %v2959_v48  ;;  %v3162_v46 = vadd.f32 %v6388_v29, %v9682_v4  ;;  %v3161_v1 = vadd.f32 %v6388_v29, %v9683_v20  ;;  %v3160_v31 = vadd.f32 %v6388_v29, %v9686_v62 }
 0x5f4   : > { %v2977_v12 = vmul.f32 %v2969_v23, %v8643_v54  ;;  %v3159_v43 = vadd.f32 %v6388_v29, %v9687_v16  ;;  %v3158_v44 = vadd.f32 %v6388_v29, %v9690_v61  ;;  %v3171_v23 = vpop.permute.xlu1 %3170  ;;  %v7155_v16 = vld [vmem:[%s9678_s4 + $0x8] sm:$0xff]  }
 0x5f5   : > { %v2975_v10 = vmul.f32 %v2967_v57, %v2895_v24  ;;  %v6389_v24 = vld [vmem:[%s1484_s13] ss:$0 sm:$0xff]  ;;  %s9697_s13 = sld [smem:[#allocation22_spill]] }
 0x5f6   : > { %v2986_v36 = vpack.c.bf16 %v2977_v12, %v2976_v32  ;;  %v3216_v14 = vadd.f32 %v6389_v24, %v9684_v40  ;;  %v3215_v58 = vadd.f32 %v6389_v24, %v9685_v22  ;;  %v3214_v17 = vadd.f32 %v6389_v24, %v9688_v49  ;;  %v7159_v49 = vld [vmem:[%s9678_s4 + $0x28] sm:$0xff]  }
 0x5f7   : > { %v2985_v27 = vpack.c.bf16 %v2975_v10, %v2974_v26  ;;  %v3213_v42 = vadd.f32 %v6389_v24, %v9689_v53  ;;  %v3212_v55 = vadd.f32 %v6389_v24, %v9692_v2  ;;  %v7161_v53 = vld [vmem:[%s9678_s4 + $0x38] sm:$0xff]  }
 0x5f9   : > { %6798 = vmatprep.mubr.msk.bf16.mxu1 %vm3005_vm2, %v2985_v27 }
 0x5fa   : > { %6799 = vmatmul.mubr.msk.bf16.gmra.mxu1 %vm3005_vm2, %v2986_v36 }
 0x6b2   : > { %v6796_v33 = vpop.f32.mrf.mxu1 }
 0x6b3   : > { %v3061_v50 = vadd.f32 %v6796_v33, %v6381_v35 }
 0x6b4   : > { %v3052_v18 = vpop.f32.mrf.mxu1 }
 0x6b5   : > { %v3085_v48 = vadd.f32 %v3061_v50, %v8578_v63  ;;  %v3053_v13 = vadd.f32 %v6381_v35, %v3052_v18  ;;  %v9694_v18 = vld [vmem:[#allocation73_spill] sm:$0xff]  ;;  %v7157_v50 = vld [vmem:[%s9678_s4 + $0x18] sm:$0xff]  }
 0x6b6   : > { %v6797_v52 = vpop.f32.mrf.mxu1 }
 0x6b7   : > { %v3064_v41 = vadd.f32 %v6797_v52, %v6381_v35 }
 0x6b8   : > { %v3055_v54 = vpop.f32.mrf.mxu1 }
 0x6b9   : > { %v3086_v11 = vadd.f32 %v3064_v41, %v8569_v56  ;;  %v3056_v9 = vadd.f32 %v6381_v35, %v3055_v54  ;;  %v9693_v56 = vld [vmem:[#allocation72_spill] sm:$0xff] }
 0x6ba   : > { %v6800_v15 = vpop.f32.mrf.mxu1  ;;  %v3211_v32 = vadd.f32 %v6389_v24, %v9693_v56 }
 0x6bb   : > { %v3077_v8 = vadd.f32 %v6800_v15, %v6381_v35  ;;  %v3220_v27 = vadd.f32 %v3158_v44, %v3086_v11  ;;  %v3228_v36 = vmul.f32 %v3212_v55, %v3086_v11  ;;  %v3084_v34 = vadd.f32 %v3056_v9, %v8575_v60 }
 0x6bc   : > { %v3068_v51 = vpop.f32.mrf.mxu1  ;;  %v3210_v15 = vadd.f32 %v6389_v24, %v3171_v23  ;;  %v3227_v4 = vmul.f32 %v3211_v32, %v3085_v48 }
 0x6bd   : > { %v3089_v21 = vadd.f32 %v3077_v8, %v8600_v5  ;;  %v3069_v30 = vadd.f32 %v6381_v35, %v3068_v51  ;;  %v3157_v5 = vadd.f32 %v6388_v29, %v9691_v37  ;;  %v9695_v51 = vld [vmem:[#allocation74_spill] sm:$0xff] }
 0x6be   : > { %v6801_v3 = vpop.f32.mrf.mxu1  ;;  %v3155_v20 = vadd.f32 %v6388_v29, %v9695_v51 }
 0x6bf   : > { %v3087_v39 = vadd.f32 %v3069_v30, %v8594_v45  ;;  %v3080_v0 = vadd.f32 %v6801_v3, %v6381_v35  ;;  %v3223_v7 = vadd.f32 %v3161_v1, %v3089_v21  ;;  %v3231_v38 = vmul.f32 %v3215_v58, %v3089_v21  ;;  %v7158_v3 = vld [vmem:[%s9678_s4 + $0x20] sm:$0xff]  }
 0x6c0   : > { %v3071_v19 = vpop.f32.mrf.mxu1  ;;  %v3219_v8 = vadd.f32 %v3157_v5, %v3085_v48  ;;  %v8705_v30 = vadd.f32 %v3228_v36, %v3220_v27 }
 0x6c1   : > { %v3090_v6 = vadd.f32 %v3080_v0, %v8591_v25  ;;  %v3072_v47 = vadd.f32 %v6381_v35, %v3071_v19  ;;  %v3221_v45 = vadd.f32 %v3159_v43, %v3087_v39  ;;  %v3229_v57 = vmul.f32 %v3213_v42, %v3087_v39  ;;  %v3166_v25 = vpop.permute.xlu0 %3165  ;;  %v7156_v43 = vld [vmem:[%s9678_s4 + $0x10] sm:$0xff]   ;;  %v7162_v42 = vld [vmem:[%s9696_s5] sm:$0xff]   ;;  %v8732_v39 = vpop.permute.xlu1 %3354 }
 0x6c2   : > { %v8690_v54 = vadd.f32 %v3231_v38, %v3223_v7  ;;  %v3156_v35 = vadd.f32 %v6388_v29, %v9694_v18  ;;  %v3209_v1 = vadd.f32 %v6389_v24, %v3166_v25  ;;  %v8707_v58 = vadd.f32 %v3227_v4, %v3219_v8  ;;  %6842 = vmatprep.mubr.bf16.mxu1 %v7162_v42 }
 0x6c3   : > { %v3224_v12 = vadd.f32 %v3162_v46, %v3090_v6  ;;  %v3232_v26 = vmul.f32 %v3216_v14, %v3090_v6  ;;  %v3088_v10 = vadd.f32 %v3072_v47, %v8597_v28  ;;  %v3083_v28 = vadd.f32 %v3053_v13, %v8572_v59 }
 0x6c4   : > { %v8698_v41 = vadd.f32 %v3229_v57, %v3221_v45  ;;  %v3218_v40 = vadd.f32 %v3156_v35, %v3084_v34  ;;  %v3226_v14 = vmul.f32 %v3210_v15, %v3084_v34  ;;  %v3274_v29 = vpack.c.bf16 %v8705_v30, %v8707_v58 }
 0x6c5   : > { %v3222_v33 = vadd.f32 %v3160_v31, %v3088_v10  ;;  %v3230_v52 = vmul.f32 %v3214_v17, %v3088_v10  ;;  %v8692_v63 = vadd.f32 %v3232_v26, %v3224_v12  ;;  %v3217_v59 = vadd.f32 %v3155_v20, %v3083_v28  ;;  %v7160_v17 = vld [vmem:[%s9678_s4 + $0x30] sm:$0xff]   ;;  %v3350_v0 = vpop.permute.xlu0 %3349  ;;  %v8734_v61 = vpop.permute.xlu1 %3344  ;;  %s9706_s4 = sld [smem:[#allocation36_spill]] }
 0x6c6   : > { %v3225_v22 = vmul.f32 %v3209_v1, %v3083_v28  ;;  %v8711_v24 = vadd.f32 %v3226_v14, %v3218_v40 }
 0x6c7   : > { %v3276_v46 = vpack.c.bf16 %v8692_v63, %v8690_v54  ;;  %v8700_v60 = vadd.f32 %v3230_v52, %v3222_v33 }
 0x6c8   : > { %v8713_v62 = vadd.f32 %v3225_v22, %v3217_v59 }
 0x6c9   : > { %6802 = vmatprep.subr.bf16.mxu0 %v3276_v46  ;;  %v3275_v21 = vpack.c.bf16 %v8700_v60, %v8698_v41  ;;  %v3340_v44 = vpop.permute.xlu0 %3339  ;;  %v3335_v37 = vpop.permute.xlu1 %3334 }
 0x6ca   : > { %6803 = vmatpush3.bf16.msra.mxu0 %v3276_v46  ;;  %v3273_v31 = vpack.c.bf16 %v8711_v24, %v8713_v62 }
 0x6cb   : > { %6804 = vmatprep.subr.bf16.mxu0 %v3275_v21 }
 0x6cd   : > { %v3330_v5 = vpop.permute.xlu0 %3329  ;;  %v3325_v11 = vpop.permute.xlu1 %3324 }
 0x6ce   : > { %6805 = vmatpush3.bf16.msra.mxu0 %v3275_v21 }
 0x6cf   : > { %6806 = vmatprep.subr.bf16.mxu0 %v3274_v29 }
 0x6d1   : > { %v3320_v9 = vpop.permute.xlu0 %3319  ;;  %v3315_v6 = vpop.permute.xlu1 %3314 }
 0x6d2   : > { %6807 = vmatpush3.bf16.msra.mxu0 %v3274_v29 }
 0x6d3   : > { %6808 = vmatprep.subr.bf16.mxu0 %v3273_v31 }
 0x6d5   : > { %v3310_v47 = vpop.permute.xlu0 %3309  ;;  %v3305_v13 = vpop.permute.xlu1 %3304 }
 0x6d6   : > { %6809 = vmatpush3.bf16.msra.mxu0 %v3273_v31 }
 0x6d9   : > { %6811 = vmatmul.mubr.msk.bf16.vlgmr.msra.gmra.mxu0 %vm1800_vm0, %v7155_v16  ;;  %v3300_v45 = vpop.permute.xlu0 %3299  ;;  %v3295_v26 = vpop.permute.xlu1 %3294 }
 0x6da   : > { %6814 = vmatprep.mubr.msk.bf16.mxu0 %vm1800_vm0, %v7156_v43 }
 0x6dd   : > { %v3290_v56 = vpop.permute.xlu0 %3289  ;;  %v3285_v15 = vpop.permute.xlu1 %3284 }
 0x6e1   : > { %6815 = vmatmul.mubr.msk.bf16.gmra.mxu0 %vm1800_vm0, %v7157_v50  ;;  %v3280_v51 = vpop.permute.xlu0 %3279 }
 0x6e2   : > { %6818 = vmatprep.mubr.msk.bf16.mxu0 %vm1800_vm0, %v7158_v3 }
 0x6e9   : > { %6819 = vmatmul.mubr.msk.bf16.gmra.mxu0 %vm1800_vm0, %v7159_v49 }
 0x6ea   : > { %6822 = vmatprep.mubr.msk.bf16.mxu0 %vm1800_vm0, %v7160_v17 }
 0x6f1   : > { %6823 = vmatmul.mubr.msk.bf16.gmra.mxu0 %vm1800_vm0, %v7161_v53 }
 0x799   : > { %v6812_v19 = vpop.f32.mrf.mxu0 }
 0x79a   : > { %v8742_v34 = vadd.f32 %v6812_v19, %v3290_v56 }
 0x79b   : > { %v3455_v7 = vpop.f32.mrf.mxu0 }
 0x79c   : > { %v8759_v20 = vmul.f32 %v8742_v34, %v8742_v34  ;;  %v8763_v14 = vadd.f32 %v3455_v7, %v3280_v51 }
 0x79d   : > { %v6813_v38 = vpop.f32.mrf.mxu0 }
 0x79e   : > { %v8738_v32 = vadd.f32 %v6813_v38, %v3295_v26 }
 0x79f   : > { %v3458_v2 = vpop.f32.mrf.mxu0 }
 0x7a0   : > { %v3521_v18 = vmul.f32 %v8738_v32, %v8738_v32  ;;  %v8765_v21 = vadd.f32 %v3458_v2, %v3285_v15 }
 0x7a1   : > { %v6816_v55 = vpop.f32.mrf.mxu0 }
 0x7a2   : > { %v8750_v8 = vadd.f32 %v6816_v55, %v3310_v47  ;;  %v8771_v29 = vmul.f32 %v3521_v18, %v8738_v32 }
 0x7a3   : > { %v3471_v48 = vpop.f32.mrf.mxu0 }
 0x7a4   : > { %v3524_v3 = vmul.f32 %v8750_v8, %v8750_v8  ;;  %v8783_v42 = vadd.f32 %v3471_v48, %v3300_v45 }
 0x7a5   : > { %v6817_v23 = vpop.f32.mrf.mxu0 }
 0x7a6   : > { %v8752_v4 = vadd.f32 %v6817_v23, %v3315_v6  ;;  %v3540_v23 = vmul.f32 %v3524_v3, %v8750_v8 }
 0x7a7   : > { %v3474_v57 = vpop.f32.mrf.mxu0 }
 0x7a8   : > { %v8773_v31 = vadd.f32 %v3474_v57, %v3305_v13  ;;  %v3525_v49 = vmul.f32 %v8752_v4, %v8752_v4  ;;  %v3522_v57 = vmul.f32 %v8783_v42, %v8783_v42 }
 0x7a9   : > { %v6820_v12 = vpop.f32.mrf.mxu0 }
 0x7aa   : > { %v8736_v10 = vadd.f32 %v6820_v12, %v3330_v5  ;;  %v3523_v6 = vmul.f32 %v8773_v31, %v8773_v31  ;;  %v3541_v48 = vmul.f32 %v3525_v49, %v8752_v4 }
 0x7ab   : > { %v3487_v27 = vpop.f32.mrf.mxu0 }
 0x7ac   : > { %v3528_v36 = vmul.f32 %v8736_v10, %v8736_v10  ;;  %v8744_v33 = vadd.f32 %v3487_v27, %v3320_v9  ;;  %v3519_v9 = vmul.f32 %v8765_v21, %v8765_v21  ;;  %v3539_v18 = vmul.f32 %v3523_v6, %v8773_v31 }
 0x7ad   : > { %v6821_v25 = vpop.f32.mrf.mxu0  ;;  %v3536_v6 = vmul.f32 %v8759_v20, %v8742_v34 }
 0x7ae   : > { %v8746_v52 = vadd.f32 %v6821_v25, %v3335_v37  ;;  %v3544_v28 = vmul.f32 %v3528_v36, %v8736_v10  ;;  %v3526_v59 = vmul.f32 %v8744_v33, %v8744_v33 }
 0x7af   : > { %v3490_v35 = vpop.f32.mrf.mxu0 }
 0x7b0   : > { %v3529_v46 = vmul.f32 %v8746_v52, %v8746_v52  ;;  %v8761_v1 = vadd.f32 %v3490_v35, %v3325_v11  ;;  %v3560_v17 = vmul.f32 0.044715, %v3544_v28  ;;  %v3542_v19 = vmul.f32 %v3526_v59, %v8744_v33 }
 0x7b1   : > { %v6824_v40 = vpop.f32.mrf.mxu0  ;;  %v3557_v28 = vmul.f32 0.044715, %v3541_v48  ;;  %v3556_v59 = vmul.f32 0.044715, %v3540_v23 }
 0x7b2   : > { %v3545_v22 = vmul.f32 %v3529_v46, %v8746_v52  ;;  %v3527_v16 = vmul.f32 %v8761_v1, %v8761_v1  ;;  %v8777_v43 = vadd.f32 %v6824_v40, %v3350_v0  ;;  %v3576_v13 = vadd.f32 %v3560_v17, %v8736_v10 }
 0x7b3   : > { %v3503_v50 = vpop.f32.mrf.mxu0  ;;  %v3558_v56 = vmul.f32 0.044715, %v3542_v19 }
 0x7b4   : > { %v3561_v53 = vmul.f32 0.044715, %v3545_v22  ;;  %v3543_v37 = vmul.f32 %v3527_v16, %v8761_v1  ;;  %v3532_v5 = vmul.f32 %v8777_v43, %v8777_v43  ;;  %v8788_v11 = vadd.f32 %v3503_v50, %v3340_v44 }
 0x7b5   : > { %v6825_v0 = vpop.f32.mrf.mxu0  ;;  %v3592_v46 = vmul.f32 0.7978846, %v3576_v13  ;;  %v3538_v22 = vmul.f32 %v3522_v57, %v8783_v42  ;;  %v3574_v3 = vadd.f32 %v3558_v56, %v8744_v33  ;;  %v3535_v13 = vmul.f32 %v3519_v9, %v8765_v21 }
 0x7b6   : > { %v3577_v7 = vadd.f32 %v3561_v53, %v8746_v52  ;;  %v8795_v38 = vadd.f32 %v6825_v0, %v8732_v39  ;;  %v3559_v47 = vmul.f32 0.044715, %v3543_v37  ;;  %v3548_v2 = vmul.f32 %v3532_v5, %v8777_v43 }
 0x7b7   : > { %v3530_v44 = vmul.f32 %v8788_v11, %v8788_v11  ;;  %v3506_v55 = vpop.f32.mrf.mxu0  ;;  %v3555_v53 = vmul.f32 0.044715, %v3539_v18  ;;  %v3573_v0 = vadd.f32 %v3557_v28, %v8752_v4 }
 0x7b8   : > { %v3533_v45 = vmul.f32 %v8795_v38, %v8795_v38  ;;  %v8807_v39 = vadd.f32 %v3506_v55, %v8734_v61  ;;  %v3564_v12 = vmul.f32 0.044715, %v3548_v2  ;;  %v3593_v27 = vmul.f32 0.7978846, %v3577_v7 }
 0x7b9   : > { %v3546_v26 = vmul.f32 %v3530_v44, %v8788_v11  ;;  %v3575_v61 = vadd.f32 %v3559_v47, %v8761_v1  ;;  %v3518_v47 = vmul.f32 %v8763_v14, %v8763_v14  ;;  %v3572_v2 = vadd.f32 %v3556_v59, %v8750_v8 }
 0x7ba   : > { %v3549_v36 = vmul.f32 %v3533_v45, %v8795_v38  ;;  %v3531_v25 = vmul.f32 %v8807_v39, %v8807_v39  ;;  %v3580_v35 = vadd.f32 %v3564_v12, %v8777_v43  ;;  %7288 = vtanh.f32 %v3593_v27 }
 0x7bb   : > { %v3562_v15 = vmul.f32 0.044715, %v3546_v26  ;;  %v3591_v37 = vmul.f32 0.7978846, %v3575_v61  ;;  %v3554_v44 = vmul.f32 0.044715, %v3538_v22  ;;  %v3571_v57 = vadd.f32 %v3555_v53, %v8773_v31 }
 0x7bc   : > { %v3565_v51 = vmul.f32 0.044715, %v3549_v36  ;;  %v3547_v40 = vmul.f32 %v3531_v25, %v8807_v39  ;;  %v3596_v16 = vmul.f32 0.7978846, %v3580_v35  ;;  %v3590_v55 = vmul.f32 0.7978846, %v3574_v3 }
 0x7bd   : > { %v3578_v50 = vadd.f32 %v3562_v15, %v8788_v11  ;;  %v3553_v45 = vmul.f32 0.044715, %v8771_v29  ;;  %v3589_v23 = vmul.f32 0.7978846, %v3573_v0  ;;  %v3534_v20 = vmul.f32 %v3518_v47, %v8763_v14 }
 0x7be   : > { %v3581_v49 = vadd.f32 %v3565_v51, %v8795_v38  ;;  %v3563_v17 = vmul.f32 0.044715, %v3547_v40  ;;  %7290 = vtanh.f32 %v3596_v16  ;;  %v3552_v12 = vmul.f32 0.044715, %v3536_v6 }
 0x7bf   : > { %v3594_v5 = vmul.f32 0.7978846, %v3578_v50  ;;  %7292 = vtanh.f32 %v3592_v46  ;;  %v3588_v26 = vmul.f32 0.7978846, %v3572_v2  ;;  %v3570_v56 = vadd.f32 %v3554_v44, %v8783_v42 }
 0x7c0   : > { %v3597_v19 = vmul.f32 0.7978846, %v3581_v49  ;;  %v3579_v7 = vadd.f32 %v3563_v17, %v8807_v39  ;;  %v3551_v27 = vmul.f32 0.044715, %v3535_v13  ;;  %v3569_v36 = vadd.f32 %v3553_v45, %v8738_v32 }
 0x7c1   : > { %7294 = vtanh.f32 %v3594_v5  ;;  %v3587_v25 = vmul.f32 0.7978846, %v3571_v57  ;;  %v3550_v9 = vmul.f32 0.044715, %v3534_v20  ;;  %v3568_v18 = vadd.f32 %v3552_v12, %v8742_v34 }
 0x7c2   : > { %7296 = vtanh.f32 %v3597_v19  ;;  %v3595_v48 = vmul.f32 0.7978846, %v3579_v7  ;;  %v3586_v29 = vmul.f32 0.7978846, %v3570_v56  ;;  %v3567_v35 = vadd.f32 %v3551_v27, %v8765_v21 }
 0x7c3   : > { %7298 = vtanh.f32 %v3591_v37  ;;  %v3585_v28 = vmul.f32 0.7978846, %v3569_v36  ;;  %v3566_v51 = vadd.f32 %v3550_v9, %v8763_v14  ;;  %v3584_v22 = vmul.f32 0.7978846, %v3568_v18 }
 0x7c4   : > { %7300 = vtanh.f32 %v3595_v48  ;;  %v3583_v50 = vmul.f32 0.7978846, %v3567_v35 }
 0x7c5   : > { %7302 = vtanh.f32 %v3590_v55  ;;  %v3582_v0 = vmul.f32 0.7978846, %v3566_v51 }
 0x7c6   : > { %7304 = vtanh.f32 %v3589_v23 }
 0x7c7   : > { %7306 = vtanh.f32 %v3588_v26  ;;  %v7289_v61 = vpop.eup %7288 }
 0x7c8   : > { %7308 = vtanh.f32 %v3587_v25  ;;  %v3625_v49 = vadd.f32 1.0, %v7289_v61 }
 0x7c9   : > { %7310 = vtanh.f32 %v3586_v29 }
 0x7ca   : > { %7312 = vtanh.f32 %v3585_v28  ;;  %v3641_v44 = vmul.f32 0.5, %v3625_v49 }
 0x7cb   : > { %v7291_v15 = vpop.eup %7290  ;;  %7314 = vtanh.f32 %v3584_v22 }
 0x7cc   : > { %v7293_v46 = vpop.eup %7292  ;;  %v3628_v40 = vadd.f32 1.0, %v7291_v15  ;;  %7316 = vtanh.f32 %v3583_v50  ;;  %v3657_v25 = vmul.f32 %v3641_v44, %v8746_v52 }
 0x7cd   : > { %v3624_v19 = vadd.f32 1.0, %v7293_v46  ;;  %7318 = vtanh.f32 %v3582_v0 }
 0x7ce   : > { %v7295_v59 = vpop.eup %7294  ;;  %v3644_v37 = vmul.f32 0.5, %v3628_v40 }
 0x7cf   : > { %v7297_v16 = vpop.eup %7296  ;;  %v3626_v3 = vadd.f32 1.0, %v7295_v59  ;;  %v3640_v57 = vmul.f32 0.5, %v3624_v19 }
 0x7d0   : > { %v7299_v17 = vpop.eup %7298  ;;  %v3629_v53 = vadd.f32 1.0, %v7297_v16  ;;  %v3660_v55 = vmul.f32 %v3644_v37, %v8777_v43 }
 0x7d1   : > { %v7301_v5 = vpop.eup %7300  ;;  %v3642_v47 = vmul.f32 0.5, %v3626_v3  ;;  %v3623_v45 = vadd.f32 1.0, %v7299_v17 }
 0x7d2   : > { %v3645_v7 = vmul.f32 0.5, %v3629_v53  ;;  %v3627_v6 = vadd.f32 1.0, %v7301_v5  ;;  %v7303_v2 = vpop.eup %7302 }
 0x7d3   : > { %v7305_v23 = vpop.eup %7304  ;;  %v3658_v12 = vmul.f32 %v3642_v47, %v8788_v11  ;;  %v3622_v56 = vadd.f32 1.0, %v7303_v2  ;;  %v3639_v9 = vmul.f32 0.5, %v3623_v45  ;;  %v7165_v45 = vld [vmem:[%s9696_s5 + $0x18] sm:$0xff]  }
 0x7d4   : > { %v3661_v48 = vmul.f32 %v3645_v7, %v8795_v38  ;;  %v3643_v13 = vmul.f32 0.5, %v3627_v6  ;;  %v7307_v27 = vpop.eup %7306  ;;  %v3621_v43 = vadd.f32 1.0, %v7305_v23  ;;  %v3656_v38 = vmul.f32 %v3640_v57, %v8736_v10  ;;  %v3724_v23 = vpop.permute.xlu1 %3723 }
 0x7d5   : > { %v7309_v18 = vpop.eup %7308  ;;  %v3638_v29 = vmul.f32 0.5, %v3622_v56  ;;  %v3620_v61 = vadd.f32 1.0, %v7307_v27  ;;  %v3655_v11 = vmul.f32 %v3639_v9, %v8761_v1 }
 0x7d6   : > { %v3685_v20 = vpack.c.bf16 %v3661_v48, %v3660_v55  ;;  %v3659_v26 = vmul.f32 %v3643_v13, %v8807_v39  ;;  %v7311_v35 = vpop.eup %7310  ;;  %v3683_v15 = vpack.c.bf16 %v3657_v25, %v3656_v38  ;;  %v3637_v39 = vmul.f32 0.5, %v3621_v43  ;;  %v7164_v13 = vld [vmem:[%s9696_s5 + $0x10] sm:$0xff]  }
 0x7d7   : > { %v3619_v28 = vadd.f32 1.0, %v7309_v18  ;;  %v7313_v46 = vpop.eup %7312  ;;  %v3654_v52 = vmul.f32 %v3638_v29, %v8744_v33  ;;  %v3636_v51 = vmul.f32 0.5, %v3620_v61  ;;  %v3618_v40 = vadd.f32 1.0, %v7311_v35 }
 0x7d8   : > { %6826 = vmatprep.subr.bf16.mxu1 %v3685_v20  ;;  %v3684_v36 = vpack.c.bf16 %v3659_v26, %v3658_v12  ;;  %v7315_v59 = vpop.eup %7314  ;;  %v3653_v10 = vmul.f32 %v3637_v39, %v8752_v4  ;;  %v3617_v3 = vadd.f32 1.0, %v7313_v46  ;;  %v3714_v26 = vpop.permute.xlu1 %3713 }
 0x7d9   : > { %6827 = vmatpush3.bf16.msra.mxu1 %v3685_v20  ;;  %v7317_v22 = vpop.eup %7316  ;;  %v3682_v16 = vpack.c.bf16 %v3655_v11, %v3654_v52  ;;  %v3635_v50 = vmul.f32 0.5, %v3619_v28  ;;  %v3652_v1 = vmul.f32 %v3636_v51, %v8750_v8  ;;  %v3634_v17 = vmul.f32 0.5, %v3618_v40 }
 0x7da   : > { %6828 = vmatprep.subr.bf16.mxu1 %v3684_v36  ;;  %v7319_v49 = vpop.eup %7318  ;;  %v3616_v53 = vadd.f32 1.0, %v7315_v59  ;;  %v3633_v33 = vmul.f32 0.5, %v3617_v3  ;;  %v3615_v0 = vadd.f32 1.0, %v7317_v22  ;;  %v7169_v3 = vld [vmem:[%s9697_s13 + $0x18] sm:$0xff]  }
 0x7db   : > { %v3681_v37 = vpack.c.bf16 %v3653_v10, %v3652_v1  ;;  %v3651_v5 = vmul.f32 %v3635_v50, %v8773_v31  ;;  %v3650_v19 = vmul.f32 %v3634_v17, %v8783_v42  ;;  %v3614_v4 = vadd.f32 1.0, %v7319_v49  ;;  %v7167_v50 = vld [vmem:[%s9697_s13 + $0x8] sm:$0xff]   ;;  %v7170_v49 = vld [vmem:[%s9697_s13 + $0x20] sm:$0xff]   ;;  %v7172_v1 = vld [vmem:[%s9697_s13 + $0x30] sm:$0xff]  }
 0x7dc   : > { %v3632_v7 = vmul.f32 0.5, %v3616_v53  ;;  %v3649_v47 = vmul.f32 %v3633_v33, %v8738_v32  ;;  %v3631_v2 = vmul.f32 0.5, %v3615_v0  ;;  %v7163_v32 = vld [vmem:[%s9696_s5 + $0x8] sm:$0xff]   ;;  %v3704_v9 = vpop.permute.xlu1 %3703  ;;  %v7173_v17 = vld [vmem:[%s9697_s13 + $0x38] sm:$0xff]   ;;  %v7174_v53 = vld [vmem:[%s9698_s12] sm:$0xff]   ;;  %s9707_s5 = sld [smem:[#allocation38_spill]] }
 0x7dd   : > { %6829 = vmatpush3.bf16.msra.mxu1 %v3684_v36  ;;  %v3680_v6 = vpack.c.bf16 %v3651_v5, %v3650_v19  ;;  %v3630_v31 = vmul.f32 0.5, %v3614_v4 }
 0x7de   : > { %6830 = vmatprep.subr.bf16.mxu1 %v3683_v15  ;;  %v3648_v8 = vmul.f32 %v3632_v7, %v8742_v34  ;;  %v3647_v55 = vmul.f32 %v3631_v2, %v8765_v21  ;;  %v7166_v34 = vld [vmem:[%s9697_s13] sm:$0xff]   ;;  %v3719_v21 = vpop.permute.xlu0 %3718 }
 0x7df   : > { %v3646_v42 = vmul.f32 %v3630_v31, %v8763_v14  ;;  %6858 = vmatprep.mubr.msk.bf16.mxu0 %vm1800_vm0, %v7166_v34 }
 0x7e0   : > { %v3679_v44 = vpack.c.bf16 %v3649_v47, %v3648_v8  ;;  %v3694_v40 = vpop.permute.xlu1 %3693 }
 0x7e1   : > { %6831 = vmatpush3.bf16.msra.mxu1 %v3683_v15  ;;  %v3678_v48 = vpack.c.bf16 %v3647_v55, %v3646_v42 }
 0x7e2   : > { %6832 = vmatprep.subr.bf16.mxu1 %v3682_v16  ;;  %v3709_v56 = vpop.permute.xlu0 %3708 }
 0x7e4   : > { %v8909_v5 = vpop.permute.xlu1 %3936 }
 0x7e5   : > { %6833 = vmatpush3.bf16.msra.mxu1 %v3682_v16 }
 0x7e6   : > { %6834 = vmatprep.subr.bf16.mxu1 %v3681_v37  ;;  %v3699_v29 = vpop.permute.xlu0 %3698 }
 0x7e8   : > { %v8911_v0 = vpop.permute.xlu1 %3926 }
 0x7e9   : > { %6835 = vmatpush3.bf16.msra.mxu1 %v3681_v37  ;;  %v7178_v37 = vld [vmem:[%s9699_s2] sm:$0xff]   ;;  %s9702_s2 = sld [smem:[#allocation30_spill]] }
 0x7ea   : > { %6836 = vmatprep.subr.bf16.mxu1 %v3680_v6  ;;  %v3689_v22 = vpop.permute.xlu0 %3688 }
 0x7ec   : > { %v3917_v7 = vpop.permute.xlu1 %3916 }
 0x7ed   : > { %6837 = vmatpush3.bf16.msra.mxu1 %v3680_v6 }
 0x7ee   : > { %6838 = vmatprep.subr.bf16.mxu1 %v3679_v44  ;;  %v3932_v33 = vpop.permute.xlu0 %3931 }
 0x7f0   : > { %v3907_v6 = vpop.permute.xlu1 %3906 }
 0x7f1   : > { %6839 = vmatpush3.bf16.msra.mxu1 %v3679_v44 }
 0x7f2   : > { %6840 = vmatprep.subr.bf16.mxu1 %v3678_v48  ;;  %v3922_v19 = vpop.permute.xlu0 %3921 }
 0x7f4   : > { %v3897_v44 = vpop.permute.xlu1 %3896 }
 0x7f5   : > { %6841 = vmatpush3.bf16.msra.mxu1 %v3678_v48 }
 0x7f6   : > { %v3912_v4 = vpop.permute.xlu0 %3911 }
 0x7f8   : > { %6843 = vmatmul.mubr.bf16.vlgmr.msra.gmra.mxu1 %v7163_v32 }
 0x7f9   : > { %6846 = vmatprep.mubr.bf16.mxu1 %v7164_v13  ;;  %v3887_v13 = vpop.permute.xlu1 %3886 }
 0x7fa   : > { %v3902_v47 = vpop.permute.xlu0 %3901 }
 0x7fe   : > { %v3892_v55 = vpop.permute.xlu0 %3891 }
 0x800   : > { %6847 = vmatmul.mubr.bf16.gmra.mxu1 %v7165_v45 }
 0x801   : > { %6890 = vmatprep.mubr.bf16.mxu1 %v7174_v53 }
 0x802   : > { %v3882_v45 = vpop.permute.xlu0 %3881 }
 0x8b8   : > { %v6844_v57 = vpop.f32.mrf.mxu1 }
 0x8b9   : > { %v3793_v28 = vadd.f32 %v6844_v57, %v3699_v29 }
 0x8ba   : > { %v3784_v20 = vpop.f32.mrf.mxu1 }
 0x8bc   : > { %v6845_v12 = vpop.f32.mrf.mxu1 }
 0x8bd   : > { %v3796_v35 = vadd.f32 %v6845_v12, %v3704_v9  ;;  %v3872_v12 = vpop.permute.xlu0 %3871 }
 0x8be   : > { %v3787_v14 = vpop.f32.mrf.mxu1 }
 0x8bf   : > { %v8876_v59 = vadd.f32 %v3796_v35, %v8705_v30 }
 0x8c0   : > { %v6848_v27 = vpop.f32.mrf.mxu1 }
 0x8c1   : > { %v3809_v25 = vadd.f32 %v6848_v27, %v3719_v21  ;;  %v3877_v21 = vpop.permute.xlu1 %3876 }
 0x8c2   : > { %v3800_v36 = vpop.f32.mrf.mxu1 }
 0x8c3   : > { %v3801_v18 = vadd.f32 %v3800_v36, %v3709_v56  ;;  %v8862_v15 = vadd.f32 %v3809_v25, %v8690_v54  ;;  %v3788_v54 = vadd.f32 %v3787_v14, %v3694_v40 }
 0x8c4   : > { %v6849_v43 = vpop.f32.mrf.mxu1 }
 0x8c5   : > { %v3812_v38 = vadd.f32 %v6849_v43, %v3724_v23  ;;  %v8868_v46 = vadd.f32 %v3801_v18, %v8698_v41  ;;  %v8881_v41 = vadd.f32 %v3793_v28, %v8707_v58  ;;  %v8884_v16 = vadd.f32 %v3788_v54, %v8711_v24  ;;  %v7168_v24 = vld [vmem:[%s9697_s13 + $0x10] sm:$0xff]   ;;  %v3862_v28 = vpop.permute.xlu0 %3861 }
 0x8c6   : > { %v3803_v61 = vpop.f32.mrf.mxu1 }
 0x8c7   : > { %v8865_v11 = vadd.f32 %v3812_v38, %v8692_v63  ;;  %v3804_v39 = vadd.f32 %v3803_v61, %v3714_v26  ;;  %v3856_v30 = vpack.c.bf16 %v8876_v59, %v8881_v41  ;;  %v3867_v38 = vpop.permute.xlu1 %3866 }
 0x8c9   : > { %v8871_v52 = vadd.f32 %v3804_v39, %v8700_v60  ;;  %v3858_v51 = vpack.c.bf16 %v8865_v11, %v8862_v15  ;;  %v3785_v60 = vadd.f32 %v3784_v20, %v3689_v22 }
 0x8cb   : > { %6850 = vmatprep.subr.bf16.mxu0 %v3858_v51  ;;  %v3857_v63 = vpack.c.bf16 %v8871_v52, %v8868_v46  ;;  %v8889_v10 = vadd.f32 %v3785_v60, %v8713_v62  ;;  %v7171_v62 = vld [vmem:[%s9697_s13 + $0x28] sm:$0xff]  }
 0x8cc   : > { %6851 = vmatpush3.bf16.msra.mxu0 %v3858_v51 }
 0x8cd   : > { %6852 = vmatprep.subr.bf16.mxu0 %v3857_v63  ;;  %v3855_v58 = vpack.c.bf16 %v8884_v16, %v8889_v10 }
 0x8d0   : > { %6853 = vmatpush3.bf16.msra.mxu0 %v3857_v63 }
 0x8d1   : > { %6854 = vmatprep.subr.bf16.mxu0 %v3856_v30 }
 0x8d4   : > { %6855 = vmatpush3.bf16.msra.mxu0 %v3856_v30 }
 0x8d5   : > { %6856 = vmatprep.subr.bf16.mxu0 %v3855_v58 }
 0x8d8   : > { %6857 = vmatpush3.bf16.msra.mxu0 %v3855_v58 }
 0x8d9   : > { %6898 = vmatprep.subr.bf16.mxu0 %v7178_v37 }
 0x8db   : > { %6859 = vmatmul.mubr.msk.bf16.vlgmr.msra.gmra.mxu0 %vm1800_vm0, %v7167_v50 }
 0x8dc   : > { %6862 = vmatprep.mubr.msk.bf16.mxu0 %vm1800_vm0, %v7168_v24  ;;  %6899 = vmatpush3.bf16.msra.mxu0 %v7178_v37 }
 0x8e3   : > { %6863 = vmatmul.mubr.msk.bf16.gmra.mxu0 %vm1800_vm0, %v7169_v3 }
 0x8e4   : > { %6866 = vmatprep.mubr.msk.bf16.mxu0 %vm1800_vm0, %v7170_v49 }
 0x8eb   : > { %6867 = vmatmul.mubr.msk.bf16.gmra.mxu0 %vm1800_vm0, %v7171_v62 }
 0x8ec   : > { %6870 = vmatprep.mubr.msk.bf16.mxu0 %vm1800_vm0, %v7172_v1 }
 0x8f3   : > { %6871 = vmatmul.mubr.msk.bf16.gmra.mxu0 %vm1800_vm0, %v7173_v17 }
 0x99b   : > { %v6860_v2 = vpop.f32.mrf.mxu0 }
 0x99c   : > { %v8919_v27 = vadd.f32 %v6860_v2, %v3872_v12 }
 0x99d   : > { %v4037_v8 = vpop.f32.mrf.mxu0 }
 0x99e   : > { %v8936_v51 = vmul.f32 %v8919_v27, %v8919_v27  ;;  %v8940_v63 = vadd.f32 %v4037_v8, %v3862_v28 }
 0x99f   : > { %v6861_v31 = vpop.f32.mrf.mxu0 }
 0x9a0   : > { %v8915_v26 = vadd.f32 %v6861_v31, %v3877_v21 }
 0x9a1   : > { %v4040_v42 = vpop.f32.mrf.mxu0 }
 0x9a2   : > { %v4103_v43 = vmul.f32 %v8915_v26, %v8915_v26  ;;  %v8942_v22 = vadd.f32 %v4040_v42, %v3867_v38 }
 0x9a3   : > { %v6864_v48 = vpop.f32.mrf.mxu0 }
 0x9a4   : > { %v8927_v29 = vadd.f32 %v6864_v48, %v3892_v55  ;;  %v8948_v58 = vmul.f32 %v4103_v43, %v8915_v26 }
 0x9a5   : > { %v4053_v32 = vpop.f32.mrf.mxu0 }
 0x9a6   : > { %v4106_v62 = vmul.f32 %v8927_v29, %v8927_v29  ;;  %v8960_v37 = vadd.f32 %v4053_v32, %v3882_v45 }
 0x9a7   : > { %v6865_v34 = vpop.f32.mrf.mxu0 }
 0x9a8   : > { %v8929_v61 = vadd.f32 %v6865_v34, %v3897_v44  ;;  %v4122_v34 = vmul.f32 %v4106_v62, %v8927_v29 }
 0x9a9   : > { %v4056_v23 = vpop.f32.mrf.mxu0 }
 0x9aa   : > { %v8950_v50 = vadd.f32 %v4056_v23, %v3887_v13  ;;  %v4107_v1 = vmul.f32 %v8929_v61, %v8929_v61  ;;  %v4104_v23 = vmul.f32 %v8960_v37, %v8960_v37 }
 0x9ab   : > { %v6868_v57 = vpop.f32.mrf.mxu0 }
 0x9ac   : > { %v8913_v20 = vadd.f32 %v6868_v57, %v3912_v4  ;;  %v4105_v44 = vmul.f32 %v8950_v50, %v8950_v50  ;;  %v4123_v32 = vmul.f32 %v4107_v1, %v8929_v61 }
 0x9ad   : > { %v4069_v14 = vpop.f32.mrf.mxu0 }
 0x9ae   : > { %v4110_v56 = vmul.f32 %v8913_v20, %v8913_v20  ;;  %v8921_v25 = vadd.f32 %v4069_v14, %v3902_v47  ;;  %v4101_v47 = vmul.f32 %v8942_v22, %v8942_v22  ;;  %v4121_v43 = vmul.f32 %v4105_v44, %v8950_v50 }
 0x9af   : > { %v6869_v36 = vpop.f32.mrf.mxu0  ;;  %v4118_v44 = vmul.f32 %v8936_v51, %v8919_v27 }
 0x9b0   : > { %v8923_v9 = vadd.f32 %v6869_v36, %v3917_v7  ;;  %v4126_v35 = vmul.f32 %v4110_v56, %v8913_v20  ;;  %v4108_v60 = vmul.f32 %v8921_v25, %v8921_v25 }
 0x9b1   : > { %v4072_v18 = vpop.f32.mrf.mxu0 }
 0x9b2   : > { %v4111_v39 = vmul.f32 %v8923_v9, %v8923_v9  ;;  %v8938_v40 = vadd.f32 %v4072_v18, %v3907_v6  ;;  %v4142_v17 = vmul.f32 0.044715, %v4126_v35  ;;  %v4124_v2 = vmul.f32 %v4108_v60, %v8921_v25 }
 0x9b3   : > { %v6872_v54 = vpop.f32.mrf.mxu0  ;;  %v4139_v35 = vmul.f32 0.044715, %v4123_v32  ;;  %v4138_v60 = vmul.f32 0.044715, %v4122_v34 }
 0x9b4   : > { %v4127_v30 = vmul.f32 %v4111_v39, %v8923_v9  ;;  %v4109_v24 = vmul.f32 %v8938_v40, %v8938_v40  ;;  %v8954_v3 = vadd.f32 %v6872_v54, %v3932_v33  ;;  %v4158_v13 = vadd.f32 %v4142_v17, %v8913_v20 }
 0x9b5   : > { %v4085_v49 = vpop.f32.mrf.mxu0  ;;  %v4140_v12 = vmul.f32 0.044715, %v4124_v2 }
 0x9b6   : > { %v4143_v53 = vmul.f32 0.044715, %v4127_v30  ;;  %v4125_v7 = vmul.f32 %v4109_v24, %v8938_v40  ;;  %v4114_v4 = vmul.f32 %v8954_v3, %v8954_v3  ;;  %v8965_v6 = vadd.f32 %v4085_v49, %v3922_v19 }
 0x9b7   : > { %v6873_v33 = vpop.f32.mrf.mxu0  ;;  %v4174_v39 = vmul.f32 0.7978846, %v4158_v13  ;;  %v4120_v30 = vmul.f32 %v4104_v23, %v8960_v37  ;;  %v4156_v62 = vadd.f32 %v4140_v12, %v8921_v25  ;;  %v4117_v13 = vmul.f32 %v4101_v47, %v8942_v22 }
 0x9b8   : > { %v4159_v8 = vadd.f32 %v4143_v53, %v8923_v9  ;;  %v8972_v31 = vadd.f32 %v6873_v33, %v8909_v5  ;;  %v4141_v55 = vmul.f32 0.044715, %v4125_v7  ;;  %v4130_v42 = vmul.f32 %v4114_v4, %v8954_v3 }
 0x9b9   : > { %v4112_v19 = vmul.f32 %v8965_v6, %v8965_v6  ;;  %v4088_v48 = vpop.f32.mrf.mxu0  ;;  %v4137_v53 = vmul.f32 0.044715, %v4121_v43  ;;  %v4155_v33 = vadd.f32 %v4139_v35, %v8929_v61 }
 0x9ba   : > { %v4115_v45 = vmul.f32 %v8972_v31, %v8972_v31  ;;  %v8984_v5 = vadd.f32 %v4088_v48, %v8911_v0  ;;  %v4146_v57 = vmul.f32 0.044715, %v4130_v42  ;;  %v4175_v14 = vmul.f32 0.7978846, %v4159_v8 }
 0x9bb   : > { %v4128_v21 = vmul.f32 %v4112_v19, %v8965_v6  ;;  %v4157_v0 = vadd.f32 %v4141_v55, %v8938_v40  ;;  %v4100_v55 = vmul.f32 %v8940_v63, %v8940_v63  ;;  %v4154_v42 = vadd.f32 %v4138_v60, %v8927_v29 }
 0x9bc   : > { %v4131_v56 = vmul.f32 %v4115_v45, %v8972_v31  ;;  %v4113_v36 = vmul.f32 %v8984_v5, %v8984_v5  ;;  %v4162_v18 = vadd.f32 %v4146_v57, %v8954_v3  ;;  %7320 = vtanh.f32 %v4175_v14 }
 0x9bd   : > { %v4144_v38 = vmul.f32 0.044715, %v4128_v21  ;;  %v4173_v7 = vmul.f32 0.7978846, %v4157_v0  ;;  %v4136_v19 = vmul.f32 0.044715, %v4120_v30  ;;  %v4153_v23 = vadd.f32 %v4137_v53, %v8950_v50 }
 0x9be   : > { %v4147_v28 = vmul.f32 0.044715, %v4131_v56  ;;  %v4129_v54 = vmul.f32 %v4113_v36, %v8984_v5  ;;  %v4178_v24 = vmul.f32 0.7978846, %v4162_v18  ;;  %v4172_v48 = vmul.f32 0.7978846, %v4156_v62 }
 0x9bf   : > { %v4160_v49 = vadd.f32 %v4144_v38, %v8965_v6  ;;  %v4135_v45 = vmul.f32 0.044715, %v8948_v58  ;;  %v4171_v34 = vmul.f32 0.7978846, %v4155_v33  ;;  %v4116_v51 = vmul.f32 %v4100_v55, %v8940_v63 }
 0x9c0   : > { %v4163_v1 = vadd.f32 %v4147_v28, %v8972_v31  ;;  %v4145_v17 = vmul.f32 0.044715, %v4129_v54  ;;  %7322 = vtanh.f32 %v4178_v24  ;;  %v4134_v57 = vmul.f32 0.044715, %v4118_v44 }
 0x9c1   : > { %v4176_v4 = vmul.f32 0.7978846, %v4160_v49  ;;  %7324 = vtanh.f32 %v4174_v39  ;;  %v4170_v21 = vmul.f32 0.7978846, %v4154_v42  ;;  %v4152_v12 = vadd.f32 %v4136_v19, %v8960_v37 }
 0x9c2   : > { %v4179_v2 = vmul.f32 0.7978846, %v4163_v1  ;;  %v4161_v8 = vadd.f32 %v4145_v17, %v8984_v5  ;;  %v4133_v14 = vmul.f32 0.044715, %v4117_v13  ;;  %v4151_v56 = vadd.f32 %v4135_v45, %v8915_v26 }
 0x9c3   : > { %7326 = vtanh.f32 %v4176_v4  ;;  %v4169_v36 = vmul.f32 0.7978846, %v4153_v23  ;;  %v4132_v47 = vmul.f32 0.044715, %v4116_v51  ;;  %v4150_v43 = vadd.f32 %v4134_v57, %v8919_v27 }
 0x9c4   : > { %7328 = vtanh.f32 %v4179_v2  ;;  %v4177_v32 = vmul.f32 0.7978846, %v4161_v8  ;;  %v4168_v58 = vmul.f32 0.7978846, %v4152_v12  ;;  %v4149_v18 = vadd.f32 %v4133_v14, %v8942_v22 }
 0x9c5   : > { %7330 = vtanh.f32 %v4173_v7  ;;  %v4167_v35 = vmul.f32 0.7978846, %v4151_v56  ;;  %v4148_v28 = vadd.f32 %v4132_v47, %v8940_v63  ;;  %v4166_v30 = vmul.f32 0.7978846, %v4150_v43 }
 0x9c6   : > { %7332 = vtanh.f32 %v4177_v32  ;;  %v4165_v49 = vmul.f32 0.7978846, %v4149_v18 }
 0x9c7   : > { %7334 = vtanh.f32 %v4172_v48  ;;  %v4164_v33 = vmul.f32 0.7978846, %v4148_v28 }
 0x9c8   : > { %7336 = vtanh.f32 %v4171_v34 }
 0x9c9   : > { %7338 = vtanh.f32 %v4170_v21  ;;  %v7321_v0 = vpop.eup %7320 }
 0x9ca   : > { %7340 = vtanh.f32 %v4169_v36  ;;  %v4207_v1 = vadd.f32 1.0, %v7321_v0 }
 0x9cb   : > { %7342 = vtanh.f32 %v4168_v58 }
 0x9cc   : > { %7344 = vtanh.f32 %v4167_v35  ;;  %v4223_v19 = vmul.f32 0.5, %v4207_v1 }
 0x9cd   : > { %v7323_v38 = vpop.eup %7322  ;;  %7346 = vtanh.f32 %v4166_v30 }
 0x9ce   : > { %v7325_v39 = vpop.eup %7324  ;;  %v4210_v54 = vadd.f32 1.0, %v7323_v38  ;;  %7348 = vtanh.f32 %v4165_v49  ;;  %v4239_v36 = vmul.f32 %v4223_v19, %v8923_v9 }
 0x9cf   : > { %v4206_v2 = vadd.f32 1.0, %v7325_v39  ;;  %7350 = vtanh.f32 %v4164_v33 }
 0x9d0   : > { %v7327_v60 = vpop.eup %7326  ;;  %v4226_v7 = vmul.f32 0.5, %v4210_v54 }
 0x9d1   : > { %v7329_v24 = vpop.eup %7328  ;;  %v4208_v62 = vadd.f32 1.0, %v7327_v60  ;;  %v4222_v23 = vmul.f32 0.5, %v4206_v2 }
 0x9d2   : > { %v7331_v17 = vpop.eup %7330  ;;  %v4211_v53 = vadd.f32 1.0, %v7329_v24  ;;  %v4242_v48 = vmul.f32 %v4226_v7, %v8954_v3 }
 0x9d3   : > { %v7333_v4 = vpop.eup %7332  ;;  %v4224_v55 = vmul.f32 0.5, %v4208_v62  ;;  %v4205_v45 = vadd.f32 1.0, %v7331_v17 }
 0x9d4   : > { %v4227_v8 = vmul.f32 0.5, %v4211_v53  ;;  %v4209_v44 = vadd.f32 1.0, %v7333_v4  ;;  %v7335_v42 = vpop.eup %7334 }
 0x9d5   : > { %v7337_v34 = vpop.eup %7336  ;;  %v4240_v57 = vmul.f32 %v4224_v55, %v8965_v6  ;;  %v4204_v12 = vadd.f32 1.0, %v7335_v42  ;;  %v4221_v47 = vmul.f32 0.5, %v4205_v45  ;;  %v7177_v45 = vld [vmem:[%s9698_s12 + $0x18] sm:$0xff]  }
 0x9d6   : > { %v4243_v32 = vmul.f32 %v4227_v8, %v8972_v31  ;;  %v4225_v13 = vmul.f32 0.5, %v4209_v44  ;;  %v7339_v14 = vpop.eup %7338  ;;  %v4203_v3 = vadd.f32 1.0, %v7337_v34  ;;  %v4238_v31 = vmul.f32 %v4222_v23, %v8913_v20  ;;  %v4276_v34 = vpop.permute.xlu1 %4275 }
 0x9d7   : > { %v7341_v43 = vpop.eup %7340  ;;  %v4220_v58 = vmul.f32 0.5, %v4204_v12  ;;  %v4202_v0 = vadd.f32 1.0, %v7339_v14  ;;  %v4237_v6 = vmul.f32 %v4221_v47, %v8938_v40 }
 0x9d8   : > { %v4267_v51 = vpack.c.bf16 %v4243_v32, %v4242_v48  ;;  %v4241_v21 = vmul.f32 %v4225_v13, %v8984_v5  ;;  %v7343_v18 = vpop.eup %7342  ;;  %v4265_v38 = vpack.c.bf16 %v4239_v36, %v4238_v31  ;;  %v4219_v5 = vmul.f32 0.5, %v4203_v3  ;;  %v7175_v13 = vld [vmem:[%s9698_s12 + $0x8] sm:$0xff]  }
 0x9d9   : > { %v4201_v35 = vadd.f32 1.0, %v7341_v43  ;;  %v7345_v39 = vpop.eup %7344  ;;  %v4236_v9 = vmul.f32 %v4220_v58, %v8921_v25  ;;  %v4218_v28 = vmul.f32 0.5, %v4202_v0  ;;  %v4200_v54 = vadd.f32 1.0, %v7343_v18 }
 0x9da   : > { %6874 = vmatprep.subr.bf16.mxu1 %v4267_v51  ;;  %v4266_v56 = vpack.c.bf16 %v4241_v21, %v4240_v57  ;;  %v7347_v60 = vpop.eup %7346  ;;  %v4235_v20 = vmul.f32 %v4219_v5, %v8929_v61  ;;  %v4199_v62 = vadd.f32 1.0, %v7345_v39  ;;  %v4286_v23 = vpop.permute.xlu1 %4285 }
 0x9db   : > { %6875 = vmatpush3.bf16.msra.mxu1 %v4267_v51  ;;  %v7349_v30 = vpop.eup %7348  ;;  %v4264_v24 = vpack.c.bf16 %v4237_v6, %v4236_v9  ;;  %v4217_v49 = vmul.f32 0.5, %v4201_v35  ;;  %v4234_v40 = vmul.f32 %v4218_v28, %v8927_v29  ;;  %v4216_v17 = vmul.f32 0.5, %v4200_v54 }
 0x9dc   : > { %6876 = vmatprep.subr.bf16.mxu1 %v4266_v56  ;;  %v7351_v1 = vpop.eup %7350  ;;  %v4198_v53 = vadd.f32 1.0, %v7347_v60  ;;  %v4215_v25 = vmul.f32 0.5, %v4199_v62  ;;  %v4197_v33 = vadd.f32 1.0, %v7349_v30 }
 0x9dd   : > { %v4263_v7 = vpack.c.bf16 %v4235_v20, %v4234_v40  ;;  %v4233_v4 = vmul.f32 %v4217_v49, %v8950_v50  ;;  %v4232_v2 = vmul.f32 %v4216_v17, %v8960_v37  ;;  %v4196_v61 = vadd.f32 1.0, %v7351_v1 }
 0x9de   : > { %v4214_v8 = vmul.f32 0.5, %v4198_v53  ;;  %v4231_v55 = vmul.f32 %v4215_v25, %v8915_v26  ;;  %v4213_v42 = vmul.f32 0.5, %v4197_v33  ;;  %v7176_v26 = vld [vmem:[%s9698_s12 + $0x10] sm:$0xff]  }
 0x9df   : > { %6877 = vmatpush3.bf16.msra.mxu1 %v4266_v56  ;;  %v4262_v44 = vpack.c.bf16 %v4233_v4, %v4232_v2  ;;  %v4212_v50 = vmul.f32 0.5, %v4196_v61 }
 0x9e0   : > { %6878 = vmatprep.subr.bf16.mxu1 %v4265_v38  ;;  %v4230_v29 = vmul.f32 %v4214_v8, %v8919_v27  ;;  %v4229_v48 = vmul.f32 %v4213_v42, %v8942_v22  ;;  %v4271_v27 = vpop.permute.xlu0 %4270 }
 0x9e1   : > { %v4228_v37 = vmul.f32 %v4212_v50, %v8940_v63  ;;  %v4296_v63 = vpop.permute.xlu1 %4295 }
 0x9e2   : > { %v4261_v19 = vpack.c.bf16 %v4231_v55, %v4230_v29 }
 0x9e3   : > { %6879 = vmatpush3.bf16.msra.mxu1 %v4265_v38  ;;  %v4260_v32 = vpack.c.bf16 %v4229_v48, %v4228_v37 }
 0x9e4   : > { %6880 = vmatprep.subr.bf16.mxu1 %v4264_v24  ;;  %v4281_v57 = vpop.permute.xlu0 %4280 }
 0x9e5   : > { %v4306_v5 = vpop.permute.xlu1 %4305 }
 0x9e7   : > { %6881 = vmatpush3.bf16.msra.mxu1 %v4264_v24 }
 0x9e8   : > { %6882 = vmatprep.subr.bf16.mxu1 %v4263_v7  ;;  %v4291_v47 = vpop.permute.xlu0 %4290 }
 0x9eb   : > { %6883 = vmatpush3.bf16.msra.mxu1 %v4263_v7 }
 0x9ec   : > { %6884 = vmatprep.subr.bf16.mxu1 %v4262_v44  ;;  %v4301_v39 = vpop.permute.xlu0 %4300 }
 0x9ef   : > { %6885 = vmatpush3.bf16.msra.mxu1 %v4262_v44 }
 0x9f0   : > { %6886 = vmatprep.subr.bf16.mxu1 %v4261_v19 }
 0x9f3   : > { %6887 = vmatpush3.bf16.msra.mxu1 %v4261_v19 }
 0x9f4   : > { %6888 = vmatprep.subr.bf16.mxu1 %v4260_v32 }
 0x9f7   : > { %6889 = vmatpush3.bf16.msra.mxu1 %v4260_v32 }
 0x9fa   : > { %6891 = vmatmul.mubr.bf16.vlgmr.msra.gmra.mxu1 %v7175_v13 }
 0x9fb   : > { %6894 = vmatprep.mubr.bf16.mxu1 %v7176_v26 }
 0xa02   : > { %6895 = vmatmul.mubr.bf16.gmra.mxu1 %v7177_v45 }
 0xaba   : > { %v6892_v51 = vpop.f32.mrf.mxu1 }
 0xabb   : > { %v4375_v56 = vadd.f32 %v6892_v51, %v4281_v57 }
 0xabc   : > { %v4366_v22 = vpop.f32.mrf.mxu1 }
 0xabd   : > { %v4367_v12 = vadd.f32 %v4366_v22, %v4271_v27  ;;  %v9046_v18 = vadd.f32 %v4375_v56, %v8881_v41 }
 0xabe   : > { %v6893_v21 = vpop.f32.mrf.mxu1 }
 0xabf   : > { %v4378_v14 = vadd.f32 %v6893_v21, %v4286_v23  ;;  %v9040_v58 = vadd.f32 %v4367_v12, %v8889_v10 }
 0xac0   : > { %v4369_v36 = vpop.f32.mrf.mxu1 }
 0xac1   : > { %v4370_v3 = vadd.f32 %v4369_v36, %v4276_v34  ;;  %v9037_v43 = vadd.f32 %v4378_v14, %v8876_v59 }
 0xac2   : > { %v6896_v31 = vpop.f32.mrf.mxu1 }
 0xac3   : > { %v9043_v0 = vadd.f32 %v4370_v3, %v8884_v16  ;;  %v4409_v35 = vpack.c.bf16 %v9037_v43, %v9046_v18  ;;  %v4391_v16 = vadd.f32 %v6896_v31, %v4301_v39 }
 0xac4   : > { %v4382_v38 = vpop.f32.mrf.mxu1 }
 0xac5   : > { %v4408_v6 = vpack.c.bf16 %v9043_v0, %v9040_v58  ;;  %v4383_v9 = vadd.f32 %v4382_v38, %v4291_v47  ;;  %v9064_v24 = vadd.f32 %v4391_v16, %v8862_v15 }
 0xac6   : > { %v6897_v59 = vpop.f32.mrf.mxu1 }
 0xac7   : > { %v4394_v10 = vadd.f32 %v6897_v59, %v4306_v5  ;;  %6900 = vmatprep.mubr.msk.bf16.mxu0 %vm2828_vm1, %v4408_v6  ;;  %v9058_v60 = vadd.f32 %v4383_v9, %v8868_v46  ;;  %v7180_v46 = vld [vmem:[%s9700_s9] sm:$0xff]  }
 0xac8   : > { %v4385_v28 = vpop.f32.mrf.mxu1  ;;  %6901 = vmatmul.mubr.msk.bf16.vlgmr.msra.gmra.mxu0 %vm2828_vm1, %v4409_v35 }
 0xac9   : > { %v4386_v41 = vadd.f32 %v4385_v28, %v4296_v63  ;;  %v9055_v54 = vadd.f32 %v4394_v10, %v8865_v11  ;;  %v7179_v11 = vld [vmem:[%s9700_s9 + $0x8] sm:$0xff]  }
 0xaca   : > { %6908 = vmatprep.subr.bf16.mxu1 %v7179_v11 }
 0xacb   : > { %v9061_v30 = vadd.f32 %v4386_v41, %v8871_v52  ;;  %v4411_v49 = vpack.c.bf16 %v9055_v54, %v9064_v24  ;;  %6909 = vmatpush3.bf16.msra.mxu1 %v7179_v11  ;;  %v6430_v52 = vld [vmem:[%s9701_s8] ss:$0 sm:$0xff]  ;;  %s9703_s8 = sld [smem:[#allocation29_spill]] }
 0xacc   : > { %6910 = vmatprep.subr.bf16.mxu1 %v7180_v46 }
 0xacd   : > { %v4410_v20 = vpack.c.bf16 %v9061_v30, %v9058_v60 }
 0xacf   : > { %6904 = vmatprep.mubr.msk.bf16.mxu0 %vm2828_vm1, %v4410_v20  ;;  %6911 = vmatpush3.bf16.msra.mxu1 %v7180_v46 }
 0xad0   : > { %6905 = vmatmul.mubr.msk.bf16.gmra.mxu0 %vm2828_vm1, %v4411_v49 }
 0xb88   : > { %v6902_v62 = vpop.f32.mrf.mxu0 }
 0xb89   : > { %v9075_v15 = vadd.f32 %v6902_v62, %v6430_v52 }
 0xb8a   : > { %v4470_v1 = vpop.f32.mrf.mxu0 }
 0xb8b   : > { %v4503_v40 = vmul.f32 %v9075_v15, %v9075_v15  ;;  %v9079_v17 = vadd.f32 %v6430_v52, %v4470_v1 }
 0xb8c   : > { %v6903_v53 = vpop.f32.mrf.mxu0 }
 0xb8d   : > { %v4511_v7 = vmul.f32 %v4503_v40, %v9075_v15  ;;  %v4501_v4 = vmul.f32 %v9079_v17, %v9079_v17  ;;  %v9084_v25 = vadd.f32 %v6903_v53, %v6430_v52 }
 0xb8e   : > { %v4473_v33 = vpop.f32.mrf.mxu0 }
 0xb8f   : > { %v4519_v2 = vmul.f32 0.044715, %v4511_v7  ;;  %v4509_v8 = vmul.f32 %v4501_v4, %v9079_v17  ;;  %v4504_v61 = vmul.f32 %v9084_v25, %v9084_v25  ;;  %v9089_v44 = vadd.f32 %v6430_v52, %v4473_v33 }
 0xb90   : > { %v6906_v55 = vpop.f32.mrf.mxu0 }
 0xb91   : > { %v4527_v42 = vadd.f32 %v4519_v2, %v9075_v15  ;;  %v4517_v29 = vmul.f32 0.044715, %v4509_v8  ;;  %v4512_v50 = vmul.f32 %v4504_v61, %v9084_v25  ;;  %v4502_v19 = vmul.f32 %v9089_v44, %v9089_v44 }
 0xb92   : > { %v9095_v48 = vadd.f32 %v6906_v55, %v6430_v52  ;;  %v4486_v37 = vpop.f32.mrf.mxu0 }
 0xb93   : > { %v4535_v32 = vmul.f32 0.7978846, %v4527_v42  ;;  %v4525_v13 = vadd.f32 %v4517_v29, %v9079_v17  ;;  %v4520_v26 = vmul.f32 0.044715, %v4512_v50  ;;  %v4510_v45 = vmul.f32 %v4502_v19, %v9089_v44 }
 0xb94   : > { %v4507_v34 = vmul.f32 %v9095_v48, %v9095_v48  ;;  %v9101_v27 = vadd.f32 %v6430_v52, %v4486_v37  ;;  %v6907_v23 = vpop.f32.mrf.mxu0 }
 0xb95   : > { %v4533_v51 = vmul.f32 0.7978846, %v4525_v13  ;;  %v4528_v57 = vadd.f32 %v4520_v26, %v9084_v25  ;;  %v4518_v22 = vmul.f32 0.044715, %v4510_v45  ;;  %7352 = vtanh.f32 %v4535_v32 }
 0xb96   : > { %v4515_v21 = vmul.f32 %v4507_v34, %v9095_v48  ;;  %v4505_v12 = vmul.f32 %v9101_v27, %v9101_v27  ;;  %v4498_v14 = vadd.f32 %v6907_v23, %v6430_v52  ;;  %v4489_v63 = vpop.f32.mrf.mxu0 }
 0xb97   : > { %7354 = vtanh.f32 %v4533_v51  ;;  %v4536_v56 = vmul.f32 0.7978846, %v4528_v57  ;;  %v4526_v36 = vadd.f32 %v4518_v22, %v9089_v44  ;;  %v4490_v47 = vadd.f32 %v6430_v52, %v4489_v63 }
 0xb98   : > { %v4523_v3 = vmul.f32 0.044715, %v4515_v21  ;;  %v4513_v31 = vmul.f32 %v4505_v12, %v9101_v27  ;;  %v4508_v38 = vmul.f32 %v4498_v14, %v4498_v14 }
 0xb99   : > { %7356 = vtanh.f32 %v4536_v56  ;;  %v4534_v6 = vmul.f32 0.7978846, %v4526_v36  ;;  %v4506_v5 = vmul.f32 %v4490_v47, %v4490_v47 }
 0xb9a   : > { %v4531_v35 = vadd.f32 %v4523_v3, %v9095_v48  ;;  %v4521_v59 = vmul.f32 0.044715, %v4513_v31  ;;  %v4516_v39 = vmul.f32 %v4508_v38, %v4498_v14  ;;  %v7181_v38 = vld [vmem:[%s9702_s2] sm:$0xff]  }
 0xb9b   : > { %7358 = vtanh.f32 %v4534_v6  ;;  %v4514_v9 = vmul.f32 %v4506_v5, %v4490_v47  ;;  %6928 = vmatprep.mubr.msk.bf16.mxu0 %vm1800_vm0, %v7181_v38 }
 0xb9c   : > { %v4539_v10 = vmul.f32 0.7978846, %v4531_v35  ;;  %v4529_v16 = vadd.f32 %v4521_v59, %v9101_v27  ;;  %v4524_v28 = vmul.f32 0.044715, %v4516_v39 }
 0xb9d   : > { %v4522_v41 = vmul.f32 0.044715, %v4514_v9 }
 0xb9e   : > { %7360 = vtanh.f32 %v4539_v10  ;;  %v4537_v20 = vmul.f32 0.7978846, %v4529_v16  ;;  %v4532_v49 = vadd.f32 %v4524_v28, %v4498_v14 }
 0xb9f   : > { %v4530_v11 = vadd.f32 %v4522_v41, %v4490_v47 }
 0xba0   : > { %7362 = vtanh.f32 %v4537_v20  ;;  %v4540_v46 = vmul.f32 0.7978846, %v4532_v49 }
 0xba1   : > { %v4538_v52 = vmul.f32 0.7978846, %v4530_v11 }
 0xba2   : > { %7364 = vtanh.f32 %v4540_v46  ;;  %v7353_v62 = vpop.eup %7352 }
 0xba3   : > { %7366 = vtanh.f32 %v4538_v52  ;;  %v4551_v7 = vadd.f32 1.0, %v7353_v62 }
 0xba4   : > { %v7355_v1 = vpop.eup %7354 }
 0xba5   : > { %v4549_v40 = vadd.f32 1.0, %v7355_v1  ;;  %v4559_v55 = vmul.f32 0.5, %v4551_v7 }
 0xba6   : > { %v7357_v53 = vpop.eup %7356 }
 0xba7   : > { %v4552_v4 = vadd.f32 1.0, %v7357_v53  ;;  %v4557_v2 = vmul.f32 0.5, %v4549_v40  ;;  %v4567_v13 = vmul.f32 %v4559_v55, %v9075_v15  ;;  %v9147_v55 = vpop.permute.xlu1 %4798 }
 0xba8   : > { %v7359_v33 = vpop.eup %7358 }
 0xba9   : > { %v4560_v8 = vmul.f32 0.5, %v4552_v4  ;;  %v4550_v61 = vadd.f32 1.0, %v7359_v33  ;;  %v4565_v37 = vmul.f32 %v4557_v2, %v9079_v17  ;;  %v7182_v4 = vld [vmem:[%s9702_s2 + $0x8] sm:$0xff]   ;;  %v7185_v33 = vld [vmem:[%s9702_s2 + $0x20] sm:$0xff]   ;;  %v7187_v2 = vld [vmem:[%s9702_s2 + $0x30] sm:$0xff]  }
 0xbab   : > { %v7361_v42 = vpop.eup %7360  ;;  %v4558_v29 = vmul.f32 0.5, %v4550_v61  ;;  %v4568_v50 = vmul.f32 %v4560_v8, %v9084_v25  ;;  %v7188_v8 = vld [vmem:[%s9702_s2 + $0x38] sm:$0xff]  }
 0xbac   : > { %v4555_v26 = vadd.f32 1.0, %v7361_v42  ;;  %v4794_v42 = vpop.permute.xlu0 %4793 }
 0xbad   : > { %v7363_v19 = vpop.eup %7362  ;;  %v4566_v32 = vmul.f32 %v4558_v29, %v9089_v44  ;;  %v4579_v57 = vpack.c.bf16 %v4568_v50, %v4567_v13  ;;  %v9149_v29 = vpop.permute.xlu1 %4788 }
 0xbae   : > { %v4553_v45 = vadd.f32 1.0, %v7363_v19  ;;  %v4563_v25 = vmul.f32 0.5, %v4555_v26 }
 0xbaf   : > { %v7365_v34 = vpop.eup %7364  ;;  %v4578_v23 = vpack.c.bf16 %v4566_v32, %v4565_v37 }
 0xbb0   : > { %v7367_v51 = vpop.eup %7366  ;;  %v4556_v22 = vadd.f32 1.0, %v7365_v34  ;;  %v4561_v21 = vmul.f32 0.5, %v4553_v45  ;;  %v4571_v36 = vmul.f32 %v4563_v25, %v9095_v48  ;;  %v4784_v50 = vpop.permute.xlu0 %4783 }
 0xbb1   : > { %v4554_v12 = vadd.f32 1.0, %v7367_v51  ;;  %6912 = vmatprep.mubr.msk.bf16.mxu1 %vm3005_vm2, %v4578_v23  ;;  %v4779_v19 = vpop.permute.xlu1 %4778 }
 0xbb2   : > { %v4564_v63 = vmul.f32 0.5, %v4556_v22  ;;  %6913 = vmatmul.mubr.msk.bf16.vlgmr.msra.gmra.mxu1 %vm3005_vm2, %v4579_v57  ;;  %v4569_v15 = vmul.f32 %v4561_v21, %v9101_v27 }
 0xbb3   : > { %v4562_v17 = vmul.f32 0.5, %v4554_v12 }
 0xbb4   : > { %v4572_v44 = vmul.f32 %v4564_v63, %v4498_v14  ;;  %v6436_v14 = vld [vmem:[%s9703_s8] ss:$0 sm:$0xff]  ;;  %s9704_s8 = sld [smem:[#allocation32_spill]]  ;;  %v4774_v37 = vpop.permute.xlu0 %4773 }
 0xbb5   : > { %v4570_v56 = vmul.f32 %v4562_v17, %v4490_v47  ;;  %v4769_v32 = vpop.permute.xlu1 %4768 }
 0xbb6   : > { %v4581_v31 = vpack.c.bf16 %v4572_v44, %v4571_v36 }
 0xbb7   : > { %v4580_v3 = vpack.c.bf16 %v4570_v56, %v4569_v15 }
 0xbb8   : > { %v4764_v13 = vpop.permute.xlu0 %4763 }
 0xbb9   : > { %6916 = vmatprep.mubr.msk.bf16.mxu1 %vm3005_vm2, %v4580_v3  ;;  %v4759_v23 = vpop.permute.xlu1 %4758 }
 0xbba   : > { %6917 = vmatmul.mubr.msk.bf16.gmra.mxu1 %vm3005_vm2, %v4581_v31  ;;  %v7189_v61 = vld [vmem:[%s9704_s8] sm:$0xff]  }
 0xbbb   : > { %6960 = vmatprep.mubr.bf16.mxu1 %v7189_v61 }
 0xbbc   : > { %v4754_v51 = vpop.permute.xlu0 %4753 }
 0xbbd   : > { %v4749_v12 = vpop.permute.xlu1 %4748 }
 0xbc0   : > { %v4744_v25 = vpop.permute.xlu0 %4743 }
 0xbc1   : > { %v4739_v15 = vpop.permute.xlu1 %4738 }
 0xbc4   : > { %v4734_v36 = vpop.permute.xlu0 %4733 }
 0xc72   : > { %v6914_v6 = vpop.f32.mrf.mxu1 }
 0xc73   : > { %v4655_v11 = vadd.f32 %v6914_v6, %v6436_v14 }
 0xc74   : > { %v4646_v5 = vpop.f32.mrf.mxu1 }
 0xc75   : > { %v4679_v7 = vadd.f32 %v4655_v11, %v9046_v18  ;;  %v7183_v18 = vld [vmem:[%s9702_s2 + $0x10] sm:$0xff]  }
 0xc76   : > { %v6915_v35 = vpop.f32.mrf.mxu1 }
 0xc77   : > { %v4658_v28 = vadd.f32 %v6915_v35, %v6436_v14 }
 0xc78   : > { %v4649_v59 = vpop.f32.mrf.mxu1 }
 0xc79   : > { %v4680_v1 = vadd.f32 %v4658_v28, %v9037_v43  ;;  %v4650_v40 = vadd.f32 %v6436_v14, %v4649_v59 }
 0xc7a   : > { %v6918_v39 = vpop.f32.mrf.mxu1 }
 0xc7b   : > { %v4671_v27 = vadd.f32 %v6918_v39, %v6436_v14 }
 0xc7c   : > { %v4662_v9 = vpop.f32.mrf.mxu1 }
 0xc7d   : > { %v4663_v10 = vadd.f32 %v6436_v14, %v4662_v9  ;;  %v4683_v41 = vadd.f32 %v4671_v27, %v9064_v24  ;;  %v4647_v24 = vadd.f32 %v6436_v14, %v4646_v5  ;;  %v4729_v9 = vpop.permute.xlu1 %4728 }
 0xc7e   : > { %v6919_v47 = vpop.f32.mrf.mxu1 }
 0xc7f   : > { %v4674_v48 = vadd.f32 %v6919_v47, %v6436_v14  ;;  %v4681_v46 = vadd.f32 %v4663_v10, %v9058_v60  ;;  %v4718_v60 = vpack.c.bf16 %v4680_v1, %v4679_v7  ;;  %v4677_v43 = vadd.f32 %v4647_v24, %v9040_v58  ;;  %v7186_v58 = vld [vmem:[%s9702_s2 + $0x28] sm:$0xff]  }
 0xc80   : > { %v4665_v16 = vpop.f32.mrf.mxu1 }
 0xc81   : > { %v4684_v20 = vadd.f32 %v4674_v48, %v9055_v54  ;;  %v4666_v49 = vadd.f32 %v6436_v14, %v4665_v16  ;;  %v4678_v54 = vadd.f32 %v4650_v40, %v9043_v0  ;;  %v7184_v0 = vld [vmem:[%s9702_s2 + $0x18] sm:$0xff]   ;;  %v4724_v16 = vpop.permute.xlu0 %4723  ;;  %s9705_s2 = sld [smem:[#allocation34_spill]] }
 0xc83   : > { %v4682_v52 = vadd.f32 %v4666_v49, %v9061_v30  ;;  %v4720_v62 = vpack.c.bf16 %v4684_v20, %v4683_v41  ;;  %v4717_v30 = vpack.c.bf16 %v4678_v54, %v4677_v43 }
 0xc85   : > { %6920 = vmatprep.subr.bf16.mxu0 %v4720_v62  ;;  %v4719_v53 = vpack.c.bf16 %v4682_v52, %v4681_v46 }
 0xc86   : > { %6921 = vmatpush3.bf16.msra.mxu0 %v4720_v62 }
 0xc87   : > { %6922 = vmatprep.subr.bf16.mxu0 %v4719_v53 }
 0xc8a   : > { %6923 = vmatpush3.bf16.msra.mxu0 %v4719_v53 }
 0xc8b   : > { %6924 = vmatprep.subr.bf16.mxu0 %v4718_v60 }
 0xc8e   : > { %6925 = vmatpush3.bf16.msra.mxu0 %v4718_v60 }
 0xc8f   : > { %6926 = vmatprep.subr.bf16.mxu0 %v4717_v30 }
 0xc92   : > { %6927 = vmatpush3.bf16.msra.mxu0 %v4717_v30 }
 0xc95   : > { %6929 = vmatmul.mubr.msk.bf16.vlgmr.msra.gmra.mxu0 %vm1800_vm0, %v7182_v4 }
 0xc96   : > { %6932 = vmatprep.mubr.msk.bf16.mxu0 %vm1800_vm0, %v7183_v18 }
 0xc9d   : > { %6933 = vmatmul.mubr.msk.bf16.gmra.mxu0 %vm1800_vm0, %v7184_v0 }
 0xc9e   : > { %6936 = vmatprep.mubr.msk.bf16.mxu0 %vm1800_vm0, %v7185_v33 }
 0xca5   : > { %6937 = vmatmul.mubr.msk.bf16.gmra.mxu0 %vm1800_vm0, %v7186_v58 }
 0xca6   : > { %6940 = vmatprep.mubr.msk.bf16.mxu0 %vm1800_vm0, %v7187_v2 }
 0xcad   : > { %6941 = vmatmul.mubr.msk.bf16.gmra.mxu0 %vm1800_vm0, %v7188_v8 }
 0xd55   : > { %v6930_v26 = vpop.f32.mrf.mxu0 }
 0xd56   : > { %v9157_v6 = vadd.f32 %v6930_v26, %v4734_v36 }
 0xd57   : > { %v4899_v45 = vpop.f32.mrf.mxu0 }
 0xd58   : > { %v9174_v28 = vmul.f32 %v9157_v6, %v9157_v6  ;;  %v9178_v49 = vadd.f32 %v4899_v45, %v4724_v16 }
 0xd59   : > { %v6931_v34 = vpop.f32.mrf.mxu0 }
 0xd5a   : > { %v9153_v3 = vadd.f32 %v6931_v34, %v4739_v15 }
 0xd5b   : > { %v4902_v57 = vpop.f32.mrf.mxu0 }
 0xd5c   : > { %v4965_v39 = vmul.f32 %v9153_v3, %v9153_v3  ;;  %v9180_v11 = vadd.f32 %v4902_v57, %v4729_v9 }
 0xd5d   : > { %v6934_v22 = vpop.f32.mrf.mxu0 }
 0xd5e   : > { %v9165_v27 = vadd.f32 %v6934_v22, %v4754_v51  ;;  %v9186_v62 = vmul.f32 %v4965_v39, %v9153_v3  ;;  %v4963_v58 = vmul.f32 %v9180_v11, %v9180_v11 }
 0xd5f   : > { %v4915_v21 = vpop.f32.mrf.mxu0 }
 0xd60   : > { %v4968_v24 = vmul.f32 %v9165_v27, %v9165_v27  ;;  %v9198_v30 = vadd.f32 %v4915_v21, %v4744_v25 }
 0xd61   : > { %v6935_v63 = vpop.f32.mrf.mxu0 }
 0xd62   : > { %v9167_v47 = vadd.f32 %v6935_v63, %v4759_v23  ;;  %v4984_v34 = vmul.f32 %v4968_v24, %v9165_v27  ;;  %v4966_v23 = vmul.f32 %v9198_v30, %v9198_v30 }
 0xd63   : > { %v4918_v17 = vpop.f32.mrf.mxu0 }
 0xd64   : > { %v9188_v1 = vadd.f32 %v4918_v17, %v4749_v12  ;;  %v4969_v54 = vmul.f32 %v9167_v47, %v9167_v47  ;;  %v4982_v39 = vmul.f32 %v4966_v23, %v9198_v30 }
 0xd65   : > { %v6938_v44 = vpop.f32.mrf.mxu0 }
 0xd66   : > { %v9151_v56 = vadd.f32 %v6938_v44, %v4774_v37 }
 0xd67   : > { %v4931_v31 = vpop.f32.mrf.mxu0 }
 0xd68   : > { %v4972_v38 = vmul.f32 %v9151_v56, %v9151_v56  ;;  %v9159_v35 = vadd.f32 %v4931_v31, %v4764_v13  ;;  %v4985_v13 = vmul.f32 %v4969_v54, %v9167_v47  ;;  %v4980_v54 = vmul.f32 %v9174_v28, %v9157_v6 }
 0xd69   : > { %v6939_v5 = vpop.f32.mrf.mxu0 }
 0xd6a   : > { %v9161_v59 = vadd.f32 %v6939_v5, %v4779_v19  ;;  %v4988_v10 = vmul.f32 %v4972_v38, %v9151_v56  ;;  %v4970_v46 = vmul.f32 %v9159_v35, %v9159_v35  ;;  %v5001_v15 = vmul.f32 0.044715, %v4985_v13 }
 0xd6b   : > { %v4934_v14 = vpop.f32.mrf.mxu0  ;;  %v5000_v5 = vmul.f32 0.044715, %v4984_v34 }
 0xd6c   : > { %v4973_v48 = vmul.f32 %v9161_v59, %v9161_v59  ;;  %v9176_v41 = vadd.f32 %v4934_v14, %v4769_v32  ;;  %v5004_v60 = vmul.f32 0.044715, %v4988_v10  ;;  %v4986_v2 = vmul.f32 %v4970_v46, %v9159_v35 }
 0xd6d   : > { %v6942_v20 = vpop.f32.mrf.mxu0 }
 0xd6e   : > { %v4989_v52 = vmul.f32 %v4973_v48, %v9161_v59  ;;  %v4971_v40 = vmul.f32 %v9176_v41, %v9176_v41  ;;  %v9192_v53 = vadd.f32 %v6942_v20, %v4794_v42  ;;  %v4967_v42 = vmul.f32 %v9188_v1, %v9188_v1 }
 0xd6f   : > { %v4947_v7 = vpop.f32.mrf.mxu0  ;;  %v5020_v26 = vadd.f32 %v5004_v60, %v9151_v56  ;;  %v5002_v22 = vmul.f32 0.044715, %v4986_v2  ;;  %v4962_v60 = vmul.f32 %v9178_v49, %v9178_v49  ;;  %v4979_v2 = vmul.f32 %v4963_v58, %v9180_v11 }
 0xd70   : > { %v5005_v43 = vmul.f32 0.044715, %v4989_v52  ;;  %v4987_v4 = vmul.f32 %v4971_v40, %v9176_v41  ;;  %v4976_v18 = vmul.f32 %v9192_v53, %v9192_v53  ;;  %v9203_v0 = vadd.f32 %v4947_v7, %v4784_v50 }
 0xd71   : > { %v6943_v33 = vpop.f32.mrf.mxu0  ;;  %v4983_v63 = vmul.f32 %v4967_v42, %v9188_v1  ;;  %v5036_v36 = vmul.f32 0.7978846, %v5020_v26  ;;  %v5018_v10 = vadd.f32 %v5002_v22, %v9159_v35  ;;  %v5017_v40 = vadd.f32 %v5001_v15, %v9167_v47 }
 0xd72   : > { %v5021_v8 = vadd.f32 %v5005_v43, %v9161_v59  ;;  %v9210_v61 = vadd.f32 %v6943_v33, %v9147_v55  ;;  %v5003_v19 = vmul.f32 0.044715, %v4987_v4  ;;  %v4992_v37 = vmul.f32 %v4976_v18, %v9192_v53 }
 0xd73   : > { %v4974_v50 = vmul.f32 %v9203_v0, %v9203_v0  ;;  %v4950_v32 = vpop.f32.mrf.mxu0  ;;  %v4999_v20 = vmul.f32 0.044715, %v4983_v63  ;;  %v5016_v43 = vadd.f32 %v5000_v5, %v9165_v27  ;;  %v4998_v4 = vmul.f32 0.044715, %v4982_v39 }
 0xd74   : > { %v4977_v45 = vmul.f32 %v9210_v61, %v9210_v61  ;;  %v9222_v55 = vadd.f32 %v4950_v32, %v9149_v29  ;;  %v5008_v51 = vmul.f32 0.044715, %v4992_v37  ;;  %v5037_v21 = vmul.f32 0.7978846, %v5021_v8 }
 0xd75   : > { %v4990_v57 = vmul.f32 %v4974_v50, %v9203_v0  ;;  %v5019_v29 = vadd.f32 %v5003_v19, %v9176_v41  ;;  %v5034_v18 = vmul.f32 0.7978846, %v5018_v10  ;;  %v4997_v8 = vmul.f32 0.044715, %v9186_v62 }
 0xd76   : > { %v4993_v12 = vmul.f32 %v4977_v45, %v9210_v61  ;;  %v4975_v25 = vmul.f32 %v9222_v55, %v9222_v55  ;;  %v5024_v17 = vadd.f32 %v5008_v51, %v9192_v53  ;;  %7368 = vtanh.f32 %v5037_v21 }
 0xd77   : > { %v5006_v44 = vmul.f32 0.044715, %v4990_v57  ;;  %v5035_v46 = vmul.f32 0.7978846, %v5019_v29  ;;  %v5033_v42 = vmul.f32 0.7978846, %v5017_v40  ;;  %v5015_v19 = vadd.f32 %v4999_v20, %v9188_v1 }
 0xd78   : > { %v5009_v31 = vmul.f32 0.044715, %v4993_v12  ;;  %v4991_v38 = vmul.f32 %v4975_v25, %v9222_v55  ;;  %v5040_v14 = vmul.f32 0.7978846, %v5024_v17  ;;  %v4978_v28 = vmul.f32 %v4962_v60, %v9178_v49 }
 0xd79   : > { %v5022_v9 = vadd.f32 %v5006_v44, %v9203_v0  ;;  %v4996_v37 = vmul.f32 0.044715, %v4980_v54  ;;  %v5032_v50 = vmul.f32 0.7978846, %v5016_v43  ;;  %v5014_v32 = vadd.f32 %v4998_v4, %v9198_v30 }
 0xd7a   : > { %v5025_v48 = vadd.f32 %v5009_v31, %v9210_v61  ;;  %v5007_v16 = vmul.f32 0.044715, %v4991_v38  ;;  %7370 = vtanh.f32 %v5040_v14  ;;  %v4995_v13 = vmul.f32 0.044715, %v4979_v2 }
 0xd7b   : > { %v5038_v52 = vmul.f32 0.7978846, %v5022_v9  ;;  %7372 = vtanh.f32 %v5036_v36  ;;  %v5013_v26 = vadd.f32 %v4997_v8, %v9153_v3  ;;  %v5031_v45 = vmul.f32 0.7978846, %v5015_v19 }
 0xd7c   : > { %v5041_v7 = vmul.f32 0.7978846, %v5025_v48  ;;  %v5023_v24 = vadd.f32 %v5007_v16, %v9222_v55  ;;  %v4994_v58 = vmul.f32 0.044715, %v4978_v28  ;;  %v5012_v34 = vadd.f32 %v4996_v37, %v9157_v6 }
 0xd7d   : > { %7374 = vtanh.f32 %v5038_v52  ;;  %v5030_v62 = vmul.f32 0.7978846, %v5014_v32  ;;  %v5011_v51 = vadd.f32 %v4995_v13, %v9180_v11  ;;  %v5029_v22 = vmul.f32 0.7978846, %v5013_v26 }
 0xd7e   : > { %7376 = vtanh.f32 %v5041_v7  ;;  %v5039_v33 = vmul.f32 0.7978846, %v5023_v24  ;;  %v5010_v12 = vadd.f32 %v4994_v58, %v9178_v49  ;;  %v5028_v29 = vmul.f32 0.7978846, %v5012_v34 }
 0xd7f   : > { %7378 = vtanh.f32 %v5035_v46  ;;  %v5027_v44 = vmul.f32 0.7978846, %v5011_v51 }
 0xd80   : > { %7380 = vtanh.f32 %v5039_v33  ;;  %v5026_v14 = vmul.f32 0.7978846, %v5010_v12 }
 0xd81   : > { %7382 = vtanh.f32 %v5034_v18 }
 0xd82   : > { %7384 = vtanh.f32 %v5033_v42 }
 0xd83   : > { %7386 = vtanh.f32 %v5032_v50  ;;  %v7369_v23 = vpop.eup %7368 }
 0xd84   : > { %7388 = vtanh.f32 %v5031_v45  ;;  %v5069_v36 = vadd.f32 1.0, %v7369_v23 }
 0xd85   : > { %7390 = vtanh.f32 %v5030_v62 }
 0xd86   : > { %7392 = vtanh.f32 %v5029_v22  ;;  %v5085_v46 = vmul.f32 0.5, %v5069_v36 }
 0xd87   : > { %v7371_v57 = vpop.eup %7370  ;;  %7394 = vtanh.f32 %v5028_v29 }
 0xd88   : > { %v7373_v21 = vpop.eup %7372  ;;  %v5072_v25 = vadd.f32 1.0, %v7371_v57  ;;  %7396 = vtanh.f32 %v5027_v44  ;;  %v5101_v42 = vmul.f32 %v5085_v46, %v9161_v59 }
 0xd89   : > { %v5068_v9 = vadd.f32 1.0, %v7373_v21  ;;  %7398 = vtanh.f32 %v5026_v14 }
 0xd8a   : > { %v7375_v63 = vpop.eup %7374  ;;  %v5088_v5 = vmul.f32 0.5, %v5072_v25 }
 0xd8b   : > { %v7377_v17 = vpop.eup %7376  ;;  %v5070_v15 = vadd.f32 1.0, %v7375_v63  ;;  %v5084_v60 = vmul.f32 0.5, %v5068_v9  ;;  %v7191_v9 = vld [vmem:[%s9704_s8 + $0x10] sm:$0xff]  }
 0xd8c   : > { %v7379_v31 = vpop.eup %7378  ;;  %v5073_v38 = vadd.f32 1.0, %v7377_v17  ;;  %v5104_v52 = vmul.f32 %v5088_v5, %v9192_v53 }
 0xd8d   : > { %v7381_v39 = vpop.eup %7380  ;;  %v5086_v16 = vmul.f32 0.5, %v5070_v15  ;;  %v5067_v24 = vadd.f32 1.0, %v7379_v31 }
 0xd8e   : > { %v5089_v10 = vmul.f32 0.5, %v5073_v38  ;;  %v5071_v48 = vadd.f32 1.0, %v7381_v39  ;;  %v7383_v20 = vpop.eup %7382 }
 0xd8f   : > { %v7385_v54 = vpop.eup %7384  ;;  %v5102_v4 = vmul.f32 %v5086_v16, %v9203_v0  ;;  %v5066_v33 = vadd.f32 1.0, %v7383_v20  ;;  %v5083_v19 = vmul.f32 0.5, %v5067_v24  ;;  %v5168_v16 = vpop.permute.xlu1 %5167 }
 0xd90   : > { %v5105_v40 = vmul.f32 %v5089_v10, %v9210_v61  ;;  %v5087_v7 = vmul.f32 0.5, %v5071_v48  ;;  %v7387_v2 = vpop.eup %7386  ;;  %v5065_v53 = vadd.f32 1.0, %v7385_v54  ;;  %v5100_v61 = vmul.f32 %v5084_v60, %v9151_v56  ;;  %v7192_v10 = vld [vmem:[%s9704_s8 + $0x18] sm:$0xff]   ;;  %v5163_v20 = vpop.permute.xlu0 %5162 }
 0xd91   : > { %v7389_v28 = vpop.eup %7388  ;;  %v5082_v37 = vmul.f32 0.5, %v5066_v33  ;;  %v5064_v50 = vadd.f32 1.0, %v7387_v2  ;;  %v5099_v0 = vmul.f32 %v5083_v19, %v9176_v41 }
 0xd92   : > { %v5129_v43 = vpack.c.bf16 %v5105_v40, %v5104_v52  ;;  %v5103_v18 = vmul.f32 %v5087_v7, %v9222_v55  ;;  %v7391_v32 = vpop.eup %7390  ;;  %v5127_v13 = vpack.c.bf16 %v5101_v42, %v5100_v61  ;;  %v5081_v55 = vmul.f32 0.5, %v5065_v53 }
 0xd93   : > { %v5063_v26 = vadd.f32 1.0, %v7389_v28  ;;  %v7393_v45 = vpop.eup %7392  ;;  %v5098_v59 = vmul.f32 %v5082_v37, %v9159_v35  ;;  %v5080_v58 = vmul.f32 0.5, %v5064_v50  ;;  %v5062_v34 = vadd.f32 1.0, %v7391_v32 }
 0xd94   : > { %6944 = vmatprep.subr.bf16.mxu1 %v5129_v43  ;;  %v5128_v8 = vpack.c.bf16 %v5103_v18, %v5102_v4  ;;  %v7395_v62 = vpop.eup %7394  ;;  %v5097_v56 = vmul.f32 %v5081_v55, %v9167_v47  ;;  %v5061_v22 = vadd.f32 1.0, %v7393_v45  ;;  %v5153_v7 = vpop.permute.xlu0 %5152  ;;  %v7194_v55 = vld [vmem:[%s9705_s2 + $0x8] sm:$0xff]   ;;  %v7196_v45 = vld [vmem:[%s9705_s2 + $0x18] sm:$0xff]  }
 0xd95   : > { %6945 = vmatpush3.bf16.msra.mxu1 %v5129_v43  ;;  %v7397_v23 = vpop.eup %7396  ;;  %v5126_v51 = vpack.c.bf16 %v5099_v0, %v5098_v59  ;;  %v5079_v57 = vmul.f32 0.5, %v5063_v26  ;;  %v5096_v41 = vmul.f32 %v5080_v58, %v9165_v27  ;;  %v5078_v12 = vmul.f32 0.5, %v5062_v34  ;;  %v7195_v26 = vld [vmem:[%s9705_s2 + $0x10] sm:$0xff]   ;;  %v7197_v59 = vld [vmem:[%s9705_s2 + $0x20] sm:$0xff]   ;;  %v7198_v58 = vld [vmem:[%s9705_s2 + $0x28] sm:$0xff]  }
 0xd96   : > { %6946 = vmatprep.subr.bf16.mxu1 %v5128_v8  ;;  %v7399_v21 = vpop.eup %7398  ;;  %v5060_v25 = vadd.f32 1.0, %v7395_v62  ;;  %v5077_v35 = vmul.f32 0.5, %v5061_v22  ;;  %v5059_v17 = vadd.f32 1.0, %v7397_v23  ;;  %v7199_v34 = vld [vmem:[%s9705_s2 + $0x30] sm:$0xff]   ;;  %v7200_v62 = vld [vmem:[%s9705_s2 + $0x38] sm:$0xff]   ;;  %v7201_v23 = vld [vmem:[%s9706_s4] sm:$0xff]  }
 0xd97   : > { %v5125_v63 = vpack.c.bf16 %v5097_v56, %v5096_v41  ;;  %v5095_v29 = vmul.f32 %v5079_v57, %v9188_v1  ;;  %v5094_v44 = vmul.f32 %v5078_v12, %v9198_v30  ;;  %v5058_v47 = vadd.f32 1.0, %v7399_v21 }
 0xd98   : > { %v5076_v15 = vmul.f32 0.5, %v5060_v25  ;;  %v5093_v31 = vmul.f32 %v5077_v35, %v9153_v3  ;;  %v5075_v38 = vmul.f32 0.5, %v5059_v17  ;;  %v7190_v3 = vld [vmem:[%s9704_s8 + $0x8] sm:$0xff]   ;;  %v5143_v42 = vpop.permute.xlu0 %5142  ;;  %s9709_s8 = sand.u32 1, %s7500_s10  }
 0xd99   : > { %6947 = vmatpush3.bf16.msra.mxu1 %v5128_v8  ;;  %v5124_v36 = vpack.c.bf16 %v5095_v29, %v5094_v44  ;;  %v5074_v1 = vmul.f32 0.5, %v5058_v47 }
 0xd9a   : > { %6948 = vmatprep.subr.bf16.mxu1 %v5127_v13  ;;  %v5092_v27 = vmul.f32 %v5076_v15, %v9157_v6  ;;  %v5091_v39 = vmul.f32 %v5075_v38, %v9180_v11  ;;  %v7193_v6 = vld [vmem:[%s9705_s2] sm:$0xff]  }
 0xd9b   : > { %v5090_v30 = vmul.f32 %v5074_v1, %v9178_v49  ;;  %6976 = vmatprep.mubr.msk.bf16.mxu0 %vm1800_vm0, %v7193_v6  ;;  %v5158_v49 = vpop.permute.xlu1 %5157 }
 0xd9c   : > { %v5123_v5 = vpack.c.bf16 %v5093_v31, %v5092_v27  ;;  %v5133_v32 = vpop.permute.xlu0 %5132 }
 0xd9d   : > { %6949 = vmatpush3.bf16.msra.mxu1 %v5127_v13  ;;  %v5122_v14 = vpack.c.bf16 %v5091_v39, %v5090_v30 }
 0xd9e   : > { %6950 = vmatprep.subr.bf16.mxu1 %v5126_v51 }
 0xd9f   : > { %v5148_v4 = vpop.permute.xlu1 %5147 }
 0xda0   : > { %v5368_v57 = vpop.permute.xlu0 %5367 }
 0xda1   : > { %6951 = vmatpush3.bf16.msra.mxu1 %v5126_v51  ;;  %v7205_v51 = vld [vmem:[%s9707_s5] sm:$0xff]   ;;  %s9562_s5 = sand.u32 1, %s7500_s10  }
 0xda2   : > { %6952 = vmatprep.subr.bf16.mxu1 %v5125_v63  ;;  %s6322_s2 = sshll.u32 %s9562_s5, 6 }
 0xda3   : > { %v5138_v61 = vpop.permute.xlu1 %5137 }
 0xda4   : > { %v5358_v21 = vpop.permute.xlu0 %5357 }
 0xda5   : > { %6953 = vmatpush3.bf16.msra.mxu1 %v5125_v63 }
 0xda6   : > { %6954 = vmatprep.subr.bf16.mxu1 %v5124_v36 }
 0xda7   : > { %v9292_v56 = vpop.permute.xlu1 %5372 }
 0xda8   : > { %v5348_v12 = vpop.permute.xlu0 %5347 }
 0xda9   : > { %6955 = vmatpush3.bf16.msra.mxu1 %v5124_v36 }
 0xdaa   : > { %6956 = vmatprep.subr.bf16.mxu1 %v5123_v5 }
 0xdab   : > { %v9294_v22 = vpop.permute.xlu1 %5362 }
 0xdac   : > { %v5338_v63 = vpop.permute.xlu0 %5337 }
 0xdad   : > { %6957 = vmatpush3.bf16.msra.mxu1 %v5123_v5 }
 0xdae   : > { %6958 = vmatprep.subr.bf16.mxu1 %v5122_v14 }
 0xdaf   : > { %v5353_v41 = vpop.permute.xlu1 %5352 }
 0xdb0   : > { %v5328_v15 = vpop.permute.xlu0 %5327 }
 0xdb1   : > { %6959 = vmatpush3.bf16.msra.mxu1 %v5122_v14 }
 0xdb3   : > { %v5343_v25 = vpop.permute.xlu1 %5342 }
 0xdb4   : > { %6961 = vmatmul.mubr.bf16.vlgmr.msra.gmra.mxu1 %v7190_v3  ;;  %v5318_v27 = vpop.permute.xlu0 %5317 }
 0xdb5   : > { %6964 = vmatprep.mubr.bf16.mxu1 %v7191_v9 }
 0xdb7   : > { %v5333_v44 = vpop.permute.xlu1 %5332 }
 0xdb8   : > { %v5308_v3 = vpop.permute.xlu0 %5307 }
 0xdbb   : > { %v5323_v38 = vpop.permute.xlu1 %5322 }
 0xdbc   : > { %6965 = vmatmul.mubr.bf16.gmra.mxu1 %v7192_v10 }
 0xdbd   : > { %7008 = vmatprep.mubr.bf16.mxu1 %v7201_v23 }
 0xdbf   : > { %v5313_v30 = vpop.permute.xlu1 %5312 }
 0xe74   : > { %v6962_v48 = vpop.f32.mrf.mxu1 }
 0xe75   : > { %v5237_v28 = vadd.f32 %v6962_v48, %v5143_v42 }
 0xe76   : > { %v5228_v11 = vpop.f32.mrf.mxu1 }
 0xe77   : > { %v5229_v13 = vadd.f32 %v5228_v11, %v5133_v32 }
 0xe78   : > { %v6963_v46 = vpop.f32.mrf.mxu1 }
 0xe79   : > { %v5240_v19 = vadd.f32 %v6963_v46, %v5148_v4 }
 0xe7a   : > { %v5231_v52 = vpop.f32.mrf.mxu1 }
 0xe7b   : > { %v5292_v37 = vpack.c.bf16 %v5240_v19, %v5237_v28  ;;  %v5232_v50 = vadd.f32 %v5231_v52, %v5138_v61 }
 0xe7c   : > { %v6966_v40 = vpop.f32.mrf.mxu1 }
 0xe7d   : > { %v5253_v60 = vadd.f32 %v6966_v40, %v5163_v20  ;;  %v5291_v0 = vpack.c.bf16 %v5232_v50, %v5229_v13 }
 0xe7e   : > { %v5244_v24 = vpop.f32.mrf.mxu1 }
 0xe7f   : > { %v5245_v33 = vadd.f32 %v5244_v24, %v5153_v7 }
 0xe80   : > { %v6967_v54 = vpop.f32.mrf.mxu1 }
 0xe81   : > { %v5256_v43 = vadd.f32 %v6967_v54, %v5168_v16 }
 0xe82   : > { %v5247_v18 = vpop.f32.mrf.mxu1 }
 0xe83   : > { %v5294_v2 = vpack.c.bf16 %v5256_v43, %v5253_v60  ;;  %v5248_v8 = vadd.f32 %v5247_v18, %v5158_v49  ;;  %v5303_v49 = vpop.permute.xlu1 %5302  ;;  %v5298_v60 = vpop.permute.xlu0 %5297 }
 0xe85   : > { %v5293_v53 = vpack.c.bf16 %v5248_v8, %v5245_v33  ;;  %6968 = vmatprep.subr.bf16.mxu0 %v5294_v2 }
 0xe86   : > { %6969 = vmatpush3.bf16.msra.mxu0 %v5294_v2 }
 0xe87   : > { %6970 = vmatprep.subr.bf16.mxu0 %v5293_v53 }
 0xe8a   : > { %6971 = vmatpush3.bf16.msra.mxu0 %v5293_v53 }
 0xe8b   : > { %6972 = vmatprep.subr.bf16.mxu0 %v5292_v37 }
 0xe8e   : > { %6973 = vmatpush3.bf16.msra.mxu0 %v5292_v37 }
 0xe8f   : > { %6974 = vmatprep.subr.bf16.mxu0 %v5291_v0 }
 0xe92   : > { %6975 = vmatpush3.bf16.msra.mxu0 %v5291_v0 }
 0xe93   : > { %7016 = vmatprep.subr.bf16.mxu0 %v7205_v51 }
 0xe95   : > { %6977 = vmatmul.mubr.msk.bf16.vlgmr.msra.gmra.mxu0 %vm1800_vm0, %v7194_v55 }
 0xe96   : > { %6980 = vmatprep.mubr.msk.bf16.mxu0 %vm1800_vm0, %v7195_v26  ;;  %7017 = vmatpush3.bf16.msra.mxu0 %v7205_v51 }
 0xe9d   : > { %6981 = vmatmul.mubr.msk.bf16.gmra.mxu0 %vm1800_vm0, %v7196_v45 }
 0xe9e   : > { %6984 = vmatprep.mubr.msk.bf16.mxu0 %vm1800_vm0, %v7197_v59 }
 0xea5   : > { %6985 = vmatmul.mubr.msk.bf16.gmra.mxu0 %vm1800_vm0, %v7198_v58 }
 0xea6   : > { %6988 = vmatprep.mubr.msk.bf16.mxu0 %vm1800_vm0, %v7199_v34 }
 0xead   : > { %6989 = vmatmul.mubr.msk.bf16.gmra.mxu0 %vm1800_vm0, %v7200_v62 }
 0xf55   : > { %v6978_v29 = vpop.f32.mrf.mxu0 }
 0xf56   : > { %v9302_v48 = vadd.f32 %v6978_v29, %v5308_v3 }
 0xf57   : > { %v5473_v35 = vpop.f32.mrf.mxu0 }
 0xf58   : > { %v9319_v43 = vmul.f32 %v9302_v48, %v9302_v48  ;;  %v9323_v33 = vadd.f32 %v5473_v35, %v5298_v60 }
 0xf59   : > { %v6979_v17 = vpop.f32.mrf.mxu0 }
 0xf5a   : > { %v9298_v9 = vadd.f32 %v6979_v17, %v5313_v30 }
 0xf5b   : > { %v5476_v47 = vpop.f32.mrf.mxu0 }
 0xf5c   : > { %v5539_v46 = vmul.f32 %v9298_v9, %v9298_v9  ;;  %v9325_v2 = vadd.f32 %v5476_v47, %v5303_v49 }
 0xf5d   : > { %v6982_v36 = vpop.f32.mrf.mxu0 }
 0xf5e   : > { %v9310_v40 = vadd.f32 %v6982_v36, %v5328_v15  ;;  %v9331_v19 = vmul.f32 %v5539_v46, %v9298_v9  ;;  %v5537_v34 = vmul.f32 %v9325_v2, %v9325_v2 }
 0xf5f   : > { %v5489_v31 = vpop.f32.mrf.mxu0 }
 0xf60   : > { %v5542_v50 = vmul.f32 %v9310_v40, %v9310_v40  ;;  %v9343_v55 = vadd.f32 %v5489_v31, %v5318_v27 }
 0xf61   : > { %v6983_v1 = vpop.f32.mrf.mxu0 }
 0xf62   : > { %v9312_v7 = vadd.f32 %v6983_v1, %v5333_v44  ;;  %v5558_v17 = vmul.f32 %v5542_v50, %v9310_v40  ;;  %v5540_v44 = vmul.f32 %v9343_v55, %v9343_v55 }
 0xf63   : > { %v5492_v5 = vpop.f32.mrf.mxu0 }
 0xf64   : > { %v9333_v53 = vadd.f32 %v5492_v5, %v5323_v38  ;;  %v5543_v32 = vmul.f32 %v9312_v7, %v9312_v7  ;;  %v5556_v46 = vmul.f32 %v5540_v44, %v9343_v55 }
 0xf65   : > { %v6986_v39 = vpop.f32.mrf.mxu0 }
 0xf66   : > { %v9296_v14 = vadd.f32 %v6986_v39, %v5348_v12 }
 0xf67   : > { %v5505_v10 = vpop.f32.mrf.mxu0 }
 0xf68   : > { %v5546_v6 = vmul.f32 %v9296_v14, %v9296_v14  ;;  %v9304_v11 = vadd.f32 %v5505_v10, %v5338_v63  ;;  %v5559_v63 = vmul.f32 %v5543_v32, %v9312_v7  ;;  %v5554_v32 = vmul.f32 %v9319_v43, %v9302_v48 }
 0xf69   : > { %v6987_v16 = vpop.f32.mrf.mxu0 }
 0xf6a   : > { %v9306_v20 = vadd.f32 %v6987_v16, %v5353_v41  ;;  %v5562_v24 = vmul.f32 %v5546_v6, %v9296_v14  ;;  %v5544_v8 = vmul.f32 %v9304_v11, %v9304_v11  ;;  %v5575_v30 = vmul.f32 0.044715, %v5559_v63 }
 0xf6b   : > { %v5508_v52 = vpop.f32.mrf.mxu0  ;;  %v5574_v16 = vmul.f32 0.044715, %v5558_v17 }
 0xf6c   : > { %v5547_v54 = vmul.f32 %v9306_v20, %v9306_v20  ;;  %v9321_v4 = vadd.f32 %v5508_v52, %v5343_v25  ;;  %v5578_v13 = vmul.f32 0.044715, %v5562_v24  ;;  %v5560_v62 = vmul.f32 %v5544_v8, %v9304_v11 }
 0xf6d   : > { %v6990_v18 = vpop.f32.mrf.mxu0 }
 0xf6e   : > { %v5563_v42 = vmul.f32 %v5547_v54, %v9306_v20  ;;  %v5545_v28 = vmul.f32 %v9321_v4, %v9321_v4  ;;  %v9337_v61 = vadd.f32 %v6990_v18, %v5368_v57  ;;  %v5541_v57 = vmul.f32 %v9333_v53, %v9333_v53 }
 0xf6f   : > { %v5521_v37 = vpop.f32.mrf.mxu0  ;;  %v5594_v29 = vadd.f32 %v5578_v13, %v9296_v14  ;;  %v5576_v36 = vmul.f32 0.044715, %v5560_v62  ;;  %v5536_v13 = vmul.f32 %v9323_v33, %v9323_v33  ;;  %v5553_v62 = vmul.f32 %v5537_v34, %v9325_v2 }
 0xf70   : > { %v5579_v0 = vmul.f32 0.044715, %v5563_v42  ;;  %v5561_v26 = vmul.f32 %v5545_v28, %v9321_v4  ;;  %v5550_v45 = vmul.f32 %v9337_v61, %v9337_v61  ;;  %v9348_v59 = vadd.f32 %v5521_v37, %v5358_v21 }
 0xf71   : > { %v6991_v58 = vpop.f32.mrf.mxu0  ;;  %v5557_v1 = vmul.f32 %v5541_v57, %v9333_v53  ;;  %v5610_v3 = vmul.f32 0.7978846, %v5594_v29  ;;  %v5592_v24 = vadd.f32 %v5576_v36, %v9304_v11  ;;  %v5591_v28 = vadd.f32 %v5575_v30, %v9312_v7 }
 0xf72   : > { %v5595_v23 = vadd.f32 %v5579_v0, %v9306_v20  ;;  %v9355_v51 = vadd.f32 %v6991_v58, %v9292_v56  ;;  %v5577_v41 = vmul.f32 0.044715, %v5561_v26  ;;  %v5566_v12 = vmul.f32 %v5550_v45, %v9337_v61 }
 0xf73   : > { %v5548_v21 = vmul.f32 %v9348_v59, %v9348_v59  ;;  %v5524_v25 = vpop.f32.mrf.mxu0  ;;  %v5573_v18 = vmul.f32 0.044715, %v5557_v1  ;;  %v5590_v0 = vadd.f32 %v5574_v16, %v9310_v40  ;;  %v5572_v26 = vmul.f32 0.044715, %v5556_v46 }
 0xf74   : > { %v5551_v35 = vmul.f32 %v9355_v51, %v9355_v51  ;;  %v9367_v56 = vadd.f32 %v5524_v25, %v9294_v22  ;;  %v5582_v15 = vmul.f32 0.044715, %v5566_v12  ;;  %v5611_v31 = vmul.f32 0.7978846, %v5595_v23 }
 0xf75   : > { %v5564_v47 = vmul.f32 %v5548_v21, %v9348_v59  ;;  %v5593_v22 = vadd.f32 %v5577_v41, %v9321_v4  ;;  %v5608_v45 = vmul.f32 0.7978846, %v5592_v24  ;;  %v5571_v23 = vmul.f32 0.044715, %v9331_v19 }
 0xf76   : > { %v5567_v38 = vmul.f32 %v5551_v35, %v9355_v51  ;;  %v5549_v27 = vmul.f32 %v9367_v56, %v9367_v56  ;;  %v5598_v5 = vadd.f32 %v5582_v15, %v9337_v61  ;;  %7400 = vtanh.f32 %v5611_v31 }
 0xf77   : > { %v5580_v39 = vmul.f32 0.044715, %v5564_v47  ;;  %v5609_v8 = vmul.f32 0.7978846, %v5593_v22  ;;  %v5607_v57 = vmul.f32 0.7978846, %v5591_v28  ;;  %v5589_v41 = vadd.f32 %v5573_v18, %v9333_v53 }
 0xf78   : > { %v5583_v10 = vmul.f32 0.044715, %v5567_v38  ;;  %v5565_v6 = vmul.f32 %v5549_v27, %v9367_v56  ;;  %v5614_v52 = vmul.f32 0.7978846, %v5598_v5  ;;  %v5552_v43 = vmul.f32 %v5536_v13, %v9323_v33 }
 0xf79   : > { %v5596_v49 = vadd.f32 %v5580_v39, %v9348_v59  ;;  %v5570_v12 = vmul.f32 0.044715, %v5554_v32  ;;  %v5606_v21 = vmul.f32 0.7978846, %v5590_v0  ;;  %v5588_v25 = vadd.f32 %v5572_v26, %v9343_v55 }
 0xf7a   : > { %v5599_v54 = vadd.f32 %v5583_v10, %v9355_v51  ;;  %v5581_v60 = vmul.f32 0.044715, %v5565_v6  ;;  %7402 = vtanh.f32 %v5614_v52  ;;  %v5569_v63 = vmul.f32 0.044715, %v5553_v62 }
 0xf7b   : > { %v5612_v42 = vmul.f32 0.7978846, %v5596_v49  ;;  %7404 = vtanh.f32 %v5610_v3  ;;  %v5587_v29 = vadd.f32 %v5571_v23, %v9298_v9  ;;  %v5605_v35 = vmul.f32 0.7978846, %v5589_v41 }
 0xf7c   : > { %v5615_v37 = vmul.f32 0.7978846, %v5599_v54  ;;  %v5597_v50 = vadd.f32 %v5581_v60, %v9367_v56  ;;  %v5568_v34 = vmul.f32 0.044715, %v5552_v43  ;;  %v5586_v17 = vadd.f32 %v5570_v12, %v9302_v48 }
 0xf7d   : > { %7406 = vtanh.f32 %v5612_v42  ;;  %v5604_v19 = vmul.f32 0.7978846, %v5588_v25  ;;  %v5585_v15 = vadd.f32 %v5569_v63, %v9325_v2  ;;  %v5603_v36 = vmul.f32 0.7978846, %v5587_v29 }
 0xf7e   : > { %7408 = vtanh.f32 %v5615_v37  ;;  %v5613_v58 = vmul.f32 0.7978846, %v5597_v50  ;;  %v5584_v38 = vadd.f32 %v5568_v34, %v9323_v33  ;;  %v5602_v22 = vmul.f32 0.7978846, %v5586_v17 }
 0xf7f   : > { %7410 = vtanh.f32 %v5609_v8  ;;  %v5601_v39 = vmul.f32 0.7978846, %v5585_v15 }
 0xf80   : > { %7412 = vtanh.f32 %v5613_v58  ;;  %v5600_v52 = vmul.f32 0.7978846, %v5584_v38 }
 0xf81   : > { %7414 = vtanh.f32 %v5608_v45 }
 0xf82   : > { %7416 = vtanh.f32 %v5607_v57 }
 0xf83   : > { %7418 = vtanh.f32 %v5606_v21  ;;  %v7401_v44 = vpop.eup %7400 }
 0xf84   : > { %7420 = vtanh.f32 %v5605_v35  ;;  %v5643_v3 = vadd.f32 1.0, %v7401_v44 }
 0xf85   : > { %7422 = vtanh.f32 %v5604_v19 }
 0xf86   : > { %7424 = vtanh.f32 %v5603_v36  ;;  %v5659_v8 = vmul.f32 0.5, %v5643_v3 }
 0xf87   : > { %v7403_v47 = vpop.eup %7402  ;;  %7426 = vtanh.f32 %v5602_v22 }
 0xf88   : > { %v7405_v31 = vpop.eup %7404  ;;  %v5646_v27 = vadd.f32 1.0, %v7403_v47  ;;  %7428 = vtanh.f32 %v5601_v39  ;;  %v5675_v57 = vmul.f32 %v5659_v8, %v9306_v20 }
 0xf89   : > { %v5642_v49 = vadd.f32 1.0, %v7405_v31  ;;  %7430 = vtanh.f32 %v5600_v52 }
 0xf8a   : > { %v7407_v1 = vpop.eup %7406  ;;  %v5662_v16 = vmul.f32 0.5, %v5646_v27 }
 0xf8b   : > { %v7409_v5 = vpop.eup %7408  ;;  %v5644_v30 = vadd.f32 1.0, %v7407_v1  ;;  %v5658_v13 = vmul.f32 0.5, %v5642_v49  ;;  %v7202_v49 = vld [vmem:[%s9706_s4 + $0x8] sm:$0xff]  }
 0xf8c   : > { %v7411_v10 = vpop.eup %7410  ;;  %v5647_v6 = vadd.f32 1.0, %v7409_v5  ;;  %v5678_v42 = vmul.f32 %v5662_v16, %v9337_v61 }
 0xf8d   : > { %v7413_v46 = vpop.eup %7412  ;;  %v5660_v60 = vmul.f32 0.5, %v5644_v30  ;;  %v5641_v50 = vadd.f32 1.0, %v7411_v10 }
 0xf8e   : > { %v5663_v24 = vmul.f32 0.5, %v5647_v6  ;;  %v5645_v54 = vadd.f32 1.0, %v7413_v46  ;;  %v7415_v18 = vpop.eup %7414 }
 0xf8f   : > { %v7417_v32 = vpop.eup %7416  ;;  %v5676_v26 = vmul.f32 %v5660_v60, %v9348_v59  ;;  %v5640_v58 = vadd.f32 1.0, %v7415_v18  ;;  %v5657_v41 = vmul.f32 0.5, %v5641_v50 }
 0xf90   : > { %v5679_v28 = vmul.f32 %v5663_v24, %v9355_v51  ;;  %v5661_v37 = vmul.f32 0.5, %v5645_v54  ;;  %v7419_v62 = vpop.eup %7418  ;;  %v5639_v61 = vadd.f32 1.0, %v7417_v32  ;;  %v5674_v51 = vmul.f32 %v5658_v13, %v9296_v14  ;;  %v7204_v24 = vld [vmem:[%s9706_s4 + $0x18] sm:$0xff]   ;;  %v5712_v54 = vpop.permute.xlu1 %5711 }
 0xf91   : > { %v7421_v43 = vpop.eup %7420  ;;  %v5656_v12 = vmul.f32 0.5, %v5640_v58  ;;  %v5638_v21 = vadd.f32 1.0, %v7419_v62  ;;  %v5673_v59 = vmul.f32 %v5657_v41, %v9321_v4 }
 0xf92   : > { %v5703_v0 = vpack.c.bf16 %v5679_v28, %v5678_v42  ;;  %v5677_v45 = vmul.f32 %v5661_v37, %v9367_v56  ;;  %v7423_v25 = vpop.eup %7422  ;;  %v5701_v63 = vpack.c.bf16 %v5675_v57, %v5674_v51  ;;  %v5655_v56 = vmul.f32 0.5, %v5639_v61 }
 0xf93   : > { %v5637_v29 = vadd.f32 1.0, %v7421_v43  ;;  %v7425_v35 = vpop.eup %7424  ;;  %v5672_v20 = vmul.f32 %v5656_v12, %v9304_v11  ;;  %v5654_v34 = vmul.f32 0.5, %v5638_v21  ;;  %v5636_v17 = vadd.f32 1.0, %v7423_v25 }
 0xf94   : > { %6992 = vmatprep.subr.bf16.mxu1 %v5703_v0  ;;  %v5702_v23 = vpack.c.bf16 %v5677_v45, %v5676_v26  ;;  %v7427_v19 = vpop.eup %7426  ;;  %v5671_v14 = vmul.f32 %v5655_v56, %v9312_v7  ;;  %v5635_v36 = vadd.f32 1.0, %v7425_v35  ;;  %v5722_v18 = vpop.permute.xlu1 %5721  ;;  %v7207_v56 = vld [vmem:[%s7782_s24] sm:$0xff]  }
 0xf95   : > { %6993 = vmatpush3.bf16.msra.mxu1 %v5703_v0  ;;  %v7429_v44 = vpop.eup %7428  ;;  %v5700_v15 = vpack.c.bf16 %v5673_v59, %v5672_v20  ;;  %v5653_v47 = vmul.f32 0.5, %v5637_v29  ;;  %v5670_v4 = vmul.f32 %v5654_v34, %v9310_v40  ;;  %v5652_v38 = vmul.f32 0.5, %v5636_v17  ;;  %v7206_v59 = vld [vmem:[%s7782_s24 + $0x8] sm:$0xff]   ;;  %v6483_v29 = vld [vmem:[%s7777_s14] ss:$0 sm:$0xff] }
 0xf96   : > { %6994 = vmatprep.subr.bf16.mxu1 %v5702_v23  ;;  %v7431_v31 = vpop.eup %7430  ;;  %v5634_v27 = vadd.f32 1.0, %v7427_v19  ;;  %v5651_v11 = vmul.f32 0.5, %v5635_v36  ;;  %v5633_v5 = vadd.f32 1.0, %v7429_v44 }
 0xf97   : > { %v5699_v1 = vpack.c.bf16 %v5671_v14, %v5670_v4  ;;  %v5669_v22 = vmul.f32 %v5653_v47, %v9333_v53  ;;  %v5668_v39 = vmul.f32 %v5652_v38, %v9343_v55  ;;  %v5632_v7 = vadd.f32 1.0, %v7431_v31 }
 0xf98   : > { %v5650_v30 = vmul.f32 0.5, %v5634_v27  ;;  %v5667_v10 = vmul.f32 %v5651_v11, %v9298_v9  ;;  %v5649_v6 = vmul.f32 0.5, %v5633_v5  ;;  %v7203_v9 = vld [vmem:[%s9706_s4 + $0x10] sm:$0xff]   ;;  %s1447_s4 = scalar_lea.vmem [#allocation2], %s6322_s2  ;;  %s6506_s2 = sshll.u32 %s7815_s0, 10 }
 0xf99   : > { %6995 = vmatpush3.bf16.msra.mxu1 %v5702_v23  ;;  %v5698_v3 = vpack.c.bf16 %v5669_v22, %v5668_v39  ;;  %v5648_v53 = vmul.f32 0.5, %v5632_v7  ;;  %s6127_s5 = sshll.u32 %s1447_s4, 4  ;;  %s9492_s0 = scalar_lea.sflag [#allocation3], %s9709_s8  ;;  %s9486_s5 = int_to_ptr.vmem [resolvable:$true] %s6127_s5 }
 0xf9a   : > { %6996 = vmatprep.subr.bf16.mxu1 %v5701_v63  ;;  %v5666_v40 = vmul.f32 %v5650_v30, %v9302_v48  ;;  %v5665_v46 = vmul.f32 %v5649_v6, %v9325_v2  ;;  %v5707_v48 = vpop.permute.xlu0 %5706  ;;  %s7448_s9 = scalar_lea.vmem %s9486_s5, 1024 }
 0xf9b   : > { %v5664_v55 = vmul.f32 %v5648_v53, %v9323_v33  ;;  %v5732_v33 = vpop.permute.xlu1 %5731  ;;  %p7449_p11 = scmp.ne.s32.totalorder %s9486_s5, %s7448_s9 }
 0xf9c   : > { %v5697_v16 = vpack.c.bf16 %v5667_v10, %v5666_v40 }
 0xf9d   : > { %6997 = vmatpush3.bf16.msra.mxu1 %v5701_v63  ;;  %v5696_v52 = vpack.c.bf16 %v5665_v46, %v5664_v55  ;;  %p7450_p12 = pnand %p7449_p11, %p7832_p5 }
 0xf9e   : > { %6998 = vmatprep.subr.bf16.mxu1 %v5700_v15  ;;  %v5717_v2 = vpop.permute.xlu0 %5716 }
 0xf9f   : > { %v5742_v57 = vpop.permute.xlu1 %5741  ;;  %p7451_p13 = pneg %p7450_p12 }
 0xfa1   : > { %6999 = vmatpush3.bf16.msra.mxu1 %v5700_v15 }
 0xfa2   : > { %7000 = vmatprep.subr.bf16.mxu1 %v5699_v1  ;;  %v5727_v26 = vpop.permute.xlu0 %5726 }
 0xfa5   : > { %7001 = vmatpush3.bf16.msra.mxu1 %v5699_v1 }
 0xfa6   : > { %7002 = vmatprep.subr.bf16.mxu1 %v5698_v3  ;;  %v5737_v43 = vpop.permute.xlu0 %5736 }
 0xfa9   : > { %7003 = vmatpush3.bf16.msra.mxu1 %v5698_v3 }
 0xfaa   : > { %7004 = vmatprep.subr.bf16.mxu1 %v5697_v16 }
 0xfad   : > { %7005 = vmatpush3.bf16.msra.mxu1 %v5697_v16 }
 0xfae   : > { %7006 = vmatprep.subr.bf16.mxu1 %v5696_v52 }
 0xfb1   : > { %7007 = vmatpush3.bf16.msra.mxu1 %v5696_v52 }
 0xfb2   : > { %7026 = vmatprep.subr.bf16.mxu1 %v7206_v59 }
 0xfb4   : > { %7009 = vmatmul.mubr.bf16.vlgmr.msra.gmra.mxu1 %v7202_v49 }
 0xfb5   : > { %7012 = vmatprep.mubr.bf16.mxu1 %v7203_v9  ;;  %7027 = vmatpush3.bf16.msra.mxu1 %v7206_v59 }
 0xfb6   : > { %7028 = vmatprep.subr.bf16.mxu1 %v7207_v56 }
 0xfb9   : > { %7029 = vmatpush3.bf16.msra.mxu1 %v7207_v56 }
 0xfbc   : > { %7013 = vmatmul.mubr.bf16.gmra.mxu1 %v7204_v24 }
0x1074   : > { %v7010_v60 = vpop.f32.mrf.mxu1 }
0x1075   : > { %v5811_v13 = vadd.f32 %v7010_v60, %v5717_v2 }
0x1076   : > { %v5802_v8 = vpop.f32.mrf.mxu1 }
0x1077   : > { %v5803_v50 = vadd.f32 %v5802_v8, %v5707_v48 }
0x1078   : > { %v7011_v42 = vpop.f32.mrf.mxu1 }
0x1079   : > { %v5814_v28 = vadd.f32 %v7011_v42, %v5722_v18 }
0x107a   : > { %v5805_v37 = vpop.f32.mrf.mxu1 }
0x107b   : > { %v5806_v32 = vadd.f32 %v5805_v37, %v5712_v54  ;;  %v5837_v58 = vpack.c.bf16 %v5814_v28, %v5811_v13 }
0x107c   : > { %v7014_v0 = vpop.f32.mrf.mxu1 }
0x107d   : > { %v5836_v45 = vpack.c.bf16 %v5806_v32, %v5803_v50  ;;  %v5827_v21 = vadd.f32 %v7014_v0, %v5737_v43 }
0x107e   : > { %v5818_v62 = vpop.f32.mrf.mxu1 }
0x107f   : > { %7018 = vmatprep.mubr.msk.bf16.mxu0 %vm2828_vm1, %v5836_v45  ;;  %v5819_v51 = vadd.f32 %v5818_v62, %v5727_v26 }
0x1080   : > { %v7015_v23 = vpop.f32.mrf.mxu1  ;;  %7019 = vmatmul.mubr.msk.bf16.vlgmr.msra.gmra.mxu0 %vm2828_vm1, %v5837_v58 }
0x1081   : > { %v5830_v41 = vadd.f32 %v7015_v23, %v5742_v57 }
0x1082   : > { %v5821_v61 = vpop.f32.mrf.mxu1 }
0x1083   : > { %v5822_v12 = vadd.f32 %v5821_v61, %v5732_v33  ;;  %v5839_v63 = vpack.c.bf16 %v5830_v41, %v5827_v21 }
0x1085   : > { %v5838_v25 = vpack.c.bf16 %v5822_v12, %v5819_v51 }
0x1087   : > { %7022 = vmatprep.mubr.msk.bf16.mxu0 %vm2828_vm1, %v5838_v25 }
0x1088   : > { %7023 = vmatmul.mubr.msk.bf16.gmra.mxu0 %vm2828_vm1, %v5839_v63 }
0x1140   : > { %v7020_v35 = vpop.f32.mrf.mxu0 }
0x1141   : > { %v9426_v20 = vadd.f32 %v7020_v35, %v6483_v29 }
0x1142   : > { %v5898_v34 = vpop.f32.mrf.mxu0 }
0x1143   : > { %v5931_v17 = vmul.f32 %v9426_v20, %v9426_v20  ;;  %v9430_v19 = vadd.f32 %v6483_v29, %v5898_v34 }
0x1144   : > { %v7021_v44 = vpop.f32.mrf.mxu0 }
0x1145   : > { %v5939_v15 = vmul.f32 %v5931_v17, %v9426_v20  ;;  %v5929_v14 = vmul.f32 %v9430_v19, %v9430_v19  ;;  %v9435_v47 = vadd.f32 %v7021_v44, %v6483_v29 }
0x1146   : > { %v5901_v36 = vpop.f32.mrf.mxu0 }
0x1147   : > { %v5947_v31 = vmul.f32 0.044715, %v5939_v15  ;;  %v5937_v4 = vmul.f32 %v5929_v14, %v9430_v19  ;;  %v5932_v38 = vmul.f32 %v9435_v47, %v9435_v47  ;;  %v9440_v27 = vadd.f32 %v6483_v29, %v5901_v36 }
0x1148   : > { %v7024_v1 = vpop.f32.mrf.mxu0 }
0x1149   : > { %v5955_v22 = vadd.f32 %v5947_v31, %v9426_v20  ;;  %v5945_v11 = vmul.f32 0.044715, %v5937_v4  ;;  %v5940_v5 = vmul.f32 %v5932_v38, %v9435_v47  ;;  %v5930_v39 = vmul.f32 %v9440_v27, %v9440_v27 }
0x114a   : > { %v9446_v30 = vadd.f32 %v7024_v1, %v6483_v29  ;;  %v5914_v7 = vpop.f32.mrf.mxu0 }
0x114b   : > { %v5963_v3 = vmul.f32 0.7978846, %v5955_v22  ;;  %v5953_v10 = vadd.f32 %v5945_v11, %v9430_v19  ;;  %v5948_v6 = vmul.f32 0.044715, %v5940_v5  ;;  %v5938_v40 = vmul.f32 %v5930_v39, %v9440_v27 }
0x114c   : > { %v5935_v53 = vmul.f32 %v9446_v30, %v9446_v30  ;;  %v9452_v16 = vadd.f32 %v6483_v29, %v5914_v7  ;;  %v7025_v46 = vpop.f32.mrf.mxu0 }
0x114d   : > { %v5961_v55 = vmul.f32 0.7978846, %v5953_v10  ;;  %v5956_v52 = vadd.f32 %v5948_v6, %v9435_v47  ;;  %v5946_v49 = vmul.f32 0.044715, %v5938_v40  ;;  %7432 = vtanh.f32 %v5963_v3 }
0x114e   : > { %v5943_v9 = vmul.f32 %v5935_v53, %v9446_v30  ;;  %v5933_v24 = vmul.f32 %v9452_v16, %v9452_v16  ;;  %v5926_v54 = vadd.f32 %v7025_v46, %v6483_v29  ;;  %v5917_v48 = vpop.f32.mrf.mxu0 }
0x114f   : > { %7434 = vtanh.f32 %v5961_v55  ;;  %v5964_v60 = vmul.f32 0.7978846, %v5956_v52  ;;  %v5954_v18 = vadd.f32 %v5946_v49, %v9440_v27  ;;  %v5918_v8 = vadd.f32 %v6483_v29, %v5917_v48  ;;  %v6489_v49 = vld [vmem:[%s9708_s3] ss:$0 sm:$0xff]  ;;  %s9484_s3 = scalar_lea.hbm %s7792_s6, %s6506_s2  ;;  %s7556_s2 = smov [#allocation2]  }
0x1150   : > { %v5951_v2 = vmul.f32 0.044715, %v5943_v9  ;;  %v5941_v42 = vmul.f32 %v5933_v24, %v9452_v16  ;;  %v5936_v28 = vmul.f32 %v5926_v54, %v5926_v54  ;;  %s7452_s12 = sshll.u32 %s7556_s2, 4  ;;  %s7453_s12 = int_to_ptr.vmem [resolvable:$false] %s7452_s12 }
0x1151   : > { %7436 = vtanh.f32 %v5964_v60  ;;  %v5962_v37 = vmul.f32 0.7978846, %v5954_v18  ;;  %v5934_v33 = vmul.f32 %v5918_v8, %v5918_v8  ;;  %s7454_s13 = scalar_lea.vmem %s7453_s12, 2048  ;;  %p7455_p0 = scmp.lt.s32.totalorder %s9486_s5, %s7453_s12 }
0x1152   : > { %v5959_v50 = vadd.f32 %v5951_v2, %v9446_v30  ;;  %v5949_v32 = vmul.f32 0.044715, %v5941_v42  ;;  %v5944_v13 = vmul.f32 %v5936_v28, %v5926_v54  ;;  %p7456_p1 = scmp.lt.s32.totalorder %s7454_s13, %s7448_s9 }
0x1153   : > { %7438 = vtanh.f32 %v5962_v37  ;;  %v5942_v0 = vmul.f32 %v5934_v33, %v5918_v8 }
0x1154   : > { %v5967_v26 = vmul.f32 0.7978846, %v5959_v50  ;;  %v5957_v45 = vadd.f32 %v5949_v32, %v9452_v16  ;;  %v5952_v58 = vmul.f32 0.044715, %v5944_v13  ;;  %p7457_p2 = por %p7456_p1, %p7455_p0 }
0x1155   : > { %v5950_v62 = vmul.f32 0.044715, %v5942_v0 }
0x1156   : > { %7440 = vtanh.f32 %v5967_v26  ;;  %v5965_v23 = vmul.f32 0.7978846, %v5957_v45  ;;  %v5960_v57 = vadd.f32 %v5952_v58, %v5926_v54  ;;  %p7458_p3 = pnand %p7457_p2, %p7451_p13 }
0x1157   : > { %v5958_v41 = vadd.f32 %v5950_v62, %v5918_v8 }
0x1158   : > { %7442 = vtanh.f32 %v5965_v23  ;;  %v5968_v61 = vmul.f32 0.7978846, %v5960_v57 }
0x1159   : > { %v5966_v43 = vmul.f32 0.7978846, %v5958_v41 }
0x115a   : > { %7444 = vtanh.f32 %v5968_v61  ;;  %v7433_v51 = vpop.eup %7432 }
0x115b   : > { %7446 = vtanh.f32 %v5966_v43  ;;  %v5979_v63 = vadd.f32 1.0, %v7433_v51 }
0x115c   : > { %v7435_v12 = vpop.eup %7434 }
0x115d   : > { %v5977_v21 = vadd.f32 1.0, %v7435_v12  ;;  %v5987_v17 = vmul.f32 0.5, %v5979_v63 }
0x115e   : > { %v7437_v25 = vpop.eup %7436 }
0x115f   : > { %v5980_v59 = vadd.f32 1.0, %v7437_v25  ;;  %v5985_v29 = vmul.f32 0.5, %v5977_v21  ;;  %v5995_v38 = vmul.f32 %v5987_v17, %v9426_v20 }
0x1160   : > { %v7439_v56 = vpop.eup %7438 }
0x1161   : > { %v5988_v35 = vmul.f32 0.5, %v5980_v59  ;;  %v5978_v34 = vadd.f32 1.0, %v7439_v56  ;;  %v5993_v31 = vmul.f32 %v5985_v29, %v9430_v19 }
0x1163   : > { %v7441_v44 = vpop.eup %7440  ;;  %v5986_v15 = vmul.f32 0.5, %v5978_v34  ;;  %v5996_v14 = vmul.f32 %v5988_v35, %v9435_v47 }
0x1164   : > { %v5983_v1 = vadd.f32 1.0, %v7441_v44 }
0x1165   : > { %v7443_v36 = vpop.eup %7442  ;;  %v5994_v4 = vmul.f32 %v5986_v15, %v9440_v27  ;;  %v6007_v7 = vpack.c.bf16 %v5996_v14, %v5995_v38 }
0x1166   : > { %v5981_v22 = vadd.f32 1.0, %v7443_v36  ;;  %v5991_v47 = vmul.f32 0.5, %v5983_v1 }
0x1167   : > { %v7445_v11 = vpop.eup %7444  ;;  %v6006_v5 = vpack.c.bf16 %v5994_v4, %v5993_v31 }
0x1168   : > { %v7447_v39 = vpop.eup %7446  ;;  %v5984_v3 = vadd.f32 1.0, %v7445_v11  ;;  %v5989_v10 = vmul.f32 0.5, %v5981_v22  ;;  %v5999_v46 = vmul.f32 %v5991_v47, %v9446_v30 }
0x1169   : > { %v5982_v6 = vadd.f32 1.0, %v7447_v39  ;;  %7030 = vmatprep.mubr.msk.bf16.mxu1 %vm3005_vm2, %v6006_v5 }
0x116a   : > { %v5992_v19 = vmul.f32 0.5, %v5984_v3  ;;  %7031 = vmatmul.mubr.msk.bf16.vlgmr.msra.gmra.mxu1 %vm3005_vm2, %v6007_v7  ;;  %v5997_v40 = vmul.f32 %v5989_v10, %v9452_v16 }
0x116b   : > { %v5990_v27 = vmul.f32 0.5, %v5982_v6 }
0x116c   : > { %v6000_v20 = vmul.f32 %v5992_v19, %v5926_v54 }
0x116d   : > { %v5998_v53 = vmul.f32 %v5990_v27, %v5918_v8 }
0x116e   : > { %v6009_v52 = vpack.c.bf16 %v6000_v20, %v5999_v46 }
0x116f   : > { %v6008_v55 = vpack.c.bf16 %v5998_v53, %v5997_v40 }
0x1171   : > { %7034 = vmatprep.mubr.msk.bf16.mxu1 %vm3005_vm2, %v6008_v55 }
0x1172   : > { %7035 = vmatmul.mubr.msk.bf16.gmra.mxu1 %vm3005_vm2, %v6009_v52 }
0x122a   : > { %v7032_v9 = vpop.f32.mrf.mxu1 }
0x122b   : > { %v6083_v24 = vadd.f32 %v7032_v9, %v6489_v49 }
0x122c   : > { %v6074_v48 = vpop.f32.mrf.mxu1 }
0x122d   : > { %6107 = vst.msk [vmem:[%s1447_s4 + $0x10] sm:$0xff] %vm2828_vm1, %v6083_v24  ;;  %v6075_v16 = vadd.f32 %v6489_v49, %v6074_v48 }
0x122e   : > { %v7033_v54 = vpop.f32.mrf.mxu1 }
0x122f   : > { %6105 = vst.msk [vmem:[%s1447_s4] sm:$0xff] %vm2828_vm1, %v6075_v16  ;;  %v6086_v30 = vadd.f32 %v7033_v54, %v6489_v49 }
0x1230   : > { %v6077_v60 = vpop.f32.mrf.mxu1 }
0x1231   : > { %6108 = vst.msk [vmem:[%s1447_s4 + $0x18] sm:$0xff] %vm2828_vm1, %v6086_v30  ;;  %v6078_v18 = vadd.f32 %v6489_v49, %v6077_v60 }
0x1232   : > { %v7036_v8 = vpop.f32.mrf.mxu1 }
0x1233   : > { %6106 = vst.msk [vmem:[%s1447_s4 + $0x8] sm:$0xff] %vm2828_vm1, %v6078_v18  ;;  %v6099_v2 = vadd.f32 %v7036_v8, %v6489_v49 }
0x1234   : > { %v6090_v42 = vpop.f32.mrf.mxu1 }
0x1235   : > { %6111 = vst.msk [vmem:[%s1447_s4 + $0x30] sm:$0xff] %vm2828_vm1, %v6099_v2  ;;  %v6091_v28 = vadd.f32 %v6489_v49, %v6090_v42 }
0x1236   : > { %v7037_v37 = vpop.f32.mrf.mxu1 }
0x1237   : > { %6109 = vst.msk [vmem:[%s1447_s4 + $0x20] sm:$0xff] %vm2828_vm1, %v6091_v28  ;;  %v6102_v33 = vadd.f32 %v7037_v37, %v6489_v49 }
0x1238   : > { %v6093_v50 = vpop.f32.mrf.mxu1 }
0x1239   : > { %6112 = vst.msk [vmem:[%s1447_s4 + $0x38] sm:$0xff] %vm2828_vm1, %v6102_v33  ;;  %v6094_v32 = vadd.f32 %v6489_v49, %v6093_v50 }
0x123b   : > { %6110 = vst.msk [vmem:[%s1447_s4 + $0x28] sm:$0xff] %vm2828_vm1, %v6094_v32 }
0x123c   : > { %7461 = shalt.err (!%p7458_p3)
}
0x123d   : > { %s7462_s4 = scalar_lea.hbm %s9484_s3, 1024  ;;  %s7466_s8 = scalar_lea.hbm %s7792_s6, 2048 }
0x123e   : > { %p7463_p4 = scmp.ne.s32.totalorder %s9484_s3, %s7462_s4  ;;  %p7467_p9 = scmp.lt.s32.totalorder %s9484_s3, %s7792_s6 }
0x123f   : > { %p7468_p10 = scmp.lt.s32.totalorder %s7466_s8, %s7462_s4 }
0x1240   : > { %p7464_p7 = pnand %p7463_p4, %p7832_p5 }
0x1241   : > { %p7469_p11 = por %p7468_p10, %p7467_p9 }
0x1242   : > { %p7465_p8 = pneg %p7464_p7 }
0x1244   : > { %p7470_p12 = pnand %p7469_p11, %p7465_p8 }
0x1246   : > { %7473 = shalt.err (!%p7470_p12)
}
0x1247   : > { %s7557_s13 = smov 128   ;;  %s7558_s12 = smov 8  }
0x1248   : > { %7038 = dma.vmem_to_hbm [thread:$0]  (%p7832_p5), %s9486_s5, 1024, %s9484_s3, %s9492_s0, %s7557_s13, %s7557_s13, %s7558_s12  }
0x1249 PF: > { %p7044_p13 = scmp.ge.s32.totalorder %s7508_s15, 2  ;;  %s6142_s9 = sand.u32 1, %s7496_s7  }
0x124a   : > { %s6143_s2 = scalar_lea.sflag [#allocation3], %s6142_s9 }
0x124b   : > { %p7041_p0 = pnand %p7044_p13, %p7836_p6 }
0x124d   : > { %p7042_p1 = pneg %p7041_p0 }
0x124f   : > { %7491 = dma.done.wait (%p7042_p1), %s6143_s2, 1024  }
0x1250   : > { %7493 = vsyncadd (%p7042_p1), %s6143_s2, 4294966272  ;;  %p101_p2 = scmp.ge.s32.totalorder %s7819_s18, 4   ;;  %s9710_s7 = smov %s7500_s10 }
0x1251   : > { %s9711_s10 = smov %s7504_s11  ;;  %s9712_s11 = smov %s7830_s26 }
0x1252   : > { %s9713_s15 = smov %s7819_s18  ;;  %103 = sbr.rel (!%p101_p2) target bundleno = 92 (0x5c), region = 304 }
0x1257   :  { %6148 = vsyncpa [#allocation3], 1 }
0x1258   :  { %6150 = vsyncpa [#allocation3 + $0x1], 1 }

</bundles_post_ra>
